<compile_context>
chip_gen: v5e
topology: v5e:2x2
jax: 0.10.0
libtpu: 0.0.40
codegen_flags: <defaults>
</compile_context>

<pallas_src>
import math

import jax
import jax.numpy as jnp
from jax import lax
from jax.experimental import pallas as pl
from jax.experimental.pallas import tpu as pltpu


def _silu(v):
    # f32 in / f32 out.  exp and the approximate reciprocal both run on the EUP
    # slot, keeping the VPU free for the surrounding adds/muls.
    return v * pl.reciprocal(1.0 + jnp.exp(-v), approx=True)


def _leaky(v, slope=0.1):
    return jnp.where(v >= 0.0, v, slope * v)


def bottleneck_csp_kernel(x_ref,
                          w1_ref, b1_ref,
                          mw1_ref, mb1_ref, mw2_ref, mb2_ref,
                          w3_ref, b3_ref,
                          w2p_ref, b2p_ref,
                          w4_ref, b4_ref,
                          out_ref):
    H, W, c1 = x_ref.shape[1], x_ref.shape[2], x_ref.shape[3]
    c2 = out_ref.shape[3]
    n = mw1_ref.shape[0]
    c_ = w1_ref.shape[1]
    N = H * W
    cdt = w1_ref.dtype                      # bf16 matmul-input dtype

    # tokens x channels view of the image (free relayout: W % 8 == 0).
    xf = x_ref[0].reshape(N, c1)                                        # (N, c1) bf16

    # cv1: 1x1 conv (BN folded) + SiLU.  Running activation `y` stays f32.
    y = _silu(jnp.dot(xf, w1_ref[...], preferred_element_type=jnp.float32)
              + b1_ref[...])                                            # (N, c_) f32

    def conv3x3(t_f32, w_ky, bias):
        """SAME 3x3 conv as 3 matmuls with K = 3*c_ (kx taps fused along the
        contraction dim).  Shifts are value-level concats with zero borders:
        no padded scratch, no full zero pass, no misaligned ref stores."""
        t = t_f32.astype(cdt).reshape(H, W, c_)
        zc = jnp.zeros((H, 1, c_), cdt)
        # x-shifted taps fused along channels -> (H, W, 3*c_); 3*c_ <= 128 lanes.
        tx = jnp.concatenate(
            [jnp.concatenate([zc, t[:, :W - 1, :]], axis=1),   # in[y, x-1]  (kx=0)
             t,                                                # in[y, x  ]  (kx=1)
             jnp.concatenate([t[:, 1:, :], zc], axis=1)],      # in[y, x+1]  (kx=2)
            axis=2)
        zr = jnp.zeros((1, W, 3 * c_), cdt)
        p_top = jnp.concatenate([zr, tx[:H - 1]], axis=0)      # in row y-1  (ky=0)
        p_bot = jnp.concatenate([tx[1:], zr], axis=0)          # in row y+1  (ky=2)
        # accumulator initialised by the first dot (no zeros + extra add).
        acc = jnp.dot(p_top.reshape(N, 3 * c_), w_ky(0),
                      preferred_element_type=jnp.float32)
        acc = acc + jnp.dot(tx.reshape(N, 3 * c_), w_ky(1),
                            preferred_element_type=jnp.float32)
        acc = acc + jnp.dot(p_bot.reshape(N, 3 * c_), w_ky(2),
                            preferred_element_type=jnp.float32)
        return acc + bias

    def block(i, y):
        # Bottleneck: y = y + SiLU(conv3x3(SiLU(conv1x1(y))))   (BN folded)
        t = _silu(jnp.dot(y.astype(cdt), mw1_ref[i],
                          preferred_element_type=jnp.float32) + mb1_ref[i])
        return y + _silu(conv3x3(t, lambda ky: mw2_ref[i, ky], mb2_ref[i]))

    if n <= 3:                       # short chains: full unroll (LLO visibility)
        for i in range(n):
            y = block(i, y)
    else:                            # real CSP depths: bound vreg live ranges
        y = lax.fori_loop(0, n, block, y)

    # y1 = cv3(m(cv1(x))), y2 = cv2(x); the standalone BN on cat(y1, y2) is
    # folded into cv3 / cv2 weights wrapper-side.
    y1 = jnp.dot(y.astype(cdt), w3_ref[...],
                 preferred_element_type=jnp.float32) + b3_ref[...]
    y2 = jnp.dot(xf, w2p_ref[...],
                 preferred_element_type=jnp.float32) + b2p_ref[...]

    # cv4(LeakyReLU(BN(cat(y1, y2)))): one matmul via lane concat (2*c_ <= 128).
    z = jnp.concatenate([_leaky(y1), _leaky(y2)], axis=-1).astype(cdt)
    out = _silu(jnp.dot(z, w4_ref[...], preferred_element_type=jnp.float32)
                + b4_ref[...])
    out_ref[0] = out.reshape(H, W, c2).astype(out_ref.dtype)


def bottleneck_csp(x_nhwc, params, out_dtype=jnp.bfloat16):
    B, H, W, c1 = x_nhwc.shape
    c2 = params[-1].shape[-1]        # b4: (1, c2)

    def full_spec(a):
        nd = a.ndim
        return pl.BlockSpec(a.shape, lambda b, _nd=nd: (0,) * _nd)

    in_specs = ([pl.BlockSpec((1, H, W, c1), lambda b: (b, 0, 0, 0))]
                + [full_spec(p) for p in params])

    # TODO(synk): for real YOLO feature-map sizes (e.g. 160x160x128), add an
    # H-tiling grid axis with an n-row halo (whole-image blocks overflow v7x's
    # 64 MiB VMEM); the constant-index weight specs could also use a reduced
    # buffer count there.  The toy 16x16 case fits comfortably as-is.
    return pl.pallas_call(
        bottleneck_csp_kernel,
        out_shape=jax.ShapeDtypeStruct((B, H, W, c2), out_dtype),
        grid_spec=pltpu.PrefetchScalarGridSpec(
            num_scalar_prefetch=0,
            grid=(B,),
            in_specs=in_specs,
            out_specs=pl.BlockSpec((1, H, W, c2), lambda b: (b, 0, 0, 0)),
        ),
        compiler_params=pltpu.CompilerParams(
            dimension_semantics=("parallel",),
            vmem_limit_bytes=48 * 1024 * 1024),
    )(x_nhwc, *params)


if __name__ == "__main__":
    B, c1, c2, H, W, n = 2, 64, 64, 16, 16, 1
    e = 0.5
    c_ = int(c2 * e)
    eps = 1e-5  # PyTorch BatchNorm2d default
    bf16 = jnp.bfloat16

    key = jax.random.PRNGKey(0)
    ks = iter(jax.random.split(key, 32))

    def conv_w_io(k, cin, cout, ksz=1):
        bound = 1.0 / math.sqrt(cin * ksz * ksz)
        if ksz == 1:
            return jax.random.uniform(k, (cin, cout), jnp.float32, -bound, bound)
        return jax.random.uniform(k, (ksz, ksz, cin, cout), jnp.float32, -bound, bound)

    def bn_params(k, c):
        k1, k2, k3, k4 = jax.random.split(k, 4)
        gamma = jax.random.uniform(k1, (c,), jnp.float32, 0.5, 1.5)
        beta = jax.random.uniform(k2, (c,), jnp.float32, -0.5, 0.5)
        mean = 0.1 * jax.random.normal(k3, (c,), jnp.float32)
        var = jax.random.uniform(k4, (c,), jnp.float32, 0.5, 1.5)
        return gamma, beta, mean, var

    # Inputs / parameters (deterministic).
    x_nchw = jax.random.normal(next(ks), (B, c1, H, W), jnp.float32)

    cv1_w = conv_w_io(next(ks), c1, c_, 1);  cv1_bn = bn_params(next(ks), c_)
    m_w1 = [conv_w_io(next(ks), c_, c_, 1) for _ in range(n)]
    m_bn1 = [bn_params(next(ks), c_) for _ in range(n)]
    m_w2 = [conv_w_io(next(ks), c_, c_, 3) for _ in range(n)]
    m_bn2 = [bn_params(next(ks), c_) for _ in range(n)]
    cv3_w = conv_w_io(next(ks), c_, c_, 1)
    cv2p_w = conv_w_io(next(ks), c1, c_, 1)
    bn_mid = bn_params(next(ks), 2 * c_)
    cv4_w = conv_w_io(next(ks), 2 * c_, c2, 1); cv4_bn = bn_params(next(ks), c2)

    # ---- wrapper-side BN folding (exact, eval mode) + bf16 weight casts ----
    def fold_scale(bn):
        g, b, m, v = bn
        s = g / jnp.sqrt(v + eps)
        return s, b - m * s

    s1, sh1 = fold_scale(cv1_bn)
    w1 = (cv1_w * s1[None, :]).astype(bf16)
    b1 = sh1[None, :]

    mw1, mb1, mw2f, mb2 = [], [], [], []
    for i in range(n):
        s, sh = fold_scale(m_bn1[i])
        mw1.append(m_w1[i] * s[None, :]); mb1.append(sh[None, :])
        s, sh = fold_scale(m_bn2[i])
        # fuse the 3 kx taps into the contraction dim: (3, 3, c_, c_) -> (3, 3*c_, c_)
        mw2f.append((m_w2[i] * s[None, None, None, :]).reshape(3, 3 * c_, c_))
        mb2.append(sh[None, :])
    mw1 = jnp.stack(mw1).astype(bf16); mb1 = jnp.stack(mb1)
    mw2f = jnp.stack(mw2f).astype(bf16); mb2 = jnp.stack(mb2)

    # standalone BN on cat(y1, y2): fold halves into cv3 / cv2 (both bias-free).
    s_mid, sh_mid = fold_scale(bn_mid)
    w3 = (cv3_w * s_mid[:c_][None, :]).astype(bf16);  b3 = sh_mid[:c_][None, :]
    w2p = (cv2p_w * s_mid[c_:][None, :]).astype(bf16); b2p = sh_mid[c_:][None, :]

    s4, sh4 = fold_scale(cv4_bn)
    w4 = (cv4_w * s4[None, :]).astype(bf16)    # unsplit: cv4 is one matmul now
    b4 = sh4[None, :]

    params = [w1, b1, mw1, mb1, mw2f, mb2, w3, b3, w2p, b2p, w4, b4]

    # ---- run the Pallas kernel (layout glue NCHW -> NHWC + bf16 cast outside) ----
    x_nhwc = jnp.transpose(x_nchw, (0, 2, 3, 1))
    out = jax.block_until_ready(
        bottleneck_csp(x_nhwc.astype(bf16), params, out_dtype=bf16))
    out = out.astype(jnp.float32)

    # ---- pure-JAX f32 reference mirroring the PyTorch forward (eval mode) ----
    def conv(xx, w_hwio):
        return lax.conv_general_dilated(
            xx, w_hwio, (1, 1), 'SAME',
            dimension_numbers=('NHWC', 'HWIO', 'NHWC'),
            precision=lax.Precision.HIGHEST)

    def conv1(xx, w_io):
        return conv(xx, w_io[None, None])

    def bn_apply(xx, p):
        g, b, m, v = p
        return (xx - m) * (g / jnp.sqrt(v + eps)) + b

    silu = lambda v: v * jax.nn.sigmoid(v)
    leaky = lambda v: jnp.where(v >= 0, v, 0.1 * v)

    y = silu(bn_apply(conv1(x_nhwc, cv1_w), cv1_bn))
    for i in range(n):
        t = silu(bn_apply(conv1(y, m_w1[i]), m_bn1[i]))
        t = silu(bn_apply(conv(t, m_w2[i]), m_bn2[i]))
        y = y + t                      # shortcut (c1 == c2, shortcut=True)
    y1 = conv1(y, cv3_w)
    y2 = conv1(x_nhwc, cv2p_w)
    cat = jnp.concatenate([y1, y2], axis=-1)
    z = leaky(bn_apply(cat, bn_mid))
    ref = silu(bn_apply(conv1(z, cv4_w), cv4_bn))

    # bf16 matmul inputs + bf16 output => looser tolerance than the f32 version.
    err = float(jnp.max(jnp.abs(out - ref)))
    assert jnp.allclose(out, ref, atol=5e-2, rtol=5e-2), err
    print("KERNEL_OK")
</pallas_src>

<mosaic_0001>
module attributes {stable_mosaic.version = 11 : i64} {
  func.func @bottleneck_csp_kernel(%arg0: i32, %arg1: memref<1x16x16x64xbf16, #tpu.memory_space<vmem>>, %arg2: memref<64x32xbf16, #tpu.memory_space<vmem>>, %arg3: memref<1x32xf32, #tpu.memory_space<vmem>>, %arg4: memref<1x32x32xbf16, #tpu.memory_space<vmem>>, %arg5: memref<1x1x32xf32, #tpu.memory_space<vmem>>, %arg6: memref<1x3x96x32xbf16, #tpu.memory_space<vmem>>, %arg7: memref<1x1x32xf32, #tpu.memory_space<vmem>>, %arg8: memref<32x32xbf16, #tpu.memory_space<vmem>>, %arg9: memref<1x32xf32, #tpu.memory_space<vmem>>, %arg10: memref<64x32xbf16, #tpu.memory_space<vmem>>, %arg11: memref<1x32xf32, #tpu.memory_space<vmem>>, %arg12: memref<64x64xbf16, #tpu.memory_space<vmem>>, %arg13: memref<1x64xf32, #tpu.memory_space<vmem>>, %arg14: memref<1x16x16x64xbf16, #tpu.memory_space<vmem>>) attributes {dimension_semantics = [#tpu.dimension_semantics<parallel>], iteration_bounds = array<i64: 2>, scalar_prefetch = 0 : i64, scratch_operands = 0 : i64, tpu.core_type = #tpu.core_type<tc>, window_params = [{transform_indices = @transform_0, window_bounds = array<i64: 1, 16, 16, 64>}, {pipeline_mode = #tpu.pipeline_mode<synchronous>, transform_indices = @transform_1, window_bounds = array<i64: 64, 32>}, {pipeline_mode = #tpu.pipeline_mode<synchronous>, transform_indices = @transform_2, window_bounds = array<i64: 1, 32>}, {pipeline_mode = #tpu.pipeline_mode<synchronous>, transform_indices = @transform_3, window_bounds = array<i64: 1, 32, 32>}, {pipeline_mode = #tpu.pipeline_mode<synchronous>, transform_indices = @transform_4, window_bounds = array<i64: 1, 1, 32>}, {pipeline_mode = #tpu.pipeline_mode<synchronous>, transform_indices = @transform_5, window_bounds = array<i64: 1, 3, 96, 32>}, {pipeline_mode = #tpu.pipeline_mode<synchronous>, transform_indices = @transform_6, window_bounds = array<i64: 1, 1, 32>}, {pipeline_mode = #tpu.pipeline_mode<synchronous>, transform_indices = @transform_7, window_bounds = array<i64: 32, 32>}, {pipeline_mode = #tpu.pipeline_mode<synchronous>, transform_indices = @transform_8, window_bounds = array<i64: 1, 32>}, {pipeline_mode = #tpu.pipeline_mode<synchronous>, transform_indices = @transform_9, window_bounds = array<i64: 64, 32>}, {pipeline_mode = #tpu.pipeline_mode<synchronous>, transform_indices = @transform_10, window_bounds = array<i64: 1, 32>}, {pipeline_mode = #tpu.pipeline_mode<synchronous>, transform_indices = @transform_11, window_bounds = array<i64: 64, 64>}, {pipeline_mode = #tpu.pipeline_mode<synchronous>, transform_indices = @transform_12, window_bounds = array<i64: 1, 64>}, {transform_indices = @transform_13, window_bounds = array<i64: 1, 16, 16, 64>}]} {
    %c0 = arith.constant 0 : index
    %c0_0 = arith.constant 0 : index
    %c0_1 = arith.constant 0 : index
    %c0_2 = arith.constant 0 : index
    %0 = vector.load %arg1[%c0, %c0_0, %c0_1, %c0_2] : memref<1x16x16x64xbf16, #tpu.memory_space<vmem>>, vector<1x16x16x64xbf16>
    %1 = vector.shape_cast %0 : vector<1x16x16x64xbf16> to vector<16x16x64xbf16>
    %2 = vector.shape_cast %1 : vector<16x16x64xbf16> to vector<256x64xbf16>
    %c0_3 = arith.constant 0 : index
    %c0_4 = arith.constant 0 : index
    %3 = vector.load %arg2[%c0_3, %c0_4] : memref<64x32xbf16, #tpu.memory_space<vmem>>, vector<64x32xbf16>
    %cst = arith.constant dense<0.000000e+00> : vector<256x32xf32>
    %4 = tpu.matmul %2, %3, %cst {dimension_numbers = #tpu.dot_dimension_numbers<[1], [0], [0], [1], [0, 0, 1, 1], [], []>} : vector<256x64xbf16>, vector<64x32xbf16>, vector<256x32xf32> -> vector<256x32xf32>
    %c0_5 = arith.constant 0 : index
    %c0_6 = arith.constant 0 : index
    %5 = vector.load %arg3[%c0_5, %c0_6] : memref<1x32xf32, #tpu.memory_space<vmem>>, vector<1x32xf32>
    %6 = vector.broadcast %5 : vector<1x32xf32> to vector<256x32xf32>
    %7 = arith.addf %4, %6 : vector<256x32xf32>
    %cst_7 = arith.constant 0.000000e+00 : f32
    %8 = vector.broadcast %cst_7 : f32 to vector<256x32xf32>
    %9 = arith.subf %8, %7 : vector<256x32xf32>
    %10 = math.exp %9 : vector<256x32xf32>
    %cst_8 = arith.constant 1.000000e+00 : f32
    %11 = vector.broadcast %cst_8 : f32 to vector<256x32xf32>
    %12 = arith.addf %11, %10 : vector<256x32xf32>
    %13 = tpu.reciprocal %12 {approx = true} : vector<256x32xf32> -> vector<256x32xf32>
    %14 = arith.mulf %7, %13 : vector<256x32xf32>
    %15 = arith.truncf %14 : vector<256x32xf32> to vector<256x32xbf16>
    %c0_9 = arith.constant 0 : index
    %c0_10 = arith.constant 0 : index
    %c0_11 = arith.constant 0 : index
    %16 = vector.load %arg4[%c0_9, %c0_10, %c0_11] : memref<1x32x32xbf16, #tpu.memory_space<vmem>>, vector<1x32x32xbf16>
    %17 = vector.shape_cast %16 : vector<1x32x32xbf16> to vector<32x32xbf16>
    %cst_12 = arith.constant dense<0.000000e+00> : vector<256x32xf32>
    %18 = tpu.matmul %15, %17, %cst_12 {dimension_numbers = #tpu.dot_dimension_numbers<[1], [0], [0], [1], [0, 0, 1, 1], [], []>} : vector<256x32xbf16>, vector<32x32xbf16>, vector<256x32xf32> -> vector<256x32xf32>
    %c0_13 = arith.constant 0 : index
    %c0_14 = arith.constant 0 : index
    %c0_15 = arith.constant 0 : index
    %19 = vector.load %arg5[%c0_13, %c0_14, %c0_15] : memref<1x1x32xf32, #tpu.memory_space<vmem>>, vector<1x1x32xf32>
    %20 = vector.shape_cast %19 : vector<1x1x32xf32> to vector<1x32xf32>
    %21 = vector.broadcast %20 : vector<1x32xf32> to vector<256x32xf32>
    %22 = arith.addf %18, %21 : vector<256x32xf32>
    %cst_16 = arith.constant 0.000000e+00 : f32
    %23 = vector.broadcast %cst_16 : f32 to vector<256x32xf32>
    %24 = arith.subf %23, %22 : vector<256x32xf32>
    %25 = math.exp %24 : vector<256x32xf32>
    %cst_17 = arith.constant 1.000000e+00 : f32
    %26 = vector.broadcast %cst_17 : f32 to vector<256x32xf32>
    %27 = arith.addf %26, %25 : vector<256x32xf32>
    %28 = tpu.reciprocal %27 {approx = true} : vector<256x32xf32> -> vector<256x32xf32>
    %29 = arith.mulf %22, %28 : vector<256x32xf32>
    %c0_18 = arith.constant 0 : index
    %c0_19 = arith.constant 0 : index
    %c0_20 = arith.constant 0 : index
    %30 = vector.load %arg7[%c0_18, %c0_19, %c0_20] : memref<1x1x32xf32, #tpu.memory_space<vmem>>, vector<1x1x32xf32>
    %31 = vector.shape_cast %30 : vector<1x1x32xf32> to vector<1x32xf32>
    %32 = arith.truncf %29 : vector<256x32xf32> to vector<256x32xbf16>
    %33 = vector.shape_cast %32 : vector<256x32xbf16> to vector<16x16x32xbf16>
    %cst_21 = arith.constant 0.000000e+00 : bf16
    %34 = vector.broadcast %cst_21 : bf16 to vector<16x1x32xbf16>
    %35 = vector.extract_strided_slice %33 {offsets = [0, 0, 0], sizes = [16, 15, 32], strides = [1, 1, 1]} : vector<16x16x32xbf16> to vector<16x15x32xbf16>
    %36 = tpu.concatenate %34, %35 in 1 : vector<16x1x32xbf16>, vector<16x15x32xbf16> -> vector<16x16x32xbf16>
    %37 = vector.extract_strided_slice %33 {offsets = [0, 1, 0], sizes = [16, 15, 32], strides = [1, 1, 1]} : vector<16x16x32xbf16> to vector<16x15x32xbf16>
    %38 = tpu.concatenate %37, %34 in 1 : vector<16x15x32xbf16>, vector<16x1x32xbf16> -> vector<16x16x32xbf16>
    %39 = tpu.concatenate %36, %33, %38 in 2 : vector<16x16x32xbf16>, vector<16x16x32xbf16>, vector<16x16x32xbf16> -> vector<16x16x96xbf16>
    %cst_22 = arith.constant 0.000000e+00 : bf16
    %40 = vector.broadcast %cst_22 : bf16 to vector<1x16x96xbf16>
    %41 = vector.extract_strided_slice %39 {offsets = [0, 0, 0], sizes = [15, 16, 96], strides = [1, 1, 1]} : vector<16x16x96xbf16> to vector<15x16x96xbf16>
    %42 = tpu.concatenate %40, %41 in 0 : vector<1x16x96xbf16>, vector<15x16x96xbf16> -> vector<16x16x96xbf16>
    %43 = vector.extract_strided_slice %39 {offsets = [1, 0, 0], sizes = [15, 16, 96], strides = [1, 1, 1]} : vector<16x16x96xbf16> to vector<15x16x96xbf16>
    %44 = tpu.concatenate %43, %40 in 0 : vector<15x16x96xbf16>, vector<1x16x96xbf16> -> vector<16x16x96xbf16>
    %45 = vector.shape_cast %42 : vector<16x16x96xbf16> to vector<256x96xbf16>
    %c0_23 = arith.constant 0 : index
    %c0_24 = arith.constant 0 : index
    %c0_25 = arith.constant 0 : index
    %c0_26 = arith.constant 0 : index
    %46 = vector.load %arg6[%c0_23, %c0_24, %c0_25, %c0_26] : memref<1x3x96x32xbf16, #tpu.memory_space<vmem>>, vector<1x1x96x32xbf16>
    %47 = vector.shape_cast %46 : vector<1x1x96x32xbf16> to vector<96x32xbf16>
    %cst_27 = arith.constant dense<0.000000e+00> : vector<256x32xf32>
    %48 = tpu.matmul %45, %47, %cst_27 {dimension_numbers = #tpu.dot_dimension_numbers<[1], [0], [0], [1], [0, 0, 1, 1], [], []>} : vector<256x96xbf16>, vector<96x32xbf16>, vector<256x32xf32> -> vector<256x32xf32>
    %49 = vector.shape_cast %39 : vector<16x16x96xbf16> to vector<256x96xbf16>
    %c0_28 = arith.constant 0 : index
    %c1 = arith.constant 1 : index
    %c0_29 = arith.constant 0 : index
    %c0_30 = arith.constant 0 : index
    %50 = vector.load %arg6[%c0_28, %c1, %c0_29, %c0_30] : memref<1x3x96x32xbf16, #tpu.memory_space<vmem>>, vector<1x1x96x32xbf16>
    %51 = vector.shape_cast %50 : vector<1x1x96x32xbf16> to vector<96x32xbf16>
    %cst_31 = arith.constant dense<0.000000e+00> : vector<256x32xf32>
    %52 = tpu.matmul %49, %51, %cst_31 {dimension_numbers = #tpu.dot_dimension_numbers<[1], [0], [0], [1], [0, 0, 1, 1], [], []>} : vector<256x96xbf16>, vector<96x32xbf16>, vector<256x32xf32> -> vector<256x32xf32>
    %53 = arith.addf %48, %52 : vector<256x32xf32>
    %54 = vector.shape_cast %44 : vector<16x16x96xbf16> to vector<256x96xbf16>
    %c0_32 = arith.constant 0 : index
    %c2 = arith.constant 2 : index
    %c0_33 = arith.constant 0 : index
    %c0_34 = arith.constant 0 : index
    %55 = vector.load %arg6[%c0_32, %c2, %c0_33, %c0_34] : memref<1x3x96x32xbf16, #tpu.memory_space<vmem>>, vector<1x1x96x32xbf16>
    %56 = vector.shape_cast %55 : vector<1x1x96x32xbf16> to vector<96x32xbf16>
    %cst_35 = arith.constant dense<0.000000e+00> : vector<256x32xf32>
    %57 = tpu.matmul %54, %56, %cst_35 {dimension_numbers = #tpu.dot_dimension_numbers<[1], [0], [0], [1], [0, 0, 1, 1], [], []>} : vector<256x96xbf16>, vector<96x32xbf16>, vector<256x32xf32> -> vector<256x32xf32>
    %58 = arith.addf %53, %57 : vector<256x32xf32>
    %59 = vector.broadcast %31 : vector<1x32xf32> to vector<256x32xf32>
    %60 = arith.addf %58, %59 : vector<256x32xf32>
    %cst_36 = arith.constant 0.000000e+00 : f32
    %61 = vector.broadcast %cst_36 : f32 to vector<256x32xf32>
    %62 = arith.subf %61, %60 : vector<256x32xf32>
    %63 = math.exp %62 : vector<256x32xf32>
    %cst_37 = arith.constant 1.000000e+00 : f32
    %64 = vector.broadcast %cst_37 : f32 to vector<256x32xf32>
    %65 = arith.addf %64, %63 : vector<256x32xf32>
    %66 = tpu.reciprocal %65 {approx = true} : vector<256x32xf32> -> vector<256x32xf32>
    %67 = arith.mulf %60, %66 : vector<256x32xf32>
    %68 = arith.addf %14, %67 : vector<256x32xf32>
    %69 = arith.truncf %68 : vector<256x32xf32> to vector<256x32xbf16>
    %c0_38 = arith.constant 0 : index
    %c0_39 = arith.constant 0 : index
    %70 = vector.load %arg8[%c0_38, %c0_39] : memref<32x32xbf16, #tpu.memory_space<vmem>>, vector<32x32xbf16>
    %cst_40 = arith.constant dense<0.000000e+00> : vector<256x32xf32>
    %71 = tpu.matmul %69, %70, %cst_40 {dimension_numbers = #tpu.dot_dimension_numbers<[1], [0], [0], [1], [0, 0, 1, 1], [], []>} : vector<256x32xbf16>, vector<32x32xbf16>, vector<256x32xf32> -> vector<256x32xf32>
    %c0_41 = arith.constant 0 : index
    %c0_42 = arith.constant 0 : index
    %72 = vector.load %arg9[%c0_41, %c0_42] : memref<1x32xf32, #tpu.memory_space<vmem>>, vector<1x32xf32>
    %73 = vector.broadcast %72 : vector<1x32xf32> to vector<256x32xf32>
    %74 = arith.addf %71, %73 : vector<256x32xf32>
    %c0_43 = arith.constant 0 : index
    %c0_44 = arith.constant 0 : index
    %75 = vector.load %arg10[%c0_43, %c0_44] : memref<64x32xbf16, #tpu.memory_space<vmem>>, vector<64x32xbf16>
    %cst_45 = arith.constant dense<0.000000e+00> : vector<256x32xf32>
    %76 = tpu.matmul %2, %75, %cst_45 {dimension_numbers = #tpu.dot_dimension_numbers<[1], [0], [0], [1], [0, 0, 1, 1], [], []>} : vector<256x64xbf16>, vector<64x32xbf16>, vector<256x32xf32> -> vector<256x32xf32>
    %c0_46 = arith.constant 0 : index
    %c0_47 = arith.constant 0 : index
    %77 = vector.load %arg11[%c0_46, %c0_47] : memref<1x32xf32, #tpu.memory_space<vmem>>, vector<1x32xf32>
    %78 = vector.broadcast %77 : vector<1x32xf32> to vector<256x32xf32>
    %79 = arith.addf %76, %78 : vector<256x32xf32>
    %cst_48 = arith.constant 0.000000e+00 : f32
    %80 = vector.broadcast %cst_48 : f32 to vector<256x32xf32>
    %81 = arith.cmpf oge, %74, %80 : vector<256x32xf32>
    %cst_49 = arith.constant 1.000000e-01 : f32
    %82 = vector.broadcast %cst_49 : f32 to vector<256x32xf32>
    %83 = arith.mulf %82, %74 : vector<256x32xf32>
    %84 = arith.select %81, %74, %83 : vector<256x32xi1>, vector<256x32xf32>
    %cst_50 = arith.constant 0.000000e+00 : f32
    %85 = vector.broadcast %cst_50 : f32 to vector<256x32xf32>
    %86 = arith.cmpf oge, %79, %85 : vector<256x32xf32>
    %cst_51 = arith.constant 1.000000e-01 : f32
    %87 = vector.broadcast %cst_51 : f32 to vector<256x32xf32>
    %88 = arith.mulf %87, %79 : vector<256x32xf32>
    %89 = arith.select %86, %79, %88 : vector<256x32xi1>, vector<256x32xf32>
    %90 = tpu.concatenate %84, %89 in 1 : vector<256x32xf32>, vector<256x32xf32> -> vector<256x64xf32>
    %91 = arith.truncf %90 : vector<256x64xf32> to vector<256x64xbf16>
    %c0_52 = arith.constant 0 : index
    %c0_53 = arith.constant 0 : index
    %92 = vector.load %arg12[%c0_52, %c0_53] : memref<64x64xbf16, #tpu.memory_space<vmem>>, vector<64x64xbf16>
    %cst_54 = arith.constant dense<0.000000e+00> : vector<256x64xf32>
    %93 = tpu.matmul %91, %92, %cst_54 {dimension_numbers = #tpu.dot_dimension_numbers<[1], [0], [0], [1], [0, 0, 1, 1], [], []>} : vector<256x64xbf16>, vector<64x64xbf16>, vector<256x64xf32> -> vector<256x64xf32>
    %c0_55 = arith.constant 0 : index
    %c0_56 = arith.constant 0 : index
    %94 = vector.load %arg13[%c0_55, %c0_56] : memref<1x64xf32, #tpu.memory_space<vmem>>, vector<1x64xf32>
    %95 = vector.broadcast %94 : vector<1x64xf32> to vector<256x64xf32>
    %96 = arith.addf %93, %95 : vector<256x64xf32>
    %cst_57 = arith.constant 0.000000e+00 : f32
    %97 = vector.broadcast %cst_57 : f32 to vector<256x64xf32>
    %98 = arith.subf %97, %96 : vector<256x64xf32>
    %99 = math.exp %98 : vector<256x64xf32>
    %cst_58 = arith.constant 1.000000e+00 : f32
    %100 = vector.broadcast %cst_58 : f32 to vector<256x64xf32>
    %101 = arith.addf %100, %99 : vector<256x64xf32>
    %102 = tpu.reciprocal %101 {approx = true} : vector<256x64xf32> -> vector<256x64xf32>
    %103 = arith.mulf %96, %102 : vector<256x64xf32>
    %104 = vector.shape_cast %103 : vector<256x64xf32> to vector<16x16x64xf32>
    %105 = arith.truncf %104 : vector<16x16x64xf32> to vector<16x16x64xbf16>
    %c0_59 = arith.constant 0 : index
    %c0_60 = arith.constant 0 : index
    %c0_61 = arith.constant 0 : index
    %c0_62 = arith.constant 0 : index
    %106 = vector.load %arg14[%c0_59, %c0_60, %c0_61, %c0_62] : memref<1x16x16x64xbf16, #tpu.memory_space<vmem>>, vector<1x16x16x64xbf16>
    %107 = vector.shape_cast %106 : vector<1x16x16x64xbf16> to vector<16x16x64xbf16>
    %108 = vector.shape_cast %105 : vector<16x16x64xbf16> to vector<1x16x16x64xbf16>
    tpu.vector_store %arg14[%c0_59, %c0_60, %c0_61, %c0_62], %108 {strides = array<i32>} : memref<1x16x16x64xbf16, #tpu.memory_space<vmem>>, vector<1x16x16x64xbf16>,
    return
  }
  func.func @transform_0(%arg0: i32) -> (i32, i32, i32, i32) {
    %c0_i32 = arith.constant 0 : i32
    %c0_i32_0 = arith.constant 0 : i32
    %c0_i32_1 = arith.constant 0 : i32
    %c0_i32_2 = arith.constant 0 : i32
    return %arg0, %c0_i32, %c0_i32_0, %c0_i32_1 : i32, i32, i32, i32
  }
  func.func @transform_1(%arg0: i32) -> (i32, i32) {
    %c0_i32 = arith.constant 0 : i32
    %c0_i32_0 = arith.constant 0 : i32
    %c0_i32_1 = arith.constant 0 : i32
    return %c0_i32, %c0_i32_0 : i32, i32
  }
  func.func @transform_2(%arg0: i32) -> (i32, i32) {
    %c0_i32 = arith.constant 0 : i32
    %c0_i32_0 = arith.constant 0 : i32
    %c0_i32_1 = arith.constant 0 : i32
    return %c0_i32, %c0_i32_0 : i32, i32
  }
  func.func @transform_3(%arg0: i32) -> (i32, i32, i32) {
    %c0_i32 = arith.constant 0 : i32
    %c0_i32_0 = arith.constant 0 : i32
    %c0_i32_1 = arith.constant 0 : i32
    %c0_i32_2 = arith.constant 0 : i32
    return %c0_i32, %c0_i32_0, %c0_i32_1 : i32, i32, i32
  }
  func.func @transform_4(%arg0: i32) -> (i32, i32, i32) {
    %c0_i32 = arith.constant 0 : i32
    %c0_i32_0 = arith.constant 0 : i32
    %c0_i32_1 = arith.constant 0 : i32
    %c0_i32_2 = arith.constant 0 : i32
    return %c0_i32, %c0_i32_0, %c0_i32_1 : i32, i32, i32
  }
  func.func @transform_5(%arg0: i32) -> (i32, i32, i32, i32) {
    %c0_i32 = arith.constant 0 : i32
    %c0_i32_0 = arith.constant 0 : i32
    %c0_i32_1 = arith.constant 0 : i32
    %c0_i32_2 = arith.constant 0 : i32
    %c0_i32_3 = arith.constant 0 : i32
    return %c0_i32, %c0_i32_0, %c0_i32_1, %c0_i32_2 : i32, i32, i32, i32
  }
  func.func @transform_6(%arg0: i32) -> (i32, i32, i32) {
    %c0_i32 = arith.constant 0 : i32
    %c0_i32_0 = arith.constant 0 : i32
    %c0_i32_1 = arith.constant 0 : i32
    %c0_i32_2 = arith.constant 0 : i32
    return %c0_i32, %c0_i32_0, %c0_i32_1 : i32, i32, i32
  }
  func.func @transform_7(%arg0: i32) -> (i32, i32) {
    %c0_i32 = arith.constant 0 : i32
    %c0_i32_0 = arith.constant 0 : i32
    %c0_i32_1 = arith.constant 0 : i32
    return %c0_i32, %c0_i32_0 : i32, i32
  }
  func.func @transform_8(%arg0: i32) -> (i32, i32) {
    %c0_i32 = arith.constant 0 : i32
    %c0_i32_0 = arith.constant 0 : i32
    %c0_i32_1 = arith.constant 0 : i32
    return %c0_i32, %c0_i32_0 : i32, i32
  }
  func.func @transform_9(%arg0: i32) -> (i32, i32) {
    %c0_i32 = arith.constant 0 : i32
    %c0_i32_0 = arith.constant 0 : i32
    %c0_i32_1 = arith.constant 0 : i32
    return %c0_i32, %c0_i32_0 : i32, i32
  }
  func.func @transform_10(%arg0: i32) -> (i32, i32) {
    %c0_i32 = arith.constant 0 : i32
    %c0_i32_0 = arith.constant 0 : i32
    %c0_i32_1 = arith.constant 0 : i32
    return %c0_i32, %c0_i32_0 : i32, i32
  }
  func.func @transform_11(%arg0: i32) -> (i32, i32) {
    %c0_i32 = arith.constant 0 : i32
    %c0_i32_0 = arith.constant 0 : i32
    %c0_i32_1 = arith.constant 0 : i32
    return %c0_i32, %c0_i32_0 : i32, i32
  }
  func.func @transform_12(%arg0: i32) -> (i32, i32) {
    %c0_i32 = arith.constant 0 : i32
    %c0_i32_0 = arith.constant 0 : i32
    %c0_i32_1 = arith.constant 0 : i32
    return %c0_i32, %c0_i32_0 : i32, i32
  }
  func.func @transform_13(%arg0: i32) -> (i32, i32, i32, i32) {
    %c0_i32 = arith.constant 0 : i32
    %c0_i32_0 = arith.constant 0 : i32
    %c0_i32_1 = arith.constant 0 : i32
    %c0_i32_2 = arith.constant 0 : i32
    return %arg0, %c0_i32, %c0_i32_0, %c0_i32_1 : i32, i32, i32, i32
  }
}

</mosaic_0001>

<bundles_post_ra>
// kernel: tpu_custom_call.1
= control target key start
LH: loop header
LB: loop body
LE: loop exit
PB: predicated region body
PF: predicated region fallthrough
CT: control target
= control target key end

     0   :  { %s6263_s0 = inlined_call_operand.hbm [shape: bf16[2,16,16,64], index: 0, kind: input, shape index: {}]   ;;  %s6264_s1 = inlined_call_operand.vmem [shape: bf16[64,32], index: 1, kind: input, shape index: {}]   ;;  %s6265_s2 = inlined_call_operand.vmem [shape: f32[1,32], index: 2, kind: input, shape index: {}]   ;;  %s6266_s3 = inlined_call_operand.vmem [shape: bf16[1,32,32], index: 3, kind: input, shape index: {}]   ;;  %s6267_s4 = inlined_call_operand.vmem [shape: f32[1,1,32], index: 4, kind: input, shape index: {}]   ;;  %s6268_s5 = inlined_call_operand.vmem [shape: bf16[1,3,96,32], index: 5, kind: input, shape index: {}]   ;;  %s6269_s6 = inlined_call_operand.vmem [shape: f32[1,1,32], index: 6, kind: input, shape index: {}]   ;;  %s6270_s7 = inlined_call_operand.vmem [shape: bf16[32,32], index: 7, kind: input, shape index: {}]   ;;  %s6271_s8 = inlined_call_operand.vmem [shape: f32[1,32], index: 8, kind: input, shape index: {}]   ;;  %s6272_s9 = inlined_call_operand.vmem [shape: bf16[64,32], index: 9, kind: input, shape index: {}]   ;;  %s6273_s10 = inlined_call_operand.vmem [shape: f32[1,32], index: 10, kind: input, shape index: {}]   ;;  %s6274_s11 = inlined_call_operand.vmem [shape: bf16[64,64], index: 11, kind: input, shape index: {}]   ;;  %s6275_s12 = inlined_call_operand.vmem [shape: f32[1,64], index: 12, kind: input, shape index: {}]   ;;  %s6276_s13 = inlined_call_operand.hbm [shape: bf16[2,16,16,64], index: 13, kind: output, shape index: {}]  }
   0x1   :  { %6287 = sst [smem:[#allocation15_spill]] %s6276_s13 }
   0x2   :  { %18 = vsyncpa [#allocation3], 0 }
   0x3   :  { %20 = vsyncpa [#allocation3 + $0x1], 0 }
   0x4   :  { %21 = vsyncpa [#allocation4], 0 }
   0x5   :  { %23 = vsyncpa [#allocation4 + $0x1], 0  ;;  %s4977_s25 = smov 0   ;;  %s4979_s26 = smov 0  }
   0x6   :  { %s4981_s27 = smov 0   ;;  %s4983_s28 = smov 0  }
   0x7 LB: > { %6288 = sst [smem:[#allocation8_spill]] %s4887_s25  ;;  %s4998_s29 = sadd.s32 4294967295, %s4899_s28   ;;  %s4899_s28 = sphi %s4983_s28, %s6311_s28   ;;  %s4895_s27 = sphi %s4981_s27, %s6313_s27   ;;  %s4891_s26 = sphi %s4979_s26, %s6315_s26   ;;  %s4887_s25 = sphi %s4977_s25, %s6314_s25  }
   0x8   : > { %6289 = sst [smem:[#allocation9_spill]] %s4895_s27  ;;  %s3718_s30 = sadd.s32 4294967294, %s4899_s28  }
   0x9   : > { %s5002_s14 = sadd.s32 1, %s4899_s28   ;;  %s36_s15 = sadd.s32 1, %s4895_s27 }
   0xa   : > { %6290 = sst [smem:[#allocation10_spill]] %s5002_s14  ;;  %s33_s16 = ssub.s32 %s4899_s28, %s5002_s14 }
   0xb   : > { %p43_p0 = scmp.ne.s32.totalorder %s4895_s27, %s4891_s26  ;;  %p34_p1 = scmp.eq.s32.totalorder %s33_s16, 0 }
   0xc   : > { %p44_p2 = scmp.eq.s32.totalorder %s4899_s28, 0  ;;  %p49_p3 = scmp.ne.s32.totalorder %s4891_s26, %s4887_s25 }
   0xd   : > { %p50_p4 = scmp.eq.s32.totalorder %s4998_s29, 0  ;;  %p325_p7 = scmp.eq.s32.totalorder %s4998_s29, 1 }
   0xe   : > { %s5014_s17 = scalar_select %p34_p1, %s4895_s27, %s36_s15  }
   0xf   : > { %p5016_p5 = por %p44_p2, %p43_p0  ;;  %p5020_p6 = por %p50_p4, %p49_p3 }
  0x10   : > { %6291 = sst [smem:[#allocation11_spill]] %s5014_s17  ;;  %p331_p8 = scmp.eq.s32.totalorder %s3718_s30, 1 }
  0x11   : > { %p4146_p10 = scmp.lt.s32.totalorder %s4899_s28, 2  ;;  %p5027_p11 = por %p325_p7, %p43_p0 }
  0x12   : > { %p5031_p12 = por %p331_p8, %p49_p3  ;;  %s387_s22 = sand.u32 1, %s4895_s27  }
  0x13   : > { %s6294_s20 = scalar_select %p5027_p11, 1, 0 }
  0x14   : > { %s6296_s21 = scalar_select %p5031_p12, 1, 0 }
  0x15   : > { %6295 = sst [smem:[#allocation12_spill]] %s6294_s20  ;;  %s4082_s23 = sshll.u32 %s4899_s28, 7 }
  0x16   : > { %6297 = sst [smem:[#allocation13_spill]] %s6296_s21  ;;  %s3721_s24 = sshll.u32 %s387_s22, 7 }
  0x17   : > { %s396_s17 = scalar_lea.hbm %s6263_s0, %s4082_s23  ;;  %s391_s30 = scalar_lea.vmem [#allocation2], %s3721_s24 }
  0x18   : > { %s397_s14 = sshll.u32 %s396_s17, 4  ;;  %s399_s25 = sshll.u32 %s391_s30, 4  ;;  %s398_s14 = int_to_ptr.hbm [resolvable:$true] %s397_s14  ;;  %s400_s25 = int_to_ptr.vmem [resolvable:$true] %s399_s25 }
  0x19   : > { %p5042_p13 = pnand %p4146_p10, %p5016_p5  ;;  %p3724_p0 = scmp.ge.s32.totalorder %s4899_s28, 1 }
  0x1a   : > { %p407_p1 = scmp.lt.s32.totalorder %s4899_s28, 3  ;;  %s388_s27 = scalar_lea.sflag [#allocation3], %s387_s22 }
  0x1b   : > { %s4803_s21 = sshra.s32 %s398_s14, 4  ;;  %p4807_p3 = pneg %p5042_p13  ;;  %s4804_s21 = int_to_ptr.hbm [resolvable:$true] %s4803_s21 }
  0x1c   : > { %s4805_s20 = scalar_lea.hbm %s4804_s21, 128  ;;  %s4810_s18 = scalar_lea.hbm %s6263_s0, 256 }
  0x1d   : > { %p4806_p2 = scmp.ne.s32.totalorder %s4804_s21, %s4805_s20  ;;  %p4811_p5 = scmp.lt.s32.totalorder %s4804_s21, %s6263_s0 }
  0x1e   : > { %p4812_p8 = scmp.lt.s32.totalorder %s4810_s18, %s4805_s20 }
  0x1f   : > { %p4808_p4 = pnand %p4807_p3, %p4806_p2 }
  0x20   : > { %p4813_p10 = por %p4812_p8, %p4811_p5 }
  0x21   : > { %p4809_p7 = pneg %p4808_p4 }
  0x23   : > { %p4814_p9 = pnand %p4813_p10, %p4809_p7 }
  0x25   : > { %4817 = shalt.err (!%p4814_p9)
}
  0x26   : > { %s4901_s22 = smov 64   ;;  %s4902_s16 = smov 4  }
  0x27   : > { %4141 = dma.hbm_to_vmem [thread:$0]  (!%p5042_p13), %s398_s14, 2048, %s400_s25, %s388_s27, %s4901_s22, %s4901_s22, %s4902_s16  }
  0x28   : > { %p408_p2 = pnand %p3724_p0, %p407_p1 }
  0x2a   : > { %411 = sbr.rel (%p408_p2) target bundleno = 1450 (0x5aa), region = 72 }
  0x2f   : > { %s5063_s30 = sand.u32 1, %s4891_s26  }
  0x30   : > { %s3725_s20 = sshll.u32 %s5063_s30, 7  ;;  %s414_s21 = scalar_lea.sflag [#allocation3], %s5063_s30 }
  0x31   : > { %s5069_s17 = scalar_lea.vmem [#allocation2], %s3725_s20 }
  0x32   : > { %4878 = dma.done.wait (%p5020_p6), %s414_s21, 2048  }
  0x33   : > { %4880 = vsyncadd (%p5020_p6), %s414_s21, 4294965248  ;;  %v4102_v0 = vld [vmem:[%s6264_s1 + $0x18] sm:$0xff]  ;;  %v4101_v1 = vld [vmem:[%s6264_s1 + $0x10] sm:$0xff]  ;;  %vm610_vm0 = vcmask 523264   ;;  %vm976_vm1 = vcmask 261120   ;;  %s4903_s23 = smov 32  }
  0x34   : > { %663 = vmatpush.bf16.msra.mxu0 %v4102_v0  ;;  %v4100_v2 = vld [vmem:[%s6264_s1 + $0x8] sm:$0xff]  ;;  %v4099_v3 = vld [vmem:[%s6264_s1] sm:$0xff]  ;;  %v4085_v6 = vld [vmem:[%s5069_s17 + $0x10] sm:$0xff]  ;;  %vm1614_vm2 = vcmask 1047552   ;;  %vm1615_vm3 = vsmask.f32 7424 }
  0x35   : > { %v4083_v4 = vld [vmem:[%s5069_s17] sm:$0xff]  ;;  %v4084_v5 = vld [vmem:[%s5069_s17 + $0x8] sm:$0xff]  ;;  %v4086_v7 = vld [vmem:[%s5069_s17 + $0x18] sm:$0xff]  ;;  %s4904_s18 = smov 64   ;;  %vm1547_vm5 = vcmask 1040384   ;;  %vm1854_vm8 = vcmask 785408  }
  0x36   : > { %v4087_v8 = vld [vmem:[%s5069_s17 + $0x20] sm:$0xff]  ;;  %v4088_v9 = vld [vmem:[%s5069_s17 + $0x28] sm:$0xff]  ;;  %v4089_v10 = vld [vmem:[%s5069_s17 + $0x30] sm:$0xff]  ;;  %vm1548_vm6 = vsmask.f32 256  ;;  %s4133_s27 = sshll.u32 %s4998_s29, 7 }
  0x37   : > { %v4090_v11 = vld [vmem:[%s5069_s17 + $0x38] sm:$0xff]  ;;  %v4104_v12 = vld [vmem:[%s6266_s3 + $0x8] sm:$0xff]  ;;  %v5109_v13 = vld [vmem:[%s6265_s2] ss:$0 sm:$0xff]  ;;  %s6307_s15 = sld [smem:[#allocation15_spill]] }
  0x38   : > { %664 = vmatpush.bf16.msra.mxu0 %v4101_v1  ;;  %1031 = vmatpush.bf16.msra.mxu1 %v4104_v12  ;;  %v4103_v14 = vld [vmem:[%s6266_s3] sm:$0xff]  ;;  %v4092_v25 = vld [vmem:[%s5069_s17 + $0x48] sm:$0xff]  ;;  %v4093_v42 = vld [vmem:[%s5069_s17 + $0x50] sm:$0xff] }
  0x39   : > { %v4091_v15 = vld [vmem:[%s5069_s17 + $0x40] sm:$0xff]  ;;  %v4094_v60 = vld [vmem:[%s5069_s17 + $0x58] sm:$0xff]  ;;  %vm5274_vm4 = vmand %vm1614_vm2, %vm1615_vm3 }
  0x3a   : > { %vm5516_vm7 = vmand %vm1547_vm5, %vm1548_vm6 }
  0x3c   : > { %665 = vmatpush.bf16.msra.mxu0 %v4100_v2  ;;  %1032 = vmatpush.bf16.msra.mxu1 %v4103_v14 }
  0x3d   : > { %s3641_s22 = scalar_lea.hbm %s6307_s15, %s4133_s27  ;;  %s4853_s27 = scalar_lea.hbm %s6307_s15, 256 }
  0x3e   : > { %s3644_s21 = sshll.u32 %s3641_s22, 4  ;;  %s3645_s21 = int_to_ptr.hbm [resolvable:$true] %s3644_s21 }
  0x3f   : > { %s4847_s13 = sshra.s32 %s3645_s21, 4  ;;  %s4848_s13 = int_to_ptr.hbm [resolvable:$true] %s4847_s13 }
  0x40   : > { %666 = vmatpush.bf16.msra.mxu0 %v4099_v3  ;;  %s4849_s29 = scalar_lea.hbm %s4848_s13, 128  ;;  %p4854_p0 = scmp.lt.s32.totalorder %s4848_s13, %s6307_s15 }
  0x41   : > { %p4850_p6 = scmp.ne.s32.totalorder %s4848_s13, %s4849_s29  ;;  %p4855_p1 = scmp.lt.s32.totalorder %s4853_s27, %s4849_s29 }
  0x43   : > { %3807 = vmatmul.msk.bf16.vlgmr.msra.gmra.mxu0 %vm610_vm0, %v4083_v4  ;;  %p4851_p9 = pnand %p4850_p6, %p5027_p11  ;;  %p4856_p3 = por %p4855_p1, %p4854_p0 }
  0x45   : > { %p4852_p13 = pneg %p4851_p9 }
  0x47   : > { %p4857_p4 = pnand %p4856_p3, %p4852_p13 }
  0x53   : > { %3808 = vmatmul.msk.bf16.gmra.mxu0 %vm610_vm0, %v4084_v5 }
  0x63   : > { %3809 = vmatmul.msk.bf16.gmra.mxu0 %vm610_vm0, %v4085_v6 }
  0x73   : > { %3810 = vmatmul.msk.bf16.gmra.mxu0 %vm610_vm0, %v4086_v7 }
  0x83   : > { %3811 = vmatmul.msk.bf16.gmra.mxu0 %vm610_vm0, %v4087_v8 }
  0x93   : > { %3812 = vmatmul.msk.bf16.gmra.mxu0 %vm610_vm0, %v4088_v9 }
  0xa3   : > { %3813 = vmatmul.msk.bf16.gmra.mxu0 %vm610_vm0, %v4089_v10 }
  0xb3   : > { %3814 = vmatmul.msk.bf16.gmra.mxu0 %vm610_vm0, %v4090_v11 }
  0xc0   : > { %v668_v16 = vpop.f32.mrf.mxu0 }
  0xc1   : > { %v669_v17 = vadd.f32 %v5109_v13, %v668_v16 }
  0xc3   : > { %v748_v18 = vsub.f32 0.0, %v669_v17  ;;  %3815 = vmatmul.msk.bf16.gmra.mxu0 %vm610_vm0, %v4091_v15  ;;  %v4095_v15 = vld [vmem:[%s5069_s17 + $0x60] sm:$0xff] }
  0xc5   : > { %v780_v19 = vmul.f32 1.442695, %v748_v18 }
  0xc7   : > { %4272 = vpow2.f32 %v780_v19 }
  0xc8   : > { %v670_v20 = vpop.f32.mrf.mxu0 }
  0xc9   : > { %v671_v21 = vadd.f32 %v5109_v13, %v670_v20 }
  0xcb   : > { %v749_v22 = vsub.f32 0.0, %v671_v21 }
  0xcd   : > { %v782_v23 = vmul.f32 1.442695, %v749_v22  ;;  %v4273_v24 = vpop.eup %4272 }
  0xce   : > { %v844_v28 = vadd.f32 1.0, %v4273_v24 }
  0xcf   : > { %4274 = vpow2.f32 %v782_v23 }
  0xd0   : > { %v673_v26 = vpop.f32.mrf.mxu0  ;;  %4276 = vrcp.f32 %v844_v28 }
  0xd1   : > { %v674_v27 = vadd.f32 %v5109_v13, %v673_v26 }
  0xd3   : > { %v750_v29 = vsub.f32 0.0, %v674_v27  ;;  %3816 = vmatmul.msk.bf16.gmra.mxu0 %vm610_vm0, %v4092_v25 }
  0xd5   : > { %v4275_v30 = vpop.eup %4274  ;;  %v784_v31 = vmul.f32 1.442695, %v750_v29 }
  0xd6   : > { %v845_v32 = vadd.f32 1.0, %v4275_v30  ;;  %v4277_v36 = vpop.eup %4276 }
  0xd7   : > { %v5122_v40 = vmul.f32 %v4277_v36, %v669_v17 }
  0xd8   : > { %4278 = vrcp.f32 %v845_v32  ;;  %v675_v33 = vpop.f32.mrf.mxu0 }
  0xd9   : > { %4280 = vpow2.f32 %v784_v31  ;;  %v676_v34 = vadd.f32 %v5109_v13, %v675_v33  ;;  %v4096_v33 = vld [vmem:[%s5069_s17 + $0x68] sm:$0xff] }
  0xdb   : > { %v751_v35 = vsub.f32 0.0, %v676_v34 }
  0xdd   : > { %v786_v37 = vmul.f32 1.442695, %v751_v35 }
  0xde   : > { %v4279_v38 = vpop.eup %4278 }
  0xdf   : > { %v4281_v39 = vpop.eup %4280  ;;  %v5124_v41 = vmul.f32 %v4279_v38, %v671_v21  ;;  %4282 = vpow2.f32 %v786_v37 }
  0xe0   : > { %v678_v43 = vpop.f32.mrf.mxu0  ;;  %v846_v46 = vadd.f32 1.0, %v4281_v39 }
  0xe1   : > { %v679_v44 = vadd.f32 %v5109_v13, %v678_v43  ;;  %v940_v45 = vpack.c.bf16 %v5124_v41, %v5122_v40 }
  0xe2   : > { %4284 = vrcp.f32 %v846_v46 }
  0xe3   : > { %v752_v47 = vsub.f32 0.0, %v679_v44  ;;  %3817 = vmatmul.msk.bf16.gmra.mxu0 %vm610_vm0, %v4093_v42  ;;  %3831 = vmatmul.msk.bf16.vlgmr.msra.gmra.mxu1 %vm976_vm1, %v940_v45 }
  0xe5   : > { %v4283_v48 = vpop.eup %4282  ;;  %v788_v49 = vmul.f32 1.442695, %v752_v47 }
  0xe6   : > { %v847_v50 = vadd.f32 1.0, %v4283_v48 }
  0xe8   : > { %4286 = vrcp.f32 %v847_v50  ;;  %v680_v51 = vpop.f32.mrf.mxu0  ;;  %v4285_v54 = vpop.eup %4284 }
  0xe9   : > { %4288 = vpow2.f32 %v788_v49  ;;  %v681_v52 = vadd.f32 %v5109_v13, %v680_v51  ;;  %v5133_v58 = vmul.f32 %v4285_v54, %v674_v27 }
  0xeb   : > { %v753_v53 = vsub.f32 0.0, %v681_v52 }
  0xed   : > { %v790_v55 = vmul.f32 1.442695, %v753_v53  ;;  %v4097_v53 = vld [vmem:[%s5069_s17 + $0x70] sm:$0xff] }
  0xee   : > { %v4287_v56 = vpop.eup %4286 }
  0xef   : > { %v4289_v57 = vpop.eup %4288  ;;  %v5135_v59 = vmul.f32 %v4287_v56, %v676_v34  ;;  %4290 = vpow2.f32 %v790_v55 }
  0xf0   : > { %v683_v61 = vpop.f32.mrf.mxu0  ;;  %v848_v0 = vadd.f32 1.0, %v4289_v57 }
  0xf1   : > { %v684_v62 = vadd.f32 %v5109_v13, %v683_v61  ;;  %v941_v63 = vpack.c.bf16 %v5135_v59, %v5133_v58 }
  0xf2   : > { %4292 = vrcp.f32 %v848_v0 }
  0xf3   : > { %v754_v1 = vsub.f32 0.0, %v684_v62  ;;  %3818 = vmatmul.msk.bf16.gmra.mxu0 %vm610_vm0, %v4094_v60  ;;  %3832 = vmatmul.msk.bf16.gmra.mxu1 %vm976_vm1, %v941_v63 }
  0xf5   : > { %v4291_v2 = vpop.eup %4290  ;;  %v792_v3 = vmul.f32 1.442695, %v754_v1 }
  0xf6   : > { %v849_v4 = vadd.f32 1.0, %v4291_v2 }
  0xf8   : > { %4294 = vrcp.f32 %v849_v4  ;;  %v685_v5 = vpop.f32.mrf.mxu0  ;;  %v4293_v8 = vpop.eup %4292 }
  0xf9   : > { %4296 = vpow2.f32 %v792_v3  ;;  %v686_v6 = vadd.f32 %v5109_v13, %v685_v5  ;;  %v5144_v12 = vmul.f32 %v4293_v8, %v679_v44 }
  0xfb   : > { %v755_v7 = vsub.f32 0.0, %v686_v6 }
  0xfd   : > { %v794_v9 = vmul.f32 1.442695, %v755_v7 }
  0xfe   : > { %v4295_v10 = vpop.eup %4294 }
  0xff   : > { %v4297_v11 = vpop.eup %4296  ;;  %v5146_v14 = vmul.f32 %v4295_v10, %v681_v52  ;;  %4298 = vpow2.f32 %v794_v9  ;;  %v4098_v9 = vld [vmem:[%s5069_s17 + $0x78] sm:$0xff] }
 0x100   : > { %v688_v16 = vpop.f32.mrf.mxu0  ;;  %v850_v19 = vadd.f32 1.0, %v4297_v11 }
 0x101   : > { %v689_v17 = vadd.f32 %v5109_v13, %v688_v16  ;;  %v942_v18 = vpack.c.bf16 %v5146_v14, %v5144_v12 }
 0x102   : > { %4300 = vrcp.f32 %v850_v19 }
 0x103   : > { %v756_v20 = vsub.f32 0.0, %v689_v17  ;;  %3819 = vmatmul.msk.bf16.gmra.mxu0 %vm610_vm0, %v4095_v15  ;;  %3833 = vmatmul.msk.bf16.gmra.mxu1 %vm976_vm1, %v942_v18 }
 0x105   : > { %v4299_v21 = vpop.eup %4298  ;;  %v796_v22 = vmul.f32 1.442695, %v756_v20 }
 0x106   : > { %v851_v23 = vadd.f32 1.0, %v4299_v21 }
 0x108   : > { %4302 = vrcp.f32 %v851_v23  ;;  %v690_v24 = vpop.f32.mrf.mxu0  ;;  %v4301_v27 = vpop.eup %4300 }
 0x109   : > { %4304 = vpow2.f32 %v796_v22  ;;  %v691_v25 = vadd.f32 %v5109_v13, %v690_v24  ;;  %v5155_v31 = vmul.f32 %v4301_v27, %v684_v62 }
 0x10b   : > { %v757_v26 = vsub.f32 0.0, %v691_v25 }
 0x10d   : > { %v798_v28 = vmul.f32 1.442695, %v757_v26 }
 0x10e   : > { %v4303_v29 = vpop.eup %4302 }
 0x10f   : > { %v4305_v30 = vpop.eup %4304  ;;  %v5157_v32 = vmul.f32 %v4303_v29, %v686_v6  ;;  %4306 = vpow2.f32 %v798_v28 }
 0x110   : > { %v693_v34 = vpop.f32.mrf.mxu0  ;;  %v852_v37 = vadd.f32 1.0, %v4305_v30 }
 0x111   : > { %v694_v35 = vadd.f32 %v5109_v13, %v693_v34  ;;  %v943_v36 = vpack.c.bf16 %v5157_v32, %v5155_v31 }
 0x112   : > { %4308 = vrcp.f32 %v852_v37 }
 0x113   : > { %v758_v38 = vsub.f32 0.0, %v694_v35  ;;  %3820 = vmatmul.msk.bf16.gmra.mxu0 %vm610_vm0, %v4096_v33  ;;  %3834 = vmatmul.msk.bf16.gmra.mxu1 %vm976_vm1, %v943_v36 }
 0x115   : > { %v4307_v39 = vpop.eup %4306  ;;  %v800_v42 = vmul.f32 1.442695, %v758_v38 }
 0x116   : > { %v853_v43 = vadd.f32 1.0, %v4307_v39 }
 0x118   : > { %4310 = vrcp.f32 %v853_v43  ;;  %v695_v44 = vpop.f32.mrf.mxu0  ;;  %v4309_v47 = vpop.eup %4308 }
 0x119   : > { %4312 = vpow2.f32 %v800_v42  ;;  %v696_v45 = vadd.f32 %v5109_v13, %v695_v44  ;;  %v5166_v51 = vmul.f32 %v4309_v47, %v689_v17 }
 0x11b   : > { %v759_v46 = vsub.f32 0.0, %v696_v45 }
 0x11d   : > { %v802_v48 = vmul.f32 1.442695, %v759_v46 }
 0x11e   : > { %v4311_v49 = vpop.eup %4310 }
 0x11f   : > { %v4313_v50 = vpop.eup %4312  ;;  %v5168_v52 = vmul.f32 %v4311_v49, %v691_v25  ;;  %4314 = vpow2.f32 %v802_v48 }
 0x120   : > { %v698_v54 = vpop.f32.mrf.mxu0  ;;  %v854_v57 = vadd.f32 1.0, %v4313_v50 }
 0x121   : > { %v699_v55 = vadd.f32 %v5109_v13, %v698_v54  ;;  %v944_v56 = vpack.c.bf16 %v5168_v52, %v5166_v51 }
 0x122   : > { %4316 = vrcp.f32 %v854_v57 }
 0x123   : > { %v760_v60 = vsub.f32 0.0, %v699_v55  ;;  %3821 = vmatmul.msk.bf16.gmra.mxu0 %vm610_vm0, %v4097_v53  ;;  %3835 = vmatmul.msk.bf16.gmra.mxu1 %vm976_vm1, %v944_v56 }
 0x125   : > { %v4315_v61 = vpop.eup %4314  ;;  %v804_v62 = vmul.f32 1.442695, %v760_v60 }
 0x126   : > { %v855_v63 = vadd.f32 1.0, %v4315_v61 }
 0x128   : > { %4318 = vrcp.f32 %v855_v63  ;;  %v700_v0 = vpop.f32.mrf.mxu0  ;;  %v4317_v3 = vpop.eup %4316 }
 0x129   : > { %4320 = vpow2.f32 %v804_v62  ;;  %v701_v1 = vadd.f32 %v5109_v13, %v700_v0  ;;  %v5177_v7 = vmul.f32 %v4317_v3, %v694_v35 }
 0x12b   : > { %v761_v2 = vsub.f32 0.0, %v701_v1 }
 0x12d   : > { %v806_v4 = vmul.f32 1.442695, %v761_v2 }
 0x12e   : > { %v4319_v5 = vpop.eup %4318 }
 0x12f   : > { %v4321_v6 = vpop.eup %4320  ;;  %v5179_v8 = vmul.f32 %v4319_v5, %v696_v45  ;;  %4322 = vpow2.f32 %v806_v4  ;;  %v5209_v4 = vld [vmem:[%s6267_s4] ss:$0 sm:$0xff] }
 0x130   : > { %v703_v10 = vpop.f32.mrf.mxu0  ;;  %v856_v16 = vadd.f32 1.0, %v4321_v6 }
 0x131   : > { %v704_v11 = vadd.f32 %v5109_v13, %v703_v10  ;;  %v945_v15 = vpack.c.bf16 %v5179_v8, %v5177_v7 }
 0x132   : > { %4324 = vrcp.f32 %v856_v16 }
 0x133   : > { %v762_v17 = vsub.f32 0.0, %v704_v11  ;;  %3822 = vmatmul.msk.bf16.gmra.mxu0 %vm610_vm0, %v4098_v9  ;;  %3836 = vmatmul.msk.bf16.gmra.mxu1 %vm976_vm1, %v945_v15 }
 0x135   : > { %v4323_v18 = vpop.eup %4322  ;;  %v808_v19 = vmul.f32 1.442695, %v762_v17 }
 0x136   : > { %v857_v20 = vadd.f32 1.0, %v4323_v18 }
 0x138   : > { %4326 = vrcp.f32 %v857_v20  ;;  %v705_v21 = vpop.f32.mrf.mxu0  ;;  %v4325_v24 = vpop.eup %4324 }
 0x139   : > { %4328 = vpow2.f32 %v808_v19  ;;  %v706_v22 = vadd.f32 %v5109_v13, %v705_v21  ;;  %v5188_v28 = vmul.f32 %v4325_v24, %v699_v55 }
 0x13b   : > { %v763_v23 = vsub.f32 0.0, %v706_v22 }
 0x13d   : > { %v810_v25 = vmul.f32 1.442695, %v763_v23 }
 0x13e   : > { %v4327_v26 = vpop.eup %4326 }
 0x13f   : > { %v4329_v27 = vpop.eup %4328  ;;  %v5190_v29 = vmul.f32 %v4327_v26, %v701_v1  ;;  %4330 = vpow2.f32 %v810_v25 }
 0x140   : > { %v708_v30 = vpop.f32.mrf.mxu0  ;;  %v858_v35 = vadd.f32 1.0, %v4329_v27 }
 0x141   : > { %v709_v33 = vadd.f32 %v5109_v13, %v708_v30  ;;  %v946_v34 = vpack.c.bf16 %v5190_v29, %v5188_v28 }
 0x142   : > { %4332 = vrcp.f32 %v858_v35 }
 0x143   : > { %v764_v36 = vsub.f32 0.0, %v709_v33  ;;  %3837 = vmatmul.msk.bf16.gmra.mxu1 %vm976_vm1, %v946_v34 }
 0x145   : > { %v4331_v37 = vpop.eup %4330  ;;  %v812_v38 = vmul.f32 1.442695, %v764_v36 }
 0x146   : > { %v859_v39 = vadd.f32 1.0, %v4331_v37 }
 0x148   : > { %4334 = vrcp.f32 %v859_v39  ;;  %v710_v42 = vpop.f32.mrf.mxu0  ;;  %v4333_v45 = vpop.eup %4332 }
 0x149   : > { %4336 = vpow2.f32 %v812_v38  ;;  %v711_v43 = vadd.f32 %v5109_v13, %v710_v42  ;;  %v5197_v49 = vmul.f32 %v4333_v45, %v704_v11 }
 0x14b   : > { %v765_v44 = vsub.f32 0.0, %v711_v43 }
 0x14d   : > { %v814_v46 = vmul.f32 1.442695, %v765_v44 }
 0x14e   : > { %v4335_v47 = vpop.eup %4334 }
 0x14f   : > { %v4337_v48 = vpop.eup %4336  ;;  %v5199_v50 = vmul.f32 %v4335_v47, %v706_v22  ;;  %4338 = vpow2.f32 %v814_v46 }
 0x150   : > { %v713_v53 = vpop.f32.mrf.mxu0  ;;  %v860_v56 = vadd.f32 1.0, %v4337_v48 }
 0x151   : > { %v714_v54 = vadd.f32 %v5109_v13, %v713_v53  ;;  %v947_v55 = vpack.c.bf16 %v5199_v50, %v5197_v49 }
 0x152   : > { %4340 = vrcp.f32 %v860_v56 }
 0x153   : > { %v766_v57 = vsub.f32 0.0, %v714_v54  ;;  %3838 = vmatmul.msk.bf16.gmra.mxu1 %vm976_vm1, %v947_v55 }
 0x155   : > { %v4339_v60 = vpop.eup %4338  ;;  %v816_v61 = vmul.f32 1.442695, %v766_v57 }
 0x156   : > { %v861_v62 = vadd.f32 1.0, %v4339_v60 }
 0x158   : > { %4342 = vrcp.f32 %v861_v62  ;;  %v715_v63 = vpop.f32.mrf.mxu0  ;;  %v4341_v2 = vpop.eup %4340 }
 0x159   : > { %4344 = vpow2.f32 %v816_v61  ;;  %v716_v0 = vadd.f32 %v5109_v13, %v715_v63  ;;  %v5211_v9 = vmul.f32 %v4341_v2, %v709_v33 }
 0x15b   : > { %v767_v1 = vsub.f32 0.0, %v716_v0 }
 0x15d   : > { %v818_v3 = vmul.f32 1.442695, %v767_v1 }
 0x15e   : > { %v4343_v5 = vpop.eup %4342 }
 0x15f   : > { %v4345_v6 = vpop.eup %4344  ;;  %v5213_v10 = vmul.f32 %v4343_v5, %v711_v43  ;;  %4346 = vpow2.f32 %v818_v3 }
 0x160   : > { %v718_v11 = vpop.f32.mrf.mxu0  ;;  %v1034_v15 = vpop.f32.mrf.mxu1  ;;  %v862_v19 = vadd.f32 1.0, %v4345_v6 }
 0x161   : > { %v5216_v16 = vadd.f32 %v5109_v13, %v718_v11  ;;  %v1035_v17 = vadd.f32 %v5209_v4, %v1034_v15  ;;  %v948_v18 = vpack.c.bf16 %v5213_v10, %v5211_v9 }
 0x162   : > { %4348 = vrcp.f32 %v862_v19 }
 0x163   : > { %v768_v20 = vsub.f32 0.0, %v5216_v16  ;;  %v1114_v21 = vsub.f32 0.0, %v1035_v17  ;;  %3839 = vmatmul.msk.bf16.gmra.mxu1 %vm976_vm1, %v948_v18 }
 0x165   : > { %v4347_v22 = vpop.eup %4346  ;;  %v820_v23 = vmul.f32 1.442695, %v768_v20  ;;  %v1146_v24 = vmul.f32 1.442695, %v1114_v21 }
 0x166   : > { %v863_v25 = vadd.f32 1.0, %v4347_v22 }
 0x167   : > { %4350 = vpow2.f32 %v820_v23 }
 0x168   : > { %4352 = vrcp.f32 %v863_v25  ;;  %v720_v26 = vpop.f32.mrf.mxu0  ;;  %v1036_v27 = vpop.f32.mrf.mxu1 }
 0x169   : > { %4354 = vpow2.f32 %v1146_v24  ;;  %v721_v30 = vadd.f32 %v5109_v13, %v720_v26  ;;  %v1037_v33 = vadd.f32 %v5209_v4, %v1036_v27  ;;  %v4349_v36 = vpop.eup %4348 }
 0x16a   : > { %v5225_v44 = vmul.f32 %v4349_v36, %v714_v54 }
 0x16b   : > { %v769_v34 = vsub.f32 0.0, %v721_v30  ;;  %v1115_v35 = vsub.f32 0.0, %v1037_v33 }
 0x16d   : > { %v4351_v37 = vpop.eup %4350  ;;  %v822_v38 = vmul.f32 1.442695, %v769_v34  ;;  %v1148_v39 = vmul.f32 1.442695, %v1115_v35 }
 0x16e   : > { %v4353_v42 = vpop.eup %4352  ;;  %v864_v57 = vadd.f32 1.0, %v4351_v37 }
 0x16f   : > { %v4355_v43 = vpop.eup %4354  ;;  %v5227_v45 = vmul.f32 %v4353_v42, %v716_v0  ;;  %4356 = vpow2.f32 %v822_v38 }
 0x170   : > { %v1210_v46 = vadd.f32 1.0, %v4355_v43  ;;  %v723_v47 = vpop.f32.mrf.mxu0  ;;  %v1039_v48 = vpop.f32.mrf.mxu1  ;;  %4358 = vpow2.f32 %v1148_v39 }
 0x171   : > { %v5230_v53 = vadd.f32 %v5109_v13, %v723_v47  ;;  %v5233_v55 = vadd.f32 %v5209_v4, %v1039_v48  ;;  %v949_v56 = vpack.c.bf16 %v5227_v45, %v5225_v44 }
 0x172   : > { %4360 = vrcp.f32 %v1210_v46 }
 0x173   : > { %v770_v54 = vsub.f32 0.0, %v5230_v53  ;;  %v1116_v60 = vsub.f32 0.0, %v5233_v55  ;;  %3840 = vmatmul.msk.bf16.gmra.mxu1 %vm976_vm1, %v949_v56  ;;  %4362 = vrcp.f32 %v864_v57 }
 0x175   : > { %v4357_v61 = vpop.eup %4356  ;;  %v824_v62 = vmul.f32 1.442695, %v770_v54  ;;  %v1150_v63 = vmul.f32 1.442695, %v1116_v60 }
 0x176   : > { %v865_v0 = vadd.f32 1.0, %v4357_v61  ;;  %v4359_v1 = vpop.eup %4358 }
 0x177   : > { %4364 = vpow2.f32 %v824_v62  ;;  %v1211_v2 = vadd.f32 1.0, %v4359_v1 }
 0x178   : > { %4366 = vrcp.f32 %v865_v0  ;;  %v725_v3 = vpop.f32.mrf.mxu0  ;;  %v1041_v5 = vpop.f32.mrf.mxu1 }
 0x179   : > { %v4361_v6 = vpop.eup %4360  ;;  %4368 = vpow2.f32 %v1150_v63  ;;  %v5241_v11 = vadd.f32 %v5109_v13, %v725_v3  ;;  %v5244_v15 = vadd.f32 %v5209_v4, %v1041_v5 }
 0x17a   : > { %4370 = vrcp.f32 %v1211_v2  ;;  %v4363_v20 = vpop.eup %4362  ;;  %v1274_v21 = vmul.f32 %v4361_v6, %v1035_v17 }
 0x17b   : > { %v771_v18 = vsub.f32 0.0, %v5241_v11  ;;  %v1117_v19 = vsub.f32 0.0, %v5244_v15  ;;  %v5251_v35 = vmul.f32 %v4363_v20, %v5216_v16 }
 0x17c   : > { %v1307_v36 = vpack.c.bf16 %v1274_v21, %v1274_v21 }
 0x17d   : > { %v4365_v22 = vpop.eup %4364  ;;  %v826_v23 = vmul.f32 1.442695, %v771_v18  ;;  %v1152_v24 = vmul.f32 1.442695, %v1117_v19 }
 0x17e   : > { %v4367_v25 = vpop.eup %4366  ;;  %v866_v46 = vadd.f32 1.0, %v4365_v22  ;;  %v1371_v56 = vunpack.c.l.b16 %v1307_v36 }
 0x17f   : > { %v4369_v26 = vpop.eup %4368  ;;  %v5248_v27 = vmul.f32 %v4367_v25, %v721_v30  ;;  %4372 = vpow2.f32 %v826_v23 }
 0x180   : > { %v4371_v34 = vpop.eup %4370  ;;  %v1212_v37 = vadd.f32 1.0, %v4369_v26  ;;  %v728_v38 = vpop.f32.mrf.mxu0  ;;  %4374 = vpow2.f32 %v1152_v24 }
 0x181   : > { %v1044_v39 = vpop.f32.mrf.mxu1  ;;  %v1275_v42 = vmul.f32 %v4371_v34, %v1037_v33  ;;  %v5254_v17 = vadd.f32 %v5109_v13, %v728_v38  ;;  %v950_v30 = vpack.c.bf16 %v5248_v27, %v5251_v35 }
 0x182   : > { %v5257_v43 = vadd.f32 %v5209_v4, %v1044_v39  ;;  %4376 = vrcp.f32 %v1212_v37 }
 0x183   : > { %v1308_v47 = vpack.c.bf16 %v1275_v42, %v1275_v42  ;;  %v772_v16 = vsub.f32 0.0, %v5254_v17  ;;  %3841 = vmatmul.msk.bf16.gmra.mxu1 %vm976_vm1, %v950_v30  ;;  %4378 = vrcp.f32 %v866_v46 }
 0x184   : > { %v1118_v48 = vsub.f32 0.0, %v5257_v43 }
 0x185   : > { %v4373_v33 = vpop.eup %4372  ;;  %v1372_v57 = vunpack.c.l.b16 %v1308_v47  ;;  %v828_v54 = vmul.f32 1.442695, %v772_v16 }
 0x186   : > { %v1154_v60 = vmul.f32 1.442695, %v1118_v48  ;;  %v867_v61 = vadd.f32 1.0, %v4373_v33  ;;  %v4375_v62 = vpop.eup %4374 }
 0x187   : > { %4380 = vpow2.f32 %v828_v54  ;;  %v1403_v63 = vpack.c.b16 %v1372_v57, %v1371_v56  ;;  %v1213_v0 = vadd.f32 1.0, %v4375_v62 }
 0x188   : > { %4382 = vrcp.f32 %v867_v61  ;;  %v730_v1 = vpop.f32.mrf.mxu0  ;;  %v4377_v3 = vpop.eup %4376 }
 0x189   : > { %v1046_v2 = vpop.f32.mrf.mxu1  ;;  %4384 = vpow2.f32 %v1154_v60  ;;  %1633 = vrot.lane.b32.xlu0 %v1403_v63, %s4903_s23  ;;  %v5266_v5 = vadd.f32 %v5109_v13, %v730_v1  ;;  %v1420_v18 = vshrl.u32 %v1403_v63, 16  ;;  %v1423_v19 = vshll.u32 %v1403_v63, 16  ;;  %v4379_v22 = vpop.eup %4378 }
 0x18a   : > { %v5269_v6 = vadd.f32 %v5209_v4, %v1046_v2  ;;  %4386 = vrcp.f32 %v1213_v0  ;;  %v1276_v23 = vmul.f32 %v4377_v3, %v5233_v55  ;;  %v5284_v55 = vmul.f32 %v4379_v22, %v5230_v53 }
 0x18b   : > { %v773_v20 = vsub.f32 0.0, %v5266_v5  ;;  %v1566_v24 = vrot.slane %v1423_v19, 1  ;;  %v1422_v25 = vrot.slane %v1420_v18, 7 }
 0x18c   : > { %v1119_v21 = vsub.f32 0.0, %v5269_v6  ;;  %v1309_v16 = vpack.c.bf16 %v1276_v23, %v1276_v23 }
 0x18d   : > { %v4381_v26 = vpop.eup %4380  ;;  %v830_v34 = vmul.f32 1.442695, %v773_v20  ;;  %v1567_v39 = vor.u32 %v1566_v24, %v1420_v18  ;;  %v5278_v42 = vor.u32 %v1423_v19, %v1422_v25 }
 0x18e   : > { %v1156_v36 = vmul.f32 1.442695, %v1119_v21  ;;  %v4383_v38 = vpop.eup %4382  ;;  %v868_v53 = vadd.f32 1.0, %v4381_v26  ;;  %v1373_v1 = vunpack.c.l.b16 %v1309_v16 }
 0x18f   : > { %v4385_v46 = vpop.eup %4384  ;;  %v5281_v30 = vmul.f32 %v4383_v38, %v5241_v11  ;;  %4388 = vpow2.f32 %v830_v34  ;;  %v1617_v33 = vsel %vm5274_vm4, %v1567_v39, 0 }
 0x190   : > { %v4387_v47 = vpop.eup %4386  ;;  %v1214_v48 = vadd.f32 1.0, %v4385_v46  ;;  %v733_v56 = vpop.f32.mrf.mxu0  ;;  %4390 = vpow2.f32 %v1156_v36 }
 0x191   : > { %v1049_v57 = vpop.f32.mrf.mxu1  ;;  %v1277_v54 = vmul.f32 %v4387_v47, %v5244_v15  ;;  %1681 = vrot.lane.b32.xlu0 %v1617_v33, %s4904_s18  ;;  %v5291_v11 = vadd.f32 %v5109_v13, %v733_v56  ;;  %v951_v61 = vpack.c.bf16 %v5281_v30, %v5284_v55 }
 0x192   : > { %v5294_v60 = vadd.f32 %v5209_v4, %v1049_v57  ;;  %4392 = vrcp.f32 %v1214_v48 }
 0x193   : > { %v1310_v62 = vpack.c.bf16 %v1277_v54, %v1277_v54  ;;  %v774_v63 = vsub.f32 0.0, %v5291_v11  ;;  %3842 = vmatmul.msk.bf16.gmra.mxu1 %vm976_vm1, %v951_v61  ;;  %4394 = vrcp.f32 %v868_v53 }
 0x194   : > { %v1120_v15 = vsub.f32 0.0, %v5294_v60 }
 0x195   : > { %v4389_v0 = vpop.eup %4388  ;;  %v1374_v2 = vunpack.c.l.b16 %v1310_v62  ;;  %v832_v3 = vmul.f32 1.442695, %v774_v63 }
 0x196   : > { %v1158_v18 = vmul.f32 1.442695, %v1120_v15  ;;  %v869_v19 = vadd.f32 1.0, %v4389_v0  ;;  %v4391_v20 = vpop.eup %4390 }
 0x197   : > { %4396 = vpow2.f32 %v832_v3  ;;  %v1404_v21 = vpack.c.b16 %v1374_v2, %v1373_v1  ;;  %v1215_v22 = vadd.f32 1.0, %v4391_v20 }
 0x198   : > { %4398 = vrcp.f32 %v869_v19  ;;  %v735_v23 = vpop.f32.mrf.mxu0  ;;  %v4393_v25 = vpop.eup %4392 }
 0x199   : > { %v1051_v24 = vpop.f32.mrf.mxu1  ;;  %4400 = vpow2.f32 %v1158_v18  ;;  %1635 = vrot.lane.b32.xlu1 %v1404_v21, %s4903_s23  ;;  %v5303_v26 = vadd.f32 %v5109_v13, %v735_v23  ;;  %v1427_v36 = vshrl.u32 %v1404_v21, 16  ;;  %v1430_v38 = vshll.u32 %v1404_v21, 16  ;;  %v4395_v47 = vpop.eup %4394 }
 0x19a   : > { %v5306_v34 = vadd.f32 %v5209_v4, %v1051_v24  ;;  %4402 = vrcp.f32 %v1215_v22  ;;  %v1278_v16 = vmul.f32 %v4393_v25, %v5257_v43  ;;  %v5314_v15 = vmul.f32 %v4395_v47, %v5254_v17 }
 0x19b   : > { %v775_v39 = vsub.f32 0.0, %v5303_v26  ;;  %v1568_v48 = vrot.slane %v1430_v38, 1  ;;  %v1429_v33 = vrot.slane %v1427_v36, 7 }
 0x19c   : > { %v1121_v46 = vsub.f32 0.0, %v5306_v34  ;;  %v1311_v2 = vpack.c.bf16 %v1278_v16, %v1278_v16 }
 0x19d   : > { %v4397_v56 = vpop.eup %4396  ;;  %v834_v57 = vmul.f32 1.442695, %v775_v39  ;;  %v1569_v61 = vor.u32 %v1568_v48, %v1427_v36  ;;  %v5311_v62 = vor.u32 %v1430_v38, %v1429_v33 }
 0x19e   : > { %v1160_v54 = vmul.f32 1.442695, %v1121_v46  ;;  %v4399_v53 = vpop.eup %4398 }
 0x19f   : > { %v4401_v63 = vpop.eup %4400  ;;  %v5317_v0 = vmul.f32 %v4399_v53, %v5266_v5  ;;  %4404 = vpow2.f32 %v834_v57  ;;  %v1618_v3 = vsel %vm5274_vm4, %v1569_v61, 0  ;;  %v870_v5 = vadd.f32 1.0, %v4397_v56 }
 0x1a0   : > { %v4403_v1 = vpop.eup %4402  ;;  %v1216_v43 = vadd.f32 1.0, %v4401_v63  ;;  %v738_v18 = vpop.f32.mrf.mxu0  ;;  %4406 = vpow2.f32 %v1160_v54 }
 0x1a1   : > { %v1054_v19 = vpop.f32.mrf.mxu1  ;;  %v952_v20 = vpack.c.bf16 %v5317_v0, %v5314_v15  ;;  %v1279_v21 = vmul.f32 %v4403_v1, %v5269_v6  ;;  %1683 = vrot.lane.b32.xlu1 %v1618_v3, %s4904_s18  ;;  %v5326_v17 = vadd.f32 %v5109_v13, %v738_v18  ;;  %v1375_v6 = vunpack.c.l.b16 %v1311_v2 }
 0x1a2   : > { %v5329_v22 = vadd.f32 %v5209_v4, %v1054_v19  ;;  %4408 = vrcp.f32 %v1216_v43 }
 0x1a3   : > { %v1312_v23 = vpack.c.bf16 %v1279_v21, %v1279_v21  ;;  %v776_v24 = vsub.f32 0.0, %v5326_v17  ;;  %3843 = vmatmul.msk.bf16.gmra.mxu1 %vm976_vm1, %v952_v20  ;;  %4410 = vrcp.f32 %v870_v5 }
 0x1a4   : > { %v1122_v25 = vsub.f32 0.0, %v5329_v22 }
 0x1a5   : > { %v4405_v36 = vpop.eup %4404  ;;  %v1376_v38 = vunpack.c.l.b16 %v1312_v23  ;;  %v836_v39 = vmul.f32 1.442695, %v776_v24 }
 0x1a6   : > { %v871_v46 = vadd.f32 1.0, %v4405_v36  ;;  %v1162_v47 = vmul.f32 1.442695, %v1122_v25  ;;  %v4407_v16 = vpop.eup %4406 }
 0x1a7   : > { %4412 = vpow2.f32 %v836_v39  ;;  %v1405_v48 = vpack.c.b16 %v1376_v38, %v1375_v6  ;;  %v1217_v33 = vadd.f32 1.0, %v4407_v16 }
 0x1a8   : > { %4414 = vrcp.f32 %v871_v46  ;;  %v740_v56 = vpop.f32.mrf.mxu0  ;;  %v4409_v54 = vpop.eup %4408 }
 0x1a9   : > { %v1056_v57 = vpop.f32.mrf.mxu1  ;;  %4416 = vpow2.f32 %v1162_v47  ;;  %1637 = vrot.lane.b32.xlu2 %v1405_v48, %s4903_s23  ;;  %v5336_v53 = vadd.f32 %v5109_v13, %v740_v56  ;;  %v1434_v63 = vshrl.u32 %v1405_v48, 16  ;;  %v1437_v1 = vshll.u32 %v1405_v48, 16  ;;  %v4411_v3 = vpop.eup %4410 }
 0x1aa   : > { %v5339_v61 = vadd.f32 %v5209_v4, %v1056_v57  ;;  %4418 = vrcp.f32 %v1217_v33  ;;  %v1280_v18 = vmul.f32 %v4409_v54, %v5294_v60  ;;  %v5347_v38 = vmul.f32 %v4411_v3, %v5291_v11 }
 0x1ab   : > { %v777_v2 = vsub.f32 0.0, %v5336_v53  ;;  %v1570_v19 = vrot.slane %v1437_v1, 1  ;;  %v1436_v20 = vrot.slane %v1434_v63, 7 }
 0x1ac   : > { %v1123_v43 = vsub.f32 0.0, %v5339_v61  ;;  %v1313_v47 = vpack.c.bf16 %v1280_v18, %v1280_v18 }
 0x1ad   : > { %v4413_v21 = vpop.eup %4412  ;;  %v838_v5 = vmul.f32 1.442695, %v777_v2  ;;  %v1571_v25 = vor.u32 %v1570_v19, %v1434_v63  ;;  %v5344_v36 = vor.u32 %v1437_v1, %v1436_v20 }
 0x1ae   : > { %v1164_v23 = vmul.f32 1.442695, %v1123_v43  ;;  %v4415_v24 = vpop.eup %4414 }
 0x1af   : > { %v4417_v6 = vpop.eup %4416  ;;  %v5350_v39 = vmul.f32 %v4415_v24, %v5303_v26  ;;  %4420 = vpow2.f32 %v838_v5  ;;  %v1619_v16 = vsel %vm5274_vm4, %v1571_v25, 0  ;;  %v872_v26 = vadd.f32 1.0, %v4413_v21 }
 0x1b0   : > { %v4419_v46 = vpop.eup %4418  ;;  %v1218_v60 = vadd.f32 1.0, %v4417_v6  ;;  %v743_v48 = vpop.f32.mrf.mxu0  ;;  %4422 = vpow2.f32 %v1164_v23 }
 0x1b1   : > { %v1059_v33 = vpop.f32.mrf.mxu1  ;;  %v953_v56 = vpack.c.bf16 %v5350_v39, %v5347_v38  ;;  %v1281_v57 = vmul.f32 %v4419_v46, %v5306_v34  ;;  %1685 = vrot.lane.b32.xlu2 %v1619_v16, %s4904_s18  ;;  %v5359_v11 = vadd.f32 %v5109_v13, %v743_v48  ;;  %v1377_v34 = vunpack.c.l.b16 %v1313_v47 }
 0x1b2   : > { %v5362_v54 = vadd.f32 %v5209_v4, %v1059_v33  ;;  %4424 = vrcp.f32 %v1218_v60 }
 0x1b3   : > { %v1314_v63 = vpack.c.bf16 %v1281_v57, %v1281_v57  ;;  %v778_v1 = vsub.f32 0.0, %v5359_v11  ;;  %3844 = vmatmul.msk.bf16.gmra.mxu1 %vm976_vm1, %v953_v56  ;;  %4426 = vrcp.f32 %v872_v26 }
 0x1b4   : > { %v1124_v2 = vsub.f32 0.0, %v5362_v54 }
 0x1b5   : > { %v4421_v43 = vpop.eup %4420  ;;  %v1378_v3 = vunpack.c.l.b16 %v1314_v63  ;;  %v840_v18 = vmul.f32 1.442695, %v778_v1 }
 0x1b6   : > { %v873_v19 = vadd.f32 1.0, %v4421_v43  ;;  %v1166_v20 = vmul.f32 1.442695, %v1124_v2  ;;  %v4423_v5 = vpop.eup %4422 }
 0x1b7   : > { %4428 = vpow2.f32 %v840_v18  ;;  %v1406_v21 = vpack.c.b16 %v1378_v3, %v1377_v34  ;;  %v1219_v23 = vadd.f32 1.0, %v4423_v5 }
 0x1b8   : > { %4430 = vrcp.f32 %v873_v19  ;;  %v745_v24 = vpop.f32.mrf.mxu0  ;;  %v4425_v6 = vpop.eup %4424 }
 0x1b9   : > { %v1061_v25 = vpop.f32.mrf.mxu1  ;;  %4432 = vpow2.f32 %v1166_v20  ;;  %1639 = vrot.lane.b32.xlu0 %v1406_v21, %s4903_s23  ;;  %v5369_v46 = vadd.f32 %v5109_v13, %v745_v24  ;;  %v1441_v60 = vshrl.u32 %v1406_v21, 16  ;;  %v1444_v16 = vshll.u32 %v1406_v21, 16  ;;  %v4427_v56 = vpop.eup %4426  ;;  %v4110_v13 = vld [vmem:[%s6268_s5 + $0x28] sm:$0xff] }
 0x1ba   : > { %v5372_v47 = vadd.f32 %v5209_v4, %v1061_v25  ;;  %4434 = vrcp.f32 %v1219_v23  ;;  %v1282_v57 = vmul.f32 %v4425_v6, %v5329_v22  ;;  %v5383_v20 = vmul.f32 %v4427_v56, %v5326_v17  ;;  %2017 = vmatpush.bf16.msra.mxu3 %v4110_v13 }
 0x1bb   : > { %v779_v48 = vsub.f32 0.0, %v5369_v46  ;;  %v1443_v26 = vrot.slane %v1441_v60, 7  ;;  %v1572_v63 = vrot.slane %v1444_v16, 1 }
 0x1bc   : > { %v1125_v33 = vsub.f32 0.0, %v5372_v47  ;;  %v1315_v21 = vpack.c.bf16 %v1282_v57, %v1282_v57 }
 0x1bd   : > { %v4429_v1 = vpop.eup %4428  ;;  %v842_v2 = vmul.f32 1.442695, %v779_v48  ;;  %v1573_v3 = vor.u32 %v1572_v63, %v1441_v60  ;;  %v5380_v18 = vor.u32 %v1444_v16, %v1443_v26  ;;  %v4108_v63 = vld [vmem:[%s6268_s5 + $0x18] sm:$0xff] }
 0x1be   : > { %v1168_v43 = vmul.f32 1.442695, %v1125_v33  ;;  %v4431_v34 = vpop.eup %4430  ;;  %v874_v16 = vadd.f32 1.0, %v4429_v1 }
 0x1bf   : > { %v4433_v19 = vpop.eup %4432  ;;  %v5386_v5 = vmul.f32 %v4431_v34, %v5336_v53  ;;  %4436 = vpow2.f32 %v842_v2  ;;  %v1620_v24 = vsel %vm5274_vm4, %v1573_v3, 0  ;;  %v4109_v53 = vld [vmem:[%s6268_s5 + $0x20] sm:$0xff] }
 0x1c0   : > { %v4435_v22 = vpop.eup %4434  ;;  %v1220_v23 = vadd.f32 1.0, %v4433_v19  ;;  %4438 = vpow2.f32 %v1168_v43  ;;  %1687 = vrot.lane.b32.xlu1 %v1620_v24, %s4904_s18  ;;  %2018 = vmatpush.bf16.msra.mxu3 %v4109_v53 }
 0x1c1   : > { %v1064_v25 = vpop.f32.mrf.mxu1  ;;  %v954_v6 = vpack.c.bf16 %v5386_v5, %v5383_v20  ;;  %v1283_v60 = vmul.f32 %v4435_v22, %v5339_v61  ;;  %v1379_v61 = vunpack.c.l.b16 %v1315_v21  ;;  %v4107_v21 = vld [vmem:[%s6268_s5 + $0x10] sm:$0xff] }
 0x1c2   : > { %v5395_v17 = vadd.f32 %v5209_v4, %v1064_v25  ;;  %4440 = vrcp.f32 %v1220_v23 }
 0x1c3   : > { %v1316_v48 = vpack.c.bf16 %v1283_v60, %v1283_v60  ;;  %3845 = vmatmul.msk.bf16.gmra.mxu1 %vm976_vm1, %v954_v6  ;;  %4442 = vrcp.f32 %v874_v16 }
 0x1c4   : > { %v1126_v33 = vsub.f32 0.0, %v5395_v17  ;;  %2019 = vmatpush.bf16.msra.mxu3 %v4108_v63 }
 0x1c5   : > { %v4437_v56 = vpop.eup %4436  ;;  %v1380_v57 = vunpack.c.l.b16 %v1316_v48 }
 0x1c6   : > { %v1170_v26 = vmul.f32 1.442695, %v1126_v33  ;;  %v875_v2 = vadd.f32 1.0, %v4437_v56  ;;  %v4439_v43 = vpop.eup %4438  ;;  %v4116_v56 = vld [vmem:[%s6268_s5 + $0x58] sm:$0xff] }
 0x1c7   : > { %v1407_v1 = vpack.c.b16 %v1380_v57, %v1379_v61  ;;  %v1221_v13 = vadd.f32 1.0, %v4439_v43  ;;  %v4106_v61 = vld [vmem:[%s6268_s5 + $0x8] sm:$0xff]  ;;  %1889 = vmatpush.bf16.msra.mxu2 %v4116_v56 }
 0x1c8   : > { %4444 = vpow2.f32 %v1170_v26  ;;  %v4441_v23 = vpop.eup %4440  ;;  %2020 = vmatpush.bf16.msra.mxu3 %v4107_v21  ;;  %v4105_v21 = vld [vmem:[%s6268_s5] sm:$0xff] }
 0x1c9   : > { %4446 = vrcp.f32 %v875_v2  ;;  %v1066_v34 = vpop.f32.mrf.mxu1  ;;  %1641 = vrot.lane.b32.xlu2 %v1407_v1, %s4903_s23  ;;  %v1448_v19 = vshrl.u32 %v1407_v1, 16  ;;  %v1451_v22 = vshll.u32 %v1407_v1, 16  ;;  %v4443_v60 = vpop.eup %4442  ;;  %v1284_v16 = vmul.f32 %v4441_v23, %v5362_v54 }
 0x1ca   : > { %v5407_v3 = vadd.f32 %v5209_v4, %v1066_v34  ;;  %4448 = vrcp.f32 %v1221_v13  ;;  %v5423_v2 = vmul.f32 %v4443_v60, %v5359_v11 }
 0x1cb   : > { %v1450_v25 = vrot.slane %v1448_v19, 7  ;;  %v1574_v6 = vrot.slane %v1451_v22, 1  ;;  %v1317_v34 = vpack.c.bf16 %v1284_v16, %v1284_v16  ;;  %v4114_v16 = vld [vmem:[%s6268_s5 + $0x48] sm:$0xff] }
 0x1cc   : > { %v1127_v24 = vsub.f32 0.0, %v5407_v3  ;;  %2021 = vmatpush.bf16.msra.mxu3 %v4106_v61 }
 0x1cd   : > { %v1575_v33 = vor.u32 %v1574_v6, %v1448_v19  ;;  %v5420_v57 = vor.u32 %v1451_v22, %v1450_v25  ;;  %v4122_v25 = vld [vmem:[%s6268_s5 + $0x88] sm:$0xff]  ;;  %v1381_v6 = vunpack.c.l.b16 %v1317_v34 }
 0x1ce   : > { %v4445_v53 = vpop.eup %4444  ;;  %v1172_v48 = vmul.f32 1.442695, %v1127_v24  ;;  %2155 = vmatpush.bf16.msrb.mxu1 %v4122_v25  ;;  %v4112_v25 = vld [vmem:[%s6268_s5 + $0x38] sm:$0xff] }
 0x1cf   : > { %v4447_v26 = vpop.eup %4446  ;;  %v1222_v63 = vadd.f32 1.0, %v4445_v53  ;;  %v1621_v54 = vsel %vm5274_vm4, %v1575_v33, 0  ;;  %v6285_v33 = vmov 0  }
 0x1d0   : > { %v5426_v43 = vmul.f32 %v4447_v26, %v5369_v46  ;;  %4450 = vpow2.f32 %v1172_v48  ;;  %v4449_v1 = vpop.eup %4448  ;;  %1689 = vrot.lane.b32.xlu0 %v1621_v54, %s4904_s18  ;;  %v4115_v46 = vld [vmem:[%s6268_s5 + $0x50] sm:$0xff]  ;;  %2022 = vmatpush.bf16.msra.mxu3 %v4105_v21 }
 0x1d1   : > { %v1069_v13 = vpop.f32.mrf.mxu1  ;;  %v1285_v11 = vmul.f32 %v4449_v1, %v5372_v47  ;;  %4452 = vrcp.f32 %v1222_v63  ;;  %1890 = vmatpush.bf16.msra.mxu2 %v4115_v46 }
 0x1d2   : > { %6301 = vst [vmem:[#allocation14_spill] sm:$0xff] %v5426_v43  ;;  %v955_v19 = vpack.c.bf16 %v5426_v43, %v5423_v2  ;;  %v5435_v22 = vadd.f32 %v5209_v4, %v1069_v13  ;;  %v4113_v13 = vld [vmem:[%s6268_s5 + $0x40] sm:$0xff] }
 0x1d3   : > { %v1318_v23 = vpack.c.bf16 %v1285_v11, %v1285_v11  ;;  %2023 = vmatmul.bf16.vlgmr.msra.gmra.mxu3 %v6285_v33 }
 0x1d4   : > { %v1128_v24 = vsub.f32 0.0, %v5435_v22  ;;  %3846 = vmatmul.msk.bf16.gmra.mxu1 %vm976_vm1, %v955_v19 }
 0x1d5   : > { %v1382_v60 = vunpack.c.l.b16 %v1318_v23  ;;  %1891 = vmatpush.bf16.msra.mxu2 %v4114_v16 }
 0x1d6   : > { %v4451_v47 = vpop.eup %4450  ;;  %v1174_v53 = vmul.f32 1.442695, %v1128_v24 }
 0x1d7   : > { %v1223_v48 = vadd.f32 1.0, %v4451_v47  ;;  %v1408_v56 = vpack.c.b16 %v1382_v60, %v1381_v6  ;;  %v4453_v61 = vpop.eup %4452 }
 0x1d8   : > { %4454 = vpow2.f32 %v1174_v53  ;;  %v1286_v34 = vmul.f32 %v4453_v61, %v5395_v17 }
 0x1d9   : > { %4456 = vrcp.f32 %v1223_v48  ;;  %v1071_v26 = vpop.f32.mrf.mxu1  ;;  %1643 = vrot.lane.b32.xlu1 %v1408_v56, %s4903_s23  ;;  %v1455_v54 = vshrl.u32 %v1408_v56, 16  ;;  %v1458_v1 = vshll.u32 %v1408_v56, 16  ;;  %1892 = vmatpush.bf16.msra.mxu2 %v4113_v13 }
 0x1da   : > { %v5454_v63 = vadd.f32 %v5209_v4, %v1071_v26  ;;  %v1319_v53 = vpack.c.bf16 %v1286_v34, %v1286_v34  ;;  %v4111_v26 = vld [vmem:[%s6268_s5 + $0x30] sm:$0xff] }
 0x1db   : > { %v1457_v11 = vrot.slane %v1455_v54, 7  ;;  %v1576_v46 = vrot.slane %v1458_v1, 1 }
 0x1dc   : > { %v1129_v19 = vsub.f32 0.0, %v5454_v63 }
 0x1dd   : > { %v1577_v24 = vor.u32 %v1576_v46, %v1455_v54  ;;  %v5464_v47 = vor.u32 %v1458_v1, %v1457_v11  ;;  %1893 = vmatpush.bf16.msra.mxu2 %v4112_v25  ;;  %v1383_v54 = vunpack.c.l.b16 %v1319_v53  ;;  %v4120_v46 = vld [vmem:[%s6268_s5 + $0x78] sm:$0xff] }
 0x1de   : > { %v4455_v21 = vpop.eup %4454  ;;  %v1176_v23 = vmul.f32 1.442695, %v1129_v19 }
 0x1df   : > { %v4457_v6 = vpop.eup %4456  ;;  %v1224_v60 = vadd.f32 1.0, %v4455_v21  ;;  %v1622_v17 = vsel %vm5274_vm4, %v1577_v24, 0 }
 0x1e0   : > { %v1287_v16 = vmul.f32 %v4457_v6, %v5407_v3  ;;  %4458 = vpow2.f32 %v1176_v23  ;;  %1691 = vrot.lane.b32.xlu2 %v1622_v17, %s4904_s18  ;;  %v4121_v3 = vld [vmem:[%s6268_s5 + $0x80] sm:$0xff]  ;;  %v4119_v17 = vld [vmem:[%s6268_s5 + $0x70] sm:$0xff] }
 0x1e1   : > { %v1074_v48 = vpop.f32.mrf.mxu1  ;;  %4460 = vrcp.f32 %v1224_v60  ;;  %1894 = vmatpush.bf16.msra.mxu2 %v4111_v26  ;;  %2156 = vmatpush.bf16.msrb.mxu1 %v4121_v3 }
 0x1e2   : > { %v1320_v56 = vpack.c.bf16 %v1287_v16, %v1287_v16  ;;  %v5471_v61 = vadd.f32 %v5209_v4, %v1074_v48 }
 0x1e4   : > { %v1384_v1 = vunpack.c.l.b16 %v1320_v56  ;;  %v1130_v13 = vsub.f32 0.0, %v5471_v61 }
 0x1e5   : > { %2157 = vmatpush.bf16.msrb.mxu1 %v4120_v46 }
 0x1e6   : > { %v4459_v34 = vpop.eup %4458  ;;  %v1178_v19 = vmul.f32 1.442695, %v1130_v13  ;;  %v1409_v11 = vpack.c.b16 %v1384_v1, %v1383_v54 }
 0x1e7   : > { %v1225_v21 = vadd.f32 1.0, %v4459_v34  ;;  %v4461_v25 = vpop.eup %4460  ;;  %v4118_v34 = vld [vmem:[%s6268_s5 + $0x68] sm:$0xff] }
 0x1e8   : > { %4462 = vpow2.f32 %v1178_v19  ;;  %1645 = vrot.lane.b32.xlu0 %v1409_v11, %s4903_s23  ;;  %v1462_v23 = vshrl.u32 %v1409_v11, 16  ;;  %v1465_v24 = vshll.u32 %v1409_v11, 16  ;;  %v1288_v48 = vmul.f32 %v4461_v25, %v5435_v22  ;;  %v4117_v25 = vld [vmem:[%s6268_s5 + $0x60] sm:$0xff] }
 0x1e9   : > { %4464 = vrcp.f32 %v1225_v21  ;;  %v1076_v6 = vpop.f32.mrf.mxu1  ;;  %2158 = vmatpush.bf16.msrb.mxu1 %v4119_v17 }
 0x1ea   : > { %v1077_v60 = vadd.f32 %v5209_v4, %v1076_v6  ;;  %v1464_v53 = vrot.slane %v1462_v23, 7  ;;  %v1578_v16 = vrot.slane %v1465_v24, 1  ;;  %v1321_v46 = vpack.c.bf16 %v1288_v48, %v1288_v48 }
 0x1ec   : > { %v1131_v56 = vsub.f32 0.0, %v1077_v60  ;;  %v1579_v26 = vor.u32 %v1578_v16, %v1462_v23  ;;  %v5489_v3 = vor.u32 %v1465_v24, %v1464_v53  ;;  %v1385_v6 = vunpack.c.l.b16 %v1321_v46 }
 0x1ed   : > { %2159 = vmatpush.bf16.msrb.mxu1 %v4118_v34 }
 0x1ee   : > { %v4463_v54 = vpop.eup %4462  ;;  %v1180_v1 = vmul.f32 1.442695, %v1131_v56  ;;  %v1623_v13 = vsel %vm5274_vm4, %v1579_v26, 0 }
 0x1ef   : > { %v4465_v19 = vpop.eup %4464  ;;  %v1226_v11 = vadd.f32 1.0, %v4463_v54  ;;  %1693 = vrot.lane.b32.xlu1 %v1623_v13, %s4904_s18 }
 0x1f0   : > { %v1289_v22 = vmul.f32 %v4465_v19, %v5454_v63  ;;  %4466 = vpow2.f32 %v1180_v1 }
 0x1f1   : > { %v1079_v21 = vpop.f32.mrf.mxu1  ;;  %4468 = vrcp.f32 %v1226_v11  ;;  %2160 = vmatpush.bf16.msrb.mxu1 %v4117_v25 }
 0x1f2   : > { %v1322_v23 = vpack.c.bf16 %v1289_v22, %v1289_v22  ;;  %v5499_v24 = vadd.f32 %v5209_v4, %v1079_v21 }
 0x1f4   : > { %v1386_v53 = vunpack.c.l.b16 %v1322_v23  ;;  %v1132_v16 = vsub.f32 0.0, %v5499_v24 }
 0x1f6   : > { %v4467_v17 = vpop.eup %4466  ;;  %v1182_v48 = vmul.f32 1.442695, %v1132_v16  ;;  %v1410_v63 = vpack.c.b16 %v1386_v53, %v1385_v6 }
 0x1f7   : > { %v1227_v56 = vadd.f32 1.0, %v4467_v17  ;;  %v4469_v1 = vpop.eup %4468  ;;  %v4128_v17 = vld [vmem:[%s6272_s9 + $0x18] sm:$0xff] }
 0x1f8   : > { %4470 = vpow2.f32 %v1182_v48  ;;  %1647 = vrot.lane.b32.xlu2 %v1410_v63, %s4903_s23  ;;  %v1469_v26 = vshrl.u32 %v1410_v63, 16  ;;  %v1472_v54 = vshll.u32 %v1410_v63, 16  ;;  %v1290_v46 = vmul.f32 %v4469_v1, %v5471_v61  ;;  %2746 = vmatpush.bf16.msrb.mxu2 %v4128_v17 }
 0x1f9   : > { %4472 = vrcp.f32 %v1227_v56  ;;  %v1081_v13 = vpop.f32.mrf.mxu1 }
 0x1fa   : > { %v1082_v34 = vadd.f32 %v5209_v4, %v1081_v13  ;;  %v1471_v19 = vrot.slane %v1469_v26, 7  ;;  %v1580_v11 = vrot.slane %v1472_v54, 1  ;;  %v1323_v61 = vpack.c.bf16 %v1290_v46, %v1290_v46 }
 0x1fb   : > { %v1634_v21 = vpop.permute.xlu0 %1633  ;;  %v1550_v13 = vsel %vm5516_vm7, 0, %v5278_v42 }
 0x1fc   : > { %v1133_v22 = vsub.f32 0.0, %v1082_v34  ;;  %v1581_v23 = vor.u32 %v1580_v11, %v1469_v26  ;;  %v5508_v25 = vor.u32 %v1472_v54, %v1471_v19  ;;  %v1387_v11 = vunpack.c.l.b16 %v1323_v61 }
 0x1fe   : > { %v4471_v6 = vpop.eup %4470  ;;  %v1184_v53 = vmul.f32 1.442695, %v1133_v22  ;;  %v1624_v16 = vsel %vm5274_vm4, %v1581_v23, 0 }
 0x1ff   : > { %v4473_v48 = vpop.eup %4472  ;;  %v1228_v63 = vadd.f32 1.0, %v4471_v6  ;;  %1695 = vrot.lane.b32.xlu0 %v1624_v16, %s4904_s18 }
 0x200   : > { %v1291_v56 = vmul.f32 %v4473_v48, %v1077_v60  ;;  %4474 = vpow2.f32 %v1184_v53  ;;  %v1715_v60 = vsel %vm976_vm1, %v1550_v13, %v1634_v21 }
 0x201   : > { %v1084_v1 = vpop.f32.mrf.mxu1  ;;  %4476 = vrcp.f32 %v1228_v63 }
 0x202   : > { %v1324_v54 = vpack.c.bf16 %v1291_v56, %v1291_v56  ;;  %v5524_v19 = vadd.f32 %v5209_v4, %v1084_v1 }
 0x203   : > { %v1682_v22 = vpop.permute.xlu0 %1681 }
 0x204   : > { %v1388_v46 = vunpack.c.l.b16 %v1324_v54  ;;  %v1134_v23 = vsub.f32 0.0, %v5524_v19  ;;  %v1762_v6 = vsel %vm610_vm0, %v1715_v60, %v1682_v22  ;;  %v5535_v54 = vld [vmem:[%s6267_s4] ss:$0 sm:$0xff] }
 0x205   : > { %3883 = vmatmul.msk.bf16.vlgmr.msra.gmra.mxu2 %vm1854_vm8, %v1762_v6  ;;  %3923 = vmatmul.msk.bf16.gmra.mxu3 %vm1854_vm8, %v1762_v6 }
 0x206   : > { %v4475_v53 = vpop.eup %4474  ;;  %v1411_v16 = vpack.c.b16 %v1388_v46, %v1387_v11  ;;  %v1186_v17 = vmul.f32 1.442695, %v1134_v23 }
 0x207   : > { %v1229_v42 = vadd.f32 1.0, %v4475_v53  ;;  %v4477_v63 = vpop.eup %4476 }
 0x208   : > { %1649 = vrot.lane.b32.xlu1 %v1411_v16, %s4903_s23  ;;  %v1476_v4 = vshrl.u32 %v1411_v16, 16  ;;  %v1479_v48 = vshll.u32 %v1411_v16, 16  ;;  %v1292_v13 = vmul.f32 %v4477_v63, %v5499_v24  ;;  %v1551_v24 = vsel %vm5516_vm7, 0, %v5311_v62 }
 0x209   : > { %4478 = vrcp.f32 %v1229_v42  ;;  %v1086_v21 = vpop.f32.mrf.mxu1 }
 0x20a   : > { %4480 = vpow2.f32 %v1186_v17  ;;  %v1478_v61 = vrot.slane %v1476_v4, 7  ;;  %v1582_v56 = vrot.slane %v1479_v48, 1  ;;  %v1087_v1 = vadd.f32 %v5535_v54, %v1086_v21 }
 0x20b   : > { %v1636_v11 = vpop.permute.xlu1 %1635  ;;  %v1325_v42 = vpack.c.bf16 %v1292_v13, %v1292_v13 }
 0x20c   : > { %v1583_v46 = vor.u32 %v1582_v56, %v1476_v4  ;;  %v5539_v60 = vor.u32 %v1479_v48, %v1478_v61  ;;  %v1135_v22 = vsub.f32 0.0, %v1087_v1  ;;  %v1718_v61 = vsel %vm976_vm1, %v1551_v24, %v1636_v11 }
 0x20d   : > { %v1389_v48 = vunpack.c.l.b16 %v1325_v42 }
 0x20e   : > { %v1625_v23 = vsel %vm5274_vm4, %v1583_v46, 0  ;;  %v1188_v53 = vmul.f32 1.442695, %v1135_v22 }
 0x20f   : > { %v4479_v6 = vpop.eup %4478  ;;  %1697 = vrot.lane.b32.xlu2 %v1625_v23, %s4904_s18 }
 0x210   : > { %v4481_v16 = vpop.eup %4480  ;;  %v1293_v17 = vmul.f32 %v4479_v6, %v1082_v34  ;;  %4482 = vpow2.f32 %v1188_v53 }
 0x211   : > { %v1230_v33 = vadd.f32 1.0, %v4481_v16  ;;  %v1089_v43 = vpop.f32.mrf.mxu1 }
 0x212   : > { %v1326_v21 = vpack.c.bf16 %v1293_v17, %v1293_v17  ;;  %v5548_v4 = vadd.f32 %v5535_v54, %v1089_v43  ;;  %v1638_v43 = vpop.permute.xlu2 %1637 }
 0x213   : > { %4484 = vrcp.f32 %v1230_v33  ;;  %v1684_v56 = vpop.permute.xlu1 %1683 }
 0x214   : > { %v1390_v63 = vunpack.c.l.b16 %v1326_v21  ;;  %v1136_v13 = vsub.f32 0.0, %v5548_v4  ;;  %v1764_v34 = vsel %vm610_vm0, %v1718_v61, %v1684_v56 }
 0x215   : > { %3884 = vmatmul.msk.bf16.gmra.mxu2 %vm1854_vm8, %v1764_v34  ;;  %3924 = vmatmul.msk.bf16.gmra.mxu3 %vm1854_vm8, %v1764_v34 }
 0x216   : > { %v1412_v46 = vpack.c.b16 %v1390_v63, %v1389_v48  ;;  %v4483_v22 = vpop.eup %4482  ;;  %v1190_v62 = vmul.f32 1.442695, %v1136_v13  ;;  %3974 = vmatmul.msk.bf16.vlgmr.msrb.gmra.mxu1 %vm1854_vm8, %v1764_v34 }
 0x217   : > { %v1231_v23 = vadd.f32 1.0, %v4483_v22 }
 0x218   : > { %1651 = vrot.lane.b32.xlu0 %v1412_v46, %s4903_s23  ;;  %v1483_v33 = vshrl.u32 %v1412_v46, 16  ;;  %v1486_v11 = vshll.u32 %v1412_v46, 16  ;;  %4486 = vpow2.f32 %v1190_v62 }
 0x219   : > { %v4485_v6 = vpop.eup %4484  ;;  %4488 = vrcp.f32 %v1231_v23  ;;  %v1091_v53 = vpop.f32.mrf.mxu1 }
 0x21a   : > { %v1485_v16 = vrot.slane %v1483_v33, 7  ;;  %v1584_v42 = vrot.slane %v1486_v11, 1  ;;  %v1092_v17 = vadd.f32 %v5535_v54, %v1091_v53  ;;  %v1294_v48 = vmul.f32 %v4485_v6, %v5524_v19  ;;  %v1686_v23 = vpop.permute.xlu2 %1685 }
 0x21c   : > { %v1585_v21 = vor.u32 %v1584_v42, %v1483_v33  ;;  %v5558_v24 = vor.u32 %v1486_v11, %v1485_v16  ;;  %v1137_v63 = vsub.f32 0.0, %v1092_v17  ;;  %v1327_v22 = vpack.c.bf16 %v1294_v48, %v1294_v48 }
 0x21d   : > { %v1552_v33 = vsel %vm5516_vm7, 0, %v5344_v36 }
 0x21e   : > { %v1626_v61 = vsel %vm5274_vm4, %v1585_v21, 0  ;;  %v4487_v56 = vpop.eup %4486  ;;  %v1192_v13 = vmul.f32 1.442695, %v1137_v63  ;;  %v1721_v6 = vsel %vm976_vm1, %v1552_v33, %v1638_v43  ;;  %v1391_v16 = vunpack.c.l.b16 %v1327_v22 }
 0x21f   : > { %1699 = vrot.lane.b32.xlu1 %v1626_v61, %s4904_s18  ;;  %v4489_v34 = vpop.eup %4488  ;;  %v1232_v46 = vadd.f32 1.0, %v4487_v56 }
 0x220   : > { %v1295_v62 = vmul.f32 %v4489_v34, %v1087_v1  ;;  %4490 = vpow2.f32 %v1192_v13  ;;  %v1766_v1 = vsel %vm610_vm0, %v1721_v6, %v1686_v23 }
 0x221   : > { %v1094_v53 = vpop.f32.mrf.mxu1  ;;  %4492 = vrcp.f32 %v1232_v46 }
 0x222   : > { %v1328_v19 = vpack.c.bf16 %v1295_v62, %v1295_v62  ;;  %v5568_v11 = vadd.f32 %v5535_v54, %v1094_v53 }
 0x224   : > { %v1392_v42 = vunpack.c.l.b16 %v1328_v19  ;;  %v1138_v21 = vsub.f32 0.0, %v5568_v11 }
 0x225   : > { %3885 = vmatmul.msk.bf16.gmra.mxu2 %vm1854_vm8, %v1766_v1  ;;  %3925 = vmatmul.msk.bf16.gmra.mxu3 %vm1854_vm8, %v1766_v1 }
 0x226   : > { %v4491_v48 = vpop.eup %4490  ;;  %v1194_v63 = vmul.f32 1.442695, %v1138_v21  ;;  %3975 = vmatmul.msk.bf16.gmra.mxu1 %vm1854_vm8, %v1766_v1  ;;  %v1413_v36 = vpack.c.b16 %v1392_v42, %v1391_v16 }
 0x227   : > { %v1233_v61 = vadd.f32 1.0, %v4491_v48  ;;  %v4493_v13 = vpop.eup %4492 }
 0x228   : > { %4494 = vpow2.f32 %v1194_v63  ;;  %1653 = vrot.lane.b32.xlu2 %v1413_v36, %s4903_s23  ;;  %v1490_v43 = vshrl.u32 %v1413_v36, 16  ;;  %v1493_v56 = vshll.u32 %v1413_v36, 16  ;;  %v1296_v23 = vmul.f32 %v4493_v13, %v5548_v4 }
 0x229   : > { %4496 = vrcp.f32 %v1233_v61  ;;  %v1096_v34 = vpop.f32.mrf.mxu1  ;;  %v1553_v4 = vsel %vm5516_vm7, 0, %v5380_v18 }
 0x22a   : > { %v1097_v46 = vadd.f32 %v5535_v54, %v1096_v34  ;;  %v1492_v22 = vrot.slane %v1490_v43, 7  ;;  %v1586_v62 = vrot.slane %v1493_v56, 1  ;;  %v1329_v48 = vpack.c.bf16 %v1296_v23, %v1296_v23 }
 0x22b   : > { %v1640_v36 = vpop.permute.xlu0 %1639 }
 0x22c   : > { %v1139_v53 = vsub.f32 0.0, %v1097_v46  ;;  %v1587_v33 = vor.u32 %v1586_v62, %v1490_v43  ;;  %v5579_v19 = vor.u32 %v1493_v56, %v1492_v22  ;;  %v1724_v56 = vsel %vm976_vm1, %v1553_v4, %v1640_v36 }
 0x22d   : > { %v1393_v22 = vunpack.c.l.b16 %v1329_v48 }
 0x22e   : > { %v4495_v6 = vpop.eup %4494  ;;  %v1196_v16 = vmul.f32 1.442695, %v1139_v53  ;;  %v1627_v42 = vsel %vm5274_vm4, %v1587_v33, 0 }
 0x22f   : > { %v4497_v21 = vpop.eup %4496  ;;  %v1234_v1 = vadd.f32 1.0, %v4495_v6  ;;  %1701 = vrot.lane.b32.xlu0 %v1627_v42, %s4904_s18 }
 0x230   : > { %v1297_v63 = vmul.f32 %v4497_v21, %v1092_v17  ;;  %4498 = vpow2.f32 %v1196_v16 }
 0x231   : > { %v1099_v61 = vpop.f32.mrf.mxu1  ;;  %4500 = vrcp.f32 %v1234_v1 }
 0x232   : > { %v1330_v34 = vpack.c.bf16 %v1297_v63, %v1297_v63  ;;  %v5588_v43 = vadd.f32 %v5535_v54, %v1099_v61  ;;  %v1688_v13 = vpop.permute.xlu1 %1687 }
 0x233   : > { %v1768_v17 = vsel %vm610_vm0, %v1724_v56, %v1688_v13  ;;  %v4127_v56 = vld [vmem:[%s6272_s9 + $0x10] sm:$0xff] }
 0x234   : > { %v1394_v62 = vunpack.c.l.b16 %v1330_v34  ;;  %v1140_v23 = vsub.f32 0.0, %v5588_v43  ;;  %2747 = vmatpush.bf16.msrb.mxu2 %v4127_v56 }
 0x235   : > { %3886 = vmatmul.msk.bf16.gmra.mxu2 %vm1854_vm8, %v1768_v17  ;;  %3926 = vmatmul.msk.bf16.gmra.mxu3 %vm1854_vm8, %v1768_v17 }
 0x236   : > { %v4499_v53 = vpop.eup %4498  ;;  %v1198_v33 = vmul.f32 1.442695, %v1140_v23  ;;  %3976 = vmatmul.msk.bf16.gmra.mxu1 %vm1854_vm8, %v1768_v17  ;;  %v1414_v18 = vpack.c.b16 %v1394_v62, %v1393_v22 }
 0x237   : > { %v1235_v6 = vadd.f32 1.0, %v4499_v53  ;;  %v4501_v21 = vpop.eup %4500  ;;  %v1642_v53 = vpop.permute.xlu2 %1641 }
 0x238   : > { %4502 = vpow2.f32 %v1198_v33  ;;  %1655 = vrot.lane.b32.xlu1 %v1414_v18, %s4903_s23  ;;  %v1497_v16 = vshrl.u32 %v1414_v18, 16  ;;  %v1500_v42 = vshll.u32 %v1414_v18, 16  ;;  %v1298_v61 = vmul.f32 %v4501_v21, %v5568_v11 }
 0x239   : > { %4504 = vrcp.f32 %v1235_v6  ;;  %v1101_v1 = vpop.f32.mrf.mxu1  ;;  %v1554_v6 = vsel %vm5516_vm7, 0, %v5420_v57 }
 0x23a   : > { %v1102_v48 = vadd.f32 %v5535_v54, %v1101_v1  ;;  %v1499_v63 = vrot.slane %v1497_v16, 7  ;;  %v1588_v36 = vrot.slane %v1500_v42, 1  ;;  %v1331_v11 = vpack.c.bf16 %v1298_v61, %v1298_v61 }
 0x23c   : > { %v1141_v34 = vsub.f32 0.0, %v1102_v48  ;;  %v1589_v4 = vor.u32 %v1588_v36, %v1497_v16  ;;  %v5602_v13 = vor.u32 %v1500_v42, %v1499_v63  ;;  %v1727_v42 = vsel %vm976_vm1, %v1554_v6, %v1642_v53 }
 0x23e   : > { %v4503_v22 = vpop.eup %4502  ;;  %v1200_v62 = vmul.f32 1.442695, %v1141_v34  ;;  %v1628_v23 = vsel %vm5274_vm4, %v1589_v4, 0  ;;  %v1395_v34 = vunpack.c.l.b16 %v1331_v11 }
 0x23f   : > { %v4505_v17 = vpop.eup %4504  ;;  %v1236_v33 = vadd.f32 1.0, %v4503_v22  ;;  %1703 = vrot.lane.b32.xlu2 %v1628_v23, %s4904_s18 }
 0x240   : > { %v1299_v18 = vmul.f32 %v4505_v17, %v1097_v46  ;;  %4506 = vpow2.f32 %v1200_v62 }
 0x241   : > { %v1104_v16 = vpop.f32.mrf.mxu1  ;;  %4508 = vrcp.f32 %v1236_v33 }
 0x242   : > { %v1332_v21 = vpack.c.bf16 %v1299_v18, %v1299_v18  ;;  %v5612_v1 = vadd.f32 %v5535_v54, %v1104_v16  ;;  %v1690_v63 = vpop.permute.xlu0 %1689 }
 0x243   : > { %v1770_v36 = vsel %vm610_vm0, %v1727_v42, %v1690_v63 }
 0x244   : > { %v1396_v4 = vunpack.c.l.b16 %v1332_v21  ;;  %v1142_v46 = vsub.f32 0.0, %v5612_v1 }
 0x245   : > { %3887 = vmatmul.msk.bf16.gmra.mxu2 %vm1854_vm8, %v1770_v36  ;;  %3927 = vmatmul.msk.bf16.gmra.mxu3 %vm1854_vm8, %v1770_v36 }
 0x246   : > { %v4507_v57 = vpop.eup %4506  ;;  %v1202_v61 = vmul.f32 1.442695, %v1142_v46  ;;  %3977 = vmatmul.msk.bf16.gmra.mxu1 %vm1854_vm8, %v1770_v36  ;;  %v1415_v56 = vpack.c.b16 %v1396_v4, %v1395_v34 }
 0x247   : > { %v1237_v22 = vadd.f32 1.0, %v4507_v57  ;;  %v4509_v17 = vpop.eup %4508 }
 0x248   : > { %4510 = vpow2.f32 %v1202_v61  ;;  %1657 = vrot.lane.b32.xlu0 %v1415_v56, %s4903_s23  ;;  %v1504_v62 = vshrl.u32 %v1415_v56, 16  ;;  %v1507_v23 = vshll.u32 %v1415_v56, 16  ;;  %v1300_v6 = vmul.f32 %v4509_v17, %v5588_v43 }
 0x249   : > { %4512 = vrcp.f32 %v1237_v22  ;;  %v1106_v53 = vpop.f32.mrf.mxu1  ;;  %v1555_v43 = vsel %vm5516_vm7, 0, %v5464_v47 }
 0x24a   : > { %v1107_v33 = vadd.f32 %v5535_v54, %v1106_v53  ;;  %v1506_v11 = vrot.slane %v1504_v62, 7  ;;  %v1590_v18 = vrot.slane %v1507_v23, 1  ;;  %v1333_v61 = vpack.c.bf16 %v1300_v6, %v1300_v6  ;;  %v1692_v53 = vpop.permute.xlu2 %1691 }
 0x24b   : > { %v1644_v34 = vpop.permute.xlu1 %1643 }
 0x24c   : > { %v1143_v16 = vsub.f32 0.0, %v1107_v33  ;;  %v1591_v42 = vor.u32 %v1590_v18, %v1504_v62  ;;  %v5622_v21 = vor.u32 %v1507_v23, %v1506_v11  ;;  %v1730_v22 = vsel %vm976_vm1, %v1555_v43, %v1644_v34 }
 0x24d   : > { %v1397_v11 = vunpack.c.l.b16 %v1333_v61 }
 0x24e   : > { %v4511_v63 = vpop.eup %4510  ;;  %v1204_v36 = vmul.f32 1.442695, %v1143_v16  ;;  %v1629_v4 = vsel %vm5274_vm4, %v1591_v42, 0 }
 0x24f   : > { %v4513_v46 = vpop.eup %4512  ;;  %v1238_v57 = vadd.f32 1.0, %v4511_v63  ;;  %1705 = vrot.lane.b32.xlu1 %v1629_v4, %s4904_s18 }
 0x250   : > { %v1301_v56 = vmul.f32 %v4513_v46, %v1102_v48  ;;  %4514 = vpow2.f32 %v1204_v36  ;;  %v1772_v48 = vsel %vm610_vm0, %v1730_v22, %v1692_v53 }
 0x251   : > { %v1109_v62 = vpop.f32.mrf.mxu1  ;;  %4516 = vrcp.f32 %v1238_v57 }
 0x252   : > { %v1334_v23 = vpack.c.bf16 %v1301_v56, %v1301_v56  ;;  %v5632_v17 = vadd.f32 %v5535_v54, %v1109_v62 }
 0x254   : > { %v1398_v18 = vunpack.c.l.b16 %v1334_v23  ;;  %v1144_v16 = vsub.f32 0.0, %v5632_v17 }
 0x255   : > { %3888 = vmatmul.msk.bf16.gmra.mxu2 %vm1854_vm8, %v1772_v48  ;;  %3928 = vmatmul.msk.bf16.gmra.mxu3 %vm1854_vm8, %v1772_v48 }
 0x256   : > { %v4515_v47 = vpop.eup %4514  ;;  %v1206_v6 = vmul.f32 1.442695, %v1144_v16  ;;  %3978 = vmatmul.msk.bf16.gmra.mxu1 %vm1854_vm8, %v1772_v48  ;;  %v1416_v42 = vpack.c.b16 %v1398_v18, %v1397_v11 }
 0x257   : > { %v1239_v63 = vadd.f32 1.0, %v4515_v47  ;;  %v4517_v4 = vpop.eup %4516 }
 0x258   : > { %4518 = vpow2.f32 %v1206_v6  ;;  %1659 = vrot.lane.b32.xlu2 %v1416_v42, %s4903_s23  ;;  %v1511_v36 = vshrl.u32 %v1416_v42, 16  ;;  %v1514_v34 = vshll.u32 %v1416_v42, 16  ;;  %v1302_v43 = vmul.f32 %v4517_v4, %v5612_v1 }
 0x259   : > { %4520 = vrcp.f32 %v1239_v63  ;;  %v1111_v46 = vpop.f32.mrf.mxu1  ;;  %v1556_v1 = vsel %vm5516_vm7, 0, %v5489_v3 }
 0x25a   : > { %v1112_v57 = vadd.f32 %v5535_v54, %v1111_v46  ;;  %v1513_v61 = vrot.slane %v1511_v36, 7  ;;  %v1592_v56 = vrot.slane %v1514_v34, 1  ;;  %v1646_v18 = vpop.permute.xlu0 %1645  ;;  %v4124_v54 = vld [vmem:[%s6270_s7 + $0x8] sm:$0xff]  ;;  %v1335_v6 = vpack.c.bf16 %v1302_v43, %v1302_v43 }
 0x25b   : > { %2623 = vmatpush.bf16.msrb.mxu0 %v4124_v54  ;;  %v1648_v54 = vpop.permute.xlu2 %1647 }
 0x25c   : > { %v1145_v22 = vsub.f32 0.0, %v1112_v57  ;;  %v5642_v62 = vor.u32 %v1514_v34, %v1513_v61  ;;  %v1593_v23 = vor.u32 %v1592_v56, %v1511_v36  ;;  %v1733_v36 = vsel %vm976_vm1, %v1556_v1, %v1646_v18  ;;  %v4126_v56 = vld [vmem:[%s6272_s9 + $0x8] sm:$0xff] }
 0x25d   : > { %v1399_v46 = vunpack.c.l.b16 %v1335_v6  ;;  %2748 = vmatpush.bf16.msrb.mxu2 %v4126_v56 }
 0x25e   : > { %v4519_v53 = vpop.eup %4518  ;;  %v1208_v11 = vmul.f32 1.442695, %v1145_v22  ;;  %v1630_v47 = vsel %vm5274_vm4, %v1593_v23, 0 }
 0x25f   : > { %v4521_v16 = vpop.eup %4520  ;;  %v1240_v48 = vadd.f32 1.0, %v4519_v53  ;;  %1707 = vrot.lane.b32.xlu0 %v1630_v47, %s4904_s18 }
 0x260   : > { %v1303_v42 = vmul.f32 %v4521_v16, %v1107_v33  ;;  %4522 = vpow2.f32 %v1208_v11 }
 0x261   : > { %v1694_v63 = vpop.permute.xlu1 %1693  ;;  %4524 = vrcp.f32 %v1240_v48 }
 0x262   : > { %v1336_v34 = vpack.c.bf16 %v1303_v42, %v1303_v42  ;;  %v1774_v4 = vsel %vm610_vm0, %v1733_v36, %v1694_v63  ;;  %v1557_v63 = vsel %vm5516_vm7, 0, %v5508_v25 }
 0x264   : > { %v1400_v61 = vunpack.c.l.b16 %v1336_v34 }
 0x265   : > { %3889 = vmatmul.msk.bf16.gmra.mxu2 %vm1854_vm8, %v1774_v4  ;;  %3929 = vmatmul.msk.bf16.gmra.mxu3 %vm1854_vm8, %v1774_v4 }
 0x266   : > { %v4523_v33 = vpop.eup %4522  ;;  %3979 = vmatmul.msk.bf16.gmra.mxu1 %vm1854_vm8, %v1774_v4  ;;  %v1417_v3 = vpack.c.b16 %v1400_v61, %v1399_v46  ;;  %v1736_v4 = vsel %vm976_vm1, %v1557_v63, %v1648_v54 }
 0x267   : > { %v1241_v43 = vadd.f32 1.0, %v4523_v33  ;;  %v4525_v53 = vpop.eup %4524 }
 0x268   : > { %1661 = vrot.lane.b32.xlu1 %v1417_v3, %s4903_s23  ;;  %v1518_v22 = vshrl.u32 %v1417_v3, 16  ;;  %v1521_v23 = vshll.u32 %v1417_v3, 16  ;;  %v1304_v16 = vmul.f32 %v4525_v53, %v5632_v17  ;;  %v2024_v3 = vpop.f32.mrf.mxu3 }
 0x269   : > { %4526 = vrcp.f32 %v1241_v43 }
 0x26a   : > { %v1520_v11 = vrot.slane %v1518_v22, 7  ;;  %v1594_v18 = vrot.slane %v1521_v23, 1  ;;  %v1337_v1 = vpack.c.bf16 %v1304_v16, %v1304_v16 }
 0x26c   : > { %v1595_v48 = vor.u32 %v1594_v18, %v1518_v22  ;;  %v5663_v47 = vor.u32 %v1521_v23, %v1520_v11  ;;  %v1401_v61 = vunpack.c.l.b16 %v1337_v1 }
 0x26e   : > { %v1631_v6 = vsel %vm5274_vm4, %v1595_v48, 0  ;;  %v1558_v48 = vsel %vm5516_vm7, 0, %v5539_v60 }
 0x26f   : > { %v4527_v42 = vpop.eup %4526  ;;  %1709 = vrot.lane.b32.xlu2 %v1631_v6, %s4904_s18  ;;  %v1698_v6 = vpop.permute.xlu2 %1697 }
 0x270   : > { %v1305_v36 = vmul.f32 %v4527_v42, %v1112_v57  ;;  %v2026_v18 = vpop.f32.mrf.mxu3 }
 0x271   : > { %v1696_v34 = vpop.permute.xlu0 %1695 }
 0x272   : > { %v1338_v17 = vpack.c.bf16 %v1305_v36, %v1305_v36  ;;  %v1776_v46 = vsel %vm610_vm0, %v1736_v4, %v1696_v34  ;;  %v1559_v36 = vsel %vm5516_vm7, 0, %v5558_v24  ;;  %v4123_v24 = vld [vmem:[%s6270_s7] sm:$0xff] }
 0x273   : > { %2624 = vmatpush.bf16.msrb.mxu0 %v4123_v24 }
 0x274   : > { %v1402_v33 = vunpack.c.l.b16 %v1338_v17 }
 0x275   : > { %3890 = vmatmul.msk.bf16.gmra.mxu2 %vm1854_vm8, %v1776_v46  ;;  %3930 = vmatmul.msk.bf16.gmra.mxu3 %vm1854_vm8, %v1776_v46 }
 0x276   : > { %3980 = vmatmul.msk.bf16.gmra.mxu1 %vm1854_vm8, %v1776_v46  ;;  %v1418_v56 = vpack.c.b16 %v1402_v33, %v1401_v61  ;;  %v5697_v61 = vld [vmem:[%s6269_s6] ss:$0 sm:$0xff] }
 0x278   : > { %1663 = vrot.lane.b32.xlu0 %v1418_v56, %s4903_s23  ;;  %v1525_v25 = vshrl.u32 %v1418_v56, 16  ;;  %v1528_v57 = vshll.u32 %v1418_v56, 16 }
 0x27a   : > { %v1527_v43 = vrot.slane %v1525_v25, 7  ;;  %v1596_v22 = vrot.slane %v1528_v57, 1  ;;  %v1650_v11 = vpop.permute.xlu1 %1649 }
 0x27b   : > { %v1739_v54 = vsel %vm976_vm1, %v1558_v48, %v1650_v11 }
 0x27c   : > { %v1597_v23 = vor.u32 %v1596_v22, %v1525_v25  ;;  %v5677_v53 = vor.u32 %v1528_v57, %v1527_v43  ;;  %v1778_v42 = vsel %vm610_vm0, %v1739_v54, %v1698_v6 }
 0x27e   : > { %v1632_v16 = vsel %vm5274_vm4, %v1597_v23, 0 }
 0x27f   : > { %1711 = vrot.lane.b32.xlu1 %v1632_v16, %s4904_s18 }
 0x282   : > { %v1654_v54 = vpop.permute.xlu2 %1653 }
 0x285   : > { %3891 = vmatmul.msk.bf16.gmra.mxu2 %vm1854_vm8, %v1778_v42  ;;  %3931 = vmatmul.msk.bf16.gmra.mxu3 %vm1854_vm8, %v1778_v42 }
 0x286   : > { %3981 = vmatmul.msk.bf16.gmra.mxu1 %vm1854_vm8, %v1778_v42  ;;  %v1560_v42 = vsel %vm5516_vm7, 0, %v5579_v19 }
 0x288   : > { %v1896_v1 = vpop.f32.mrf.mxu2  ;;  %v2029_v37 = vpop.f32.mrf.mxu3 }
 0x289   : > { %v2025_v46 = vadd.f32 %v2024_v3, %v1896_v1 }
 0x28a   : > { %v1652_v63 = vpop.permute.xlu0 %1651 }
 0x28b   : > { %v1742_v4 = vsel %vm976_vm1, %v1559_v36, %v1652_v63 }
 0x290   : > { %v1898_v34 = vpop.f32.mrf.mxu2  ;;  %v2031_v60 = vpop.f32.mrf.mxu3 }
 0x291   : > { %v1700_v17 = vpop.permute.xlu1 %1699  ;;  %v2027_v23 = vadd.f32 %v2026_v18, %v1898_v34 }
 0x292   : > { %v1780_v33 = vsel %vm610_vm0, %v1742_v4, %v1700_v17  ;;  %v1745_v4 = vsel %vm976_vm1, %v1560_v42, %v1654_v54 }
 0x293   : > { %v2162_v56 = vpop.f32.mrf.mxu1 }
 0x294   : > { %v2242_v25 = vadd.f32 %v2162_v56, %v2025_v46 }
 0x295   : > { %3892 = vmatmul.msk.bf16.gmra.mxu2 %vm1854_vm8, %v1780_v33  ;;  %3932 = vmatmul.msk.bf16.gmra.mxu3 %vm1854_vm8, %v1780_v33 }
 0x296   : > { %v2277_v57 = vadd.f32 %v5697_v61, %v2242_v25  ;;  %3982 = vmatmul.msk.bf16.gmra.mxu1 %vm1854_vm8, %v1780_v33 }
 0x298   : > { %v2309_v3 = vsub.f32 0.0, %v2277_v57  ;;  %v1901_v43 = vpop.f32.mrf.mxu2  ;;  %v2034_v22 = vpop.f32.mrf.mxu3 }
 0x299   : > { %v2030_v33 = vadd.f32 %v2029_v37, %v1901_v43 }
 0x29a   : > { %v2341_v11 = vmul.f32 1.442695, %v2309_v3 }
 0x29b   : > { %v2164_v16 = vpop.f32.mrf.mxu1 }
 0x29c   : > { %4528 = vpow2.f32 %v2341_v11  ;;  %v2243_v48 = vadd.f32 %v2164_v16, %v2027_v23 }
 0x29e   : > { %v2278_v6 = vadd.f32 %v5697_v61, %v2243_v48 }
 0x2a0   : > { %v2310_v1 = vsub.f32 0.0, %v2278_v6  ;;  %v1903_v63 = vpop.f32.mrf.mxu2  ;;  %v2036_v36 = vpop.f32.mrf.mxu3 }
 0x2a1   : > { %v1702_v17 = vpop.permute.xlu0 %1701  ;;  %v2032_v11 = vadd.f32 %v2031_v60, %v1903_v63 }
 0x2a2   : > { %v4529_v46 = vpop.eup %4528  ;;  %v2343_v18 = vmul.f32 1.442695, %v2310_v1  ;;  %v1782_v34 = vsel %vm610_vm0, %v1745_v4, %v1702_v17 }
 0x2a3   : > { %v2167_v56 = vpop.f32.mrf.mxu1  ;;  %v2405_v24 = vadd.f32 1.0, %v4529_v46 }
 0x2a4   : > { %4530 = vpow2.f32 %v2343_v18  ;;  %v2244_v25 = vadd.f32 %v2167_v56, %v2030_v33  ;;  %v1561_v33 = vsel %vm5516_vm7, 0, %v5602_v13 }
 0x2a5   : > { %3893 = vmatmul.msk.bf16.gmra.mxu2 %vm1854_vm8, %v1782_v34  ;;  %3933 = vmatmul.msk.bf16.gmra.mxu3 %vm1854_vm8, %v1782_v34  ;;  %4532 = vrcp.f32 %v2405_v24 }
 0x2a6   : > { %v5716_v19 = vadd.f32 %v5697_v61, %v2244_v25  ;;  %3983 = vmatmul.msk.bf16.gmra.mxu1 %vm1854_vm8, %v1782_v34 }
 0x2a8   : > { %v2311_v3 = vsub.f32 0.0, %v5716_v19  ;;  %v1906_v23 = vpop.f32.mrf.mxu2  ;;  %v5720_v37 = vpop.f32.mrf.mxu3 }
 0x2a9   : > { %v2035_v25 = vadd.f32 %v2034_v22, %v1906_v23 }
 0x2aa   : > { %v4531_v43 = vpop.eup %4530  ;;  %v2345_v16 = vmul.f32 1.442695, %v2311_v3  ;;  %v1656_v4 = vpop.permute.xlu1 %1655 }
 0x2ab   : > { %v2406_v48 = vadd.f32 1.0, %v4531_v43  ;;  %v2169_v54 = vpop.f32.mrf.mxu1  ;;  %v4533_v17 = vpop.eup %4532  ;;  %v1748_v60 = vsel %vm976_vm1, %v1561_v33, %v1656_v4 }
 0x2ac   : > { %4534 = vpow2.f32 %v2345_v16  ;;  %v2245_v42 = vadd.f32 %v2169_v54, %v2032_v11  ;;  %v2469_v56 = vmul.f32 %v4533_v17, %v2277_v57  ;;  %v1704_v43 = vpop.permute.xlu2 %1703 }
 0x2ad   : > { %4536 = vrcp.f32 %v2406_v48  ;;  %v1784_v54 = vsel %vm610_vm0, %v1748_v60, %v1704_v43 }
 0x2ae   : > { %v2280_v1 = vadd.f32 %v5697_v61, %v2245_v42  ;;  %v2501_v13 = vadd.f32 %v2469_v56, %v5122_v40 }
 0x2b0   : > { %v2312_v46 = vsub.f32 0.0, %v2280_v1  ;;  %v1908_v18 = vpop.f32.mrf.mxu2  ;;  %v5726_v34 = vpop.f32.mrf.mxu3 }
 0x2b1   : > { %v2037_v33 = vadd.f32 %v2036_v36, %v1908_v18  ;;  %v1562_v36 = vsel %vm5516_vm7, 0, %v5622_v21 }
 0x2b2   : > { %v4535_v63 = vpop.eup %4534  ;;  %v2347_v24 = vmul.f32 1.442695, %v2312_v46 }
 0x2b3   : > { %v4537_v3 = vpop.eup %4536  ;;  %v2172_v11 = vpop.f32.mrf.mxu1  ;;  %v2407_v42 = vadd.f32 1.0, %v4535_v63 }
 0x2b4   : > { %v2470_v16 = vmul.f32 %v4537_v3, %v2278_v6  ;;  %4538 = vpow2.f32 %v2347_v24  ;;  %v2246_v48 = vadd.f32 %v2172_v11, %v2035_v25  ;;  %v4125_v24 = vld [vmem:[%s6272_s9] sm:$0xff] }
 0x2b5   : > { %3894 = vmatmul.msk.bf16.gmra.mxu2 %vm1854_vm8, %v1784_v54  ;;  %3934 = vmatmul.msk.bf16.gmra.mxu3 %vm1854_vm8, %v1784_v54  ;;  %4540 = vrcp.f32 %v2407_v42 }
 0x2b6   : > { %v2502_v4 = vadd.f32 %v2470_v16, %v5124_v41  ;;  %v5735_v57 = vadd.f32 %v5697_v61, %v2246_v48  ;;  %3984 = vmatmul.msk.bf16.gmra.mxu1 %vm1854_vm8, %v1784_v54  ;;  %2749 = vmatpush.bf16.msrb.mxu2 %v4125_v24 }
 0x2b8   : > { %v2533_v22 = vpack.c.bf16 %v2502_v4, %v2501_v13  ;;  %v2313_v6 = vsub.f32 0.0, %v5735_v57  ;;  %v1911_v23 = vpop.f32.mrf.mxu2  ;;  %v5739_v17 = vpop.f32.mrf.mxu3 }
 0x2b9   : > { %v2040_v13 = vadd.f32 %v5720_v37, %v1911_v23 }
 0x2ba   : > { %v4539_v46 = vpop.eup %4538  ;;  %v2349_v60 = vmul.f32 1.442695, %v2313_v6  ;;  %3997 = vmatmul.msk.bf16.vlgmr.msrb.gmra.mxu0 %vm976_vm1, %v2533_v22  ;;  %v1658_v25 = vpop.permute.xlu0 %1657 }
 0x2bb   : > { %v2408_v40 = vadd.f32 1.0, %v4539_v46  ;;  %v2174_v63 = vpop.f32.mrf.mxu1  ;;  %v4541_v3 = vpop.eup %4540  ;;  %v1751_v16 = vsel %vm976_vm1, %v1562_v36, %v1658_v25 }
 0x2bc   : > { %4542 = vpow2.f32 %v2349_v60  ;;  %v2247_v41 = vadd.f32 %v2174_v63, %v2037_v33  ;;  %v2471_v42 = vmul.f32 %v4541_v3, %v5716_v19 }
 0x2bd   : > { %4544 = vrcp.f32 %v2408_v40 }
 0x2be   : > { %v2282_v56 = vadd.f32 %v5697_v61, %v2247_v41  ;;  %v2503_v40 = vadd.f32 %v2471_v42, %v5133_v58 }
 0x2c0   : > { %v2314_v43 = vsub.f32 0.0, %v2282_v56  ;;  %v1913_v18 = vpop.f32.mrf.mxu2  ;;  %v5749_v11 = vpop.f32.mrf.mxu3 }
 0x2c1   : > { %v1706_v48 = vpop.permute.xlu1 %1705  ;;  %v2042_v24 = vadd.f32 %v5726_v34, %v1913_v18  ;;  %v1563_v34 = vsel %vm5516_vm7, 0, %v5642_v62 }
 0x2c2   : > { %v4543_v54 = vpop.eup %4542  ;;  %v2351_v4 = vmul.f32 1.442695, %v2314_v43  ;;  %v1786_v22 = vsel %vm610_vm0, %v1751_v16, %v1706_v48  ;;  %v1660_v48 = vpop.permute.xlu2 %1659 }
 0x2c3   : > { %v4545_v6 = vpop.eup %4544  ;;  %v2177_v46 = vpop.f32.mrf.mxu1  ;;  %v2409_v60 = vadd.f32 1.0, %v4543_v54 }
 0x2c4   : > { %v2472_v33 = vmul.f32 %v4545_v6, %v2280_v1  ;;  %4546 = vpow2.f32 %v2351_v4  ;;  %v2248_v21 = vadd.f32 %v2177_v46, %v2040_v13 }
 0x2c5   : > { %3895 = vmatmul.msk.bf16.gmra.mxu2 %vm1854_vm8, %v1786_v22  ;;  %3935 = vmatmul.msk.bf16.gmra.mxu3 %vm1854_vm8, %v1786_v22  ;;  %4548 = vrcp.f32 %v2409_v60 }
 0x2c6   : > { %v2504_v63 = vadd.f32 %v2472_v33, %v5135_v59  ;;  %v5760_v19 = vadd.f32 %v5697_v61, %v2248_v21  ;;  %3985 = vmatmul.msk.bf16.gmra.mxu1 %vm1854_vm8, %v1786_v22  ;;  %v1754_v22 = vsel %vm976_vm1, %v1563_v34, %v1660_v48 }
 0x2c8   : > { %v2315_v37 = vsub.f32 0.0, %v5760_v19  ;;  %v1916_v23 = vpop.f32.mrf.mxu2  ;;  %v2049_v1 = vpop.f32.mrf.mxu3  ;;  %v2534_v41 = vpack.c.bf16 %v2504_v63, %v2503_v40 }
 0x2c9   : > { %v2045_v6 = vadd.f32 %v5739_v17, %v1916_v23 }
 0x2ca   : > { %v4547_v25 = vpop.eup %4546  ;;  %v2353_v3 = vmul.f32 1.442695, %v2315_v37  ;;  %3998 = vmatmul.msk.bf16.gmra.mxu0 %vm976_vm1, %v2534_v41 }
 0x2cb   : > { %v2410_v58 = vadd.f32 1.0, %v4547_v25  ;;  %v2179_v43 = vpop.f32.mrf.mxu1  ;;  %v4549_v16 = vpop.eup %4548 }
 0x2cc   : > { %4550 = vpow2.f32 %v2353_v3  ;;  %v2249_v59 = vadd.f32 %v2179_v43, %v2042_v24  ;;  %v2473_v4 = vmul.f32 %v4549_v16, %v5735_v57 }
 0x2cd   : > { %4552 = vrcp.f32 %v2410_v58 }
 0x2ce   : > { %v2284_v36 = vadd.f32 %v5697_v61, %v2249_v59  ;;  %v2505_v62 = vadd.f32 %v2473_v4, %v5144_v12 }
 0x2d0   : > { %v2316_v54 = vsub.f32 0.0, %v2284_v36  ;;  %v1918_v42 = vpop.f32.mrf.mxu2  ;;  %v5767_v13 = vpop.f32.mrf.mxu3 }
 0x2d1   : > { %v1708_v33 = vpop.permute.xlu0 %1707  ;;  %v2047_v58 = vadd.f32 %v5749_v11, %v1918_v42 }
 0x2d2   : > { %v4551_v18 = vpop.eup %4550  ;;  %v2355_v46 = vmul.f32 1.442695, %v2316_v54  ;;  %v1788_v40 = vsel %vm610_vm0, %v1754_v22, %v1708_v33 }
 0x2d3   : > { %v4553_v21 = vpop.eup %4552  ;;  %v2182_v60 = vpop.f32.mrf.mxu1  ;;  %v2411_v41 = vadd.f32 1.0, %v4551_v18  ;;  %v1564_v18 = vsel %vm5516_vm7, 0, %v5663_v47 }
 0x2d4   : > { %v2474_v63 = vmul.f32 %v4553_v21, %v2282_v56  ;;  %4554 = vpow2.f32 %v2355_v46  ;;  %v2250_v37 = vadd.f32 %v2182_v60, %v2045_v6  ;;  %v1710_v60 = vpop.permute.xlu2 %1709 }
 0x2d5   : > { %3896 = vmatmul.msk.bf16.gmra.mxu2 %vm1854_vm8, %v1788_v40  ;;  %3936 = vmatmul.msk.bf16.gmra.mxu3 %vm1854_vm8, %v1788_v40  ;;  %4556 = vrcp.f32 %v2411_v41 }
 0x2d6   : > { %v2506_v57 = vadd.f32 %v2474_v63, %v5146_v14  ;;  %v5781_v17 = vadd.f32 %v5697_v61, %v2250_v37  ;;  %3986 = vmatmul.msk.bf16.gmra.mxu1 %vm1854_vm8, %v1788_v40 }
 0x2d8   : > { %v2317_v23 = vsub.f32 0.0, %v5781_v17  ;;  %v1921_v25 = vpop.f32.mrf.mxu2  ;;  %v5785_v56 = vpop.f32.mrf.mxu3  ;;  %v2535_v24 = vpack.c.bf16 %v2506_v57, %v2505_v62 }
 0x2d9   : > { %v2050_v46 = vadd.f32 %v2049_v1, %v1921_v25 }
 0x2da   : > { %v4555_v3 = vpop.eup %4554  ;;  %v2357_v43 = vmul.f32 1.442695, %v2317_v23  ;;  %3999 = vmatmul.msk.bf16.gmra.mxu0 %vm976_vm1, %v2535_v24  ;;  %v1662_v48 = vpop.permute.xlu1 %1661 }
 0x2db   : > { %v2412_v12 = vadd.f32 1.0, %v4555_v3  ;;  %v2184_v14 = vpop.f32.mrf.mxu1  ;;  %v4557_v54 = vpop.eup %4556  ;;  %v1757_v11 = vsel %vm976_vm1, %v1564_v18, %v1662_v48 }
 0x2dc   : > { %4558 = vpow2.f32 %v2357_v43  ;;  %v2251_v59 = vadd.f32 %v2184_v14, %v2047_v58  ;;  %v2475_v6 = vmul.f32 %v4557_v54, %v5760_v19  ;;  %v1790_v41 = vsel %vm610_vm0, %v1757_v11, %v1710_v60 }
 0x2dd   : > { %4560 = vrcp.f32 %v2412_v12  ;;  %v1565_v54 = vsel %vm5516_vm7, 0, %v5677_v53 }
 0x2de   : > { %v2286_v16 = vadd.f32 %v5697_v61, %v2251_v59  ;;  %v2507_v47 = vadd.f32 %v2475_v6, %v5155_v31 }
 0x2e0   : > { %v2318_v34 = vsub.f32 0.0, %v2286_v16  ;;  %v1923_v4 = vpop.f32.mrf.mxu2  ;;  %v5793_v22 = vpop.f32.mrf.mxu3 }
 0x2e1   : > { %v2052_v3 = vadd.f32 %v5767_v13, %v1923_v4 }
 0x2e2   : > { %v4559_v42 = vpop.eup %4558  ;;  %v2359_v33 = vmul.f32 1.442695, %v2318_v34 }
 0x2e3   : > { %v4561_v21 = vpop.eup %4560  ;;  %v2187_v40 = vpop.f32.mrf.mxu1  ;;  %v2413_v62 = vadd.f32 1.0, %v4559_v42 }
 0x2e4   : > { %v2476_v63 = vmul.f32 %v4561_v21, %v2284_v36  ;;  %4562 = vpow2.f32 %v2359_v33  ;;  %v2252_v37 = vadd.f32 %v2187_v40, %v2050_v46 }
 0x2e5   : > { %3897 = vmatmul.msk.bf16.gmra.mxu2 %vm1854_vm8, %v1790_v41  ;;  %3937 = vmatmul.msk.bf16.gmra.mxu3 %vm1854_vm8, %v1790_v41  ;;  %4564 = vrcp.f32 %v2413_v62 }
 0x2e6   : > { %v2508_v57 = vadd.f32 %v2476_v63, %v5157_v32  ;;  %v2287_v19 = vadd.f32 %v5697_v61, %v2252_v37  ;;  %3987 = vmatmul.msk.bf16.gmra.mxu1 %vm1854_vm8, %v1790_v41 }
 0x2e8   : > { %v2319_v1 = vsub.f32 0.0, %v2287_v19  ;;  %v1926_v23 = vpop.f32.mrf.mxu2  ;;  %v2059_v36 = vpop.f32.mrf.mxu3  ;;  %v2536_v25 = vpack.c.bf16 %v2508_v57, %v2507_v47 }
 0x2e9   : > { %v2055_v6 = vadd.f32 %v5785_v56, %v1926_v23 }
 0x2ea   : > { %v4563_v24 = vpop.eup %4562  ;;  %v2361_v58 = vmul.f32 1.442695, %v2319_v1  ;;  %4000 = vmatmul.msk.bf16.gmra.mxu0 %vm976_vm1, %v2536_v25  ;;  %v1664_v14 = vpop.permute.xlu0 %1663 }
 0x2eb   : > { %v2414_v43 = vadd.f32 1.0, %v4563_v24  ;;  %v2189_v12 = vpop.f32.mrf.mxu1  ;;  %v4565_v59 = vpop.eup %4564  ;;  %v1760_v13 = vsel %vm976_vm1, %v1565_v54, %v1664_v14 }
 0x2ec   : > { %4566 = vpow2.f32 %v2361_v58  ;;  %v2253_v31 = vadd.f32 %v2189_v12, %v2052_v3  ;;  %v2477_v42 = vmul.f32 %v4565_v59, %v5781_v17 }
 0x2ed   : > { %4568 = vrcp.f32 %v2414_v43 }
 0x2ee   : > { %v2288_v32 = vadd.f32 %v5697_v61, %v2253_v31  ;;  %v2509_v53 = vadd.f32 %v2477_v42, %v5166_v51 }
 0x2f0   : > { %v2320_v48 = vsub.f32 0.0, %v2288_v32  ;;  %v1928_v34 = vpop.f32.mrf.mxu2  ;;  %v2061_v18 = vpop.f32.mrf.mxu3 }
 0x2f1   : > { %v1712_v4 = vpop.permute.xlu1 %1711 }
 0x2f2   : > { %v4567_v11 = vpop.eup %4566  ;;  %v2363_v46 = vmul.f32 1.442695, %v2320_v48  ;;  %v1792_v33 = vsel %vm610_vm0, %v1760_v13, %v1712_v4  ;;  %v4785_v4 = vld [vmem:[%s5069_s17] sm:$0xff] }
 0x2f3   : > { %v4569_v21 = vpop.eup %4568  ;;  %v2192_v60 = vpop.f32.mrf.mxu1  ;;  %v2415_v26 = vadd.f32 1.0, %v4567_v11 }
 0x2f4   : > { %v2478_v40 = vmul.f32 %v4569_v21, %v2286_v16  ;;  %4570 = vpow2.f32 %v2363_v46  ;;  %v2254_v63 = vadd.f32 %v2192_v60, %v2055_v6  ;;  %v2057_v16 = vadd.f32 %v5793_v22, %v1928_v34 }
 0x2f5   : > { %3898 = vmatmul.msk.bf16.gmra.mxu2 %vm1854_vm8, %v1792_v33  ;;  %4572 = vrcp.f32 %v2415_v26  ;;  %v6304_v46 = vmov 0  }
 0x2f6   : > { %v2510_v37 = vadd.f32 %v2478_v40, %v5168_v52  ;;  %v2289_v41 = vadd.f32 %v5697_v61, %v2254_v63  ;;  %3988 = vmatmul.msk.bf16.gmra.mxu1 %vm1854_vm8, %v1792_v33 }
 0x2f8   : > { %v2321_v17 = vsub.f32 0.0, %v2289_v41  ;;  %v1931_v56 = vpop.f32.mrf.mxu2  ;;  %v2064_v62 = vpop.f32.mrf.mxu3  ;;  %v2537_v47 = vpack.c.bf16 %v2510_v37, %v2509_v53 }
 0x2f9   : > { %v2060_v14 = vadd.f32 %v2059_v36, %v1931_v56 }
 0x2fa   : > { %v4571_v57 = vpop.eup %4570  ;;  %v2365_v1 = vmul.f32 1.442695, %v2321_v17  ;;  %4001 = vmatmul.msk.bf16.gmra.mxu0 %vm976_vm1, %v2537_v47 }
 0x2fb   : > { %v2416_v23 = vadd.f32 1.0, %v4571_v57  ;;  %v2194_v25 = vpop.f32.mrf.mxu1  ;;  %v4573_v24 = vpop.eup %4572 }
 0x2fc   : > { %4574 = vpow2.f32 %v2365_v1  ;;  %v2255_v51 = vadd.f32 %v2194_v25, %v2057_v16  ;;  %v2479_v31 = vmul.f32 %v4573_v24, %v2287_v19  ;;  %v4132_v19 = vld [vmem:[%s6274_s11 + $0x18] sm:$0xff] }
 0x2fd   : > { %4576 = vrcp.f32 %v2416_v23  ;;  %3287 = vmatpush.bf16.msrb.mxu3 %v4132_v19 }
 0x2fe   : > { %v2290_v52 = vadd.f32 %v5697_v61, %v2255_v51  ;;  %v2511_v11 = vadd.f32 %v2479_v31, %v5177_v7 }
 0x300   : > { %v2322_v3 = vsub.f32 0.0, %v2290_v52  ;;  %v1933_v58 = vpop.f32.mrf.mxu2  ;;  %v2066_v43 = vpop.f32.mrf.mxu3 }
 0x301   : > { %v2062_v40 = vadd.f32 %v2061_v18, %v1933_v58  ;;  %v4786_v58 = vld [vmem:[%s5069_s17 + $0x8] sm:$0xff] }
 0x302   : > { %v4575_v12 = vpop.eup %4574  ;;  %v2367_v59 = vmul.f32 1.442695, %v2322_v3 }
 0x303   : > { %v4577_v22 = vpop.eup %4576  ;;  %v2197_v48 = vpop.f32.mrf.mxu1  ;;  %v2417_v13 = vadd.f32 1.0, %v4575_v12 }
 0x304   : > { %v2480_v54 = vmul.f32 %v4577_v22, %v2288_v32  ;;  %4578 = vpow2.f32 %v2367_v59  ;;  %v2256_v34 = vadd.f32 %v2197_v48, %v2060_v14 }
 0x305   : > { %4029 = vmatmul.msk.bf16.vlgmr.msrb.gmra.mxu2 %vm610_vm0, %v4785_v4  ;;  %4580 = vrcp.f32 %v2417_v13 }
 0x306   : > { %v2512_v42 = vadd.f32 %v2480_v54, %v5179_v8  ;;  %v2291_v6 = vadd.f32 %v5697_v61, %v2256_v34  ;;  %2236 = vmatmul.bf16.gmra.mxu1 %v6304_v46 }
 0x308   : > { %v2323_v36 = vsub.f32 0.0, %v2291_v6  ;;  %v1936_v32 = vpop.f32.mrf.mxu2  ;;  %v2069_v33 = vpop.f32.mrf.mxu3  ;;  %v2538_v21 = vpack.c.bf16 %v2512_v42, %v2511_v11 }
 0x309   : > { %v2065_v1 = vadd.f32 %v2064_v62, %v1936_v32 }
 0x30a   : > { %v4579_v60 = vpop.eup %4578  ;;  %v2369_v63 = vmul.f32 1.442695, %v2323_v36  ;;  %4002 = vmatmul.msk.bf16.gmra.mxu0 %vm976_vm1, %v2538_v21 }
 0x30b   : > { %v2418_v7 = vadd.f32 1.0, %v4579_v60  ;;  %v2199_v8 = vpop.f32.mrf.mxu1  ;;  %v4581_v37 = vpop.eup %4580 }
 0x30c   : > { %4582 = vpow2.f32 %v2369_v63  ;;  %v2257_v26 = vadd.f32 %v2199_v8, %v2062_v40  ;;  %v2481_v16 = vmul.f32 %v4581_v37, %v2289_v41  ;;  %v4787_v8 = vld [vmem:[%s5069_s17 + $0x10] sm:$0xff] }
 0x30d   : > { %4584 = vrcp.f32 %v2418_v7 }
 0x30e   : > { %v2292_v53 = vadd.f32 %v5697_v61, %v2257_v26  ;;  %v2513_v12 = vadd.f32 %v2481_v16, %v5188_v28 }
 0x310   : > { %v2324_v17 = vsub.f32 0.0, %v2292_v53  ;;  %v1938_v56 = vpop.f32.mrf.mxu2  ;;  %v2071_v47 = vpop.f32.mrf.mxu3 }
 0x311   : > { %v2067_v48 = vadd.f32 %v2066_v43, %v1938_v56 }
 0x312   : > { %v4583_v57 = vpop.eup %4582  ;;  %v2371_v23 = vmul.f32 1.442695, %v2324_v17 }
 0x313   : > { %v4585_v18 = vpop.eup %4584  ;;  %v2202_v25 = vpop.f32.mrf.mxu1  ;;  %v2419_v3 = vadd.f32 1.0, %v4583_v57 }
 0x314   : > { %v2482_v51 = vmul.f32 %v4585_v18, %v2290_v52  ;;  %4586 = vpow2.f32 %v2371_v23  ;;  %v2258_v24 = vadd.f32 %v2202_v25, %v2065_v1 }
 0x315   : > { %4030 = vmatmul.msk.bf16.gmra.mxu2 %vm610_vm0, %v4786_v58  ;;  %4588 = vrcp.f32 %v2419_v3 }
 0x316   : > { %v2514_v31 = vadd.f32 %v2482_v51, %v5190_v29  ;;  %v2293_v14 = vadd.f32 %v5697_v61, %v2258_v24 }
 0x318   : > { %v2325_v59 = vsub.f32 0.0, %v2293_v14  ;;  %v1941_v22 = vpop.f32.mrf.mxu2  ;;  %v2539_v41 = vpack.c.bf16 %v2514_v31, %v2513_v12  ;;  %v2074_v34 = vpop.f32.mrf.mxu3 }
 0x319   : > { %v2070_v36 = vadd.f32 %v2069_v33, %v1941_v22 }
 0x31a   : > { %v4587_v62 = vpop.eup %4586  ;;  %v2373_v54 = vmul.f32 1.442695, %v2325_v59  ;;  %4003 = vmatmul.msk.bf16.gmra.mxu0 %vm976_vm1, %v2539_v41 }
 0x31b   : > { %v2420_v52 = vadd.f32 1.0, %v4587_v62  ;;  %v2204_v13 = vpop.f32.mrf.mxu1  ;;  %v4589_v29 = vpop.eup %4588 }
 0x31c   : > { %4590 = vpow2.f32 %v2373_v54  ;;  %v2259_v4 = vadd.f32 %v2204_v13, %v2067_v48  ;;  %v2483_v19 = vmul.f32 %v4589_v29, %v2291_v6  ;;  %v4788_v48 = vld [vmem:[%s5069_s17 + $0x18] sm:$0xff] }
 0x31d   : > { %4592 = vrcp.f32 %v2420_v52 }
 0x31e   : > { %v2294_v28 = vadd.f32 %v5697_v61, %v2259_v4  ;;  %v2515_v26 = vadd.f32 %v2483_v19, %v5197_v49 }
 0x320   : > { %v2326_v11 = vsub.f32 0.0, %v2294_v28  ;;  %v1943_v42 = vpop.f32.mrf.mxu2  ;;  %v2076_v7 = vpop.f32.mrf.mxu3 }
 0x321   : > { %v2072_v16 = vadd.f32 %v2071_v47, %v1943_v42 }
 0x322   : > { %v4591_v46 = vpop.eup %4590  ;;  %v2375_v32 = vmul.f32 1.442695, %v2326_v11 }
 0x323   : > { %v4593_v43 = vpop.eup %4592  ;;  %v2207_v21 = vpop.f32.mrf.mxu1  ;;  %v2421_v63 = vadd.f32 1.0, %v4591_v46 }
 0x324   : > { %v2484_v60 = vmul.f32 %v4593_v43, %v2292_v53  ;;  %4594 = vpow2.f32 %v2375_v32  ;;  %v2260_v40 = vadd.f32 %v2207_v21, %v2070_v36 }
 0x325   : > { %4031 = vmatmul.msk.bf16.gmra.mxu2 %vm610_vm0, %v4787_v8  ;;  %4596 = vrcp.f32 %v2421_v63 }
 0x326   : > { %v2516_v37 = vadd.f32 %v2484_v60, %v5199_v50  ;;  %v2295_v17 = vadd.f32 %v5697_v61, %v2260_v40 }
 0x328   : > { %v2327_v56 = vsub.f32 0.0, %v2295_v17  ;;  %v1946_v6 = vpop.f32.mrf.mxu2  ;;  %v2540_v33 = vpack.c.bf16 %v2516_v37, %v2515_v26  ;;  %v2079_v25 = vpop.f32.mrf.mxu3 }
 0x329   : > { %v2075_v12 = vadd.f32 %v2074_v34, %v1946_v6 }
 0x32a   : > { %v4595_v57 = vpop.eup %4594  ;;  %v2377_v53 = vmul.f32 1.442695, %v2327_v56  ;;  %4004 = vmatmul.msk.bf16.gmra.mxu0 %vm976_vm1, %v2540_v33  ;;  %v4789_v33 = vld [vmem:[%s5069_s17 + $0x20] sm:$0xff] }
 0x32b   : > { %v2422_v1 = vadd.f32 1.0, %v4595_v57  ;;  %v2209_v23 = vpop.f32.mrf.mxu1  ;;  %v4597_v50 = vpop.eup %4596 }
 0x32c   : > { %4598 = vpow2.f32 %v2377_v53  ;;  %v2261_v18 = vadd.f32 %v2209_v23, %v2072_v16  ;;  %v2485_v58 = vmul.f32 %v4597_v50, %v2293_v14 }
 0x32d   : > { %4600 = vrcp.f32 %v2422_v1 }
 0x32e   : > { %v2296_v49 = vadd.f32 %v5697_v61, %v2261_v18  ;;  %v2517_v54 = vadd.f32 %v2485_v58, %v5211_v9 }
 0x330   : > { %v2328_v51 = vsub.f32 0.0, %v2296_v49  ;;  %v1948_v24 = vpop.f32.mrf.mxu2  ;;  %v2081_v34 = vpop.f32.mrf.mxu3 }
 0x331   : > { %v2077_v42 = vadd.f32 %v2076_v7, %v1948_v24 }
 0x332   : > { %v4599_v3 = vpop.eup %4598  ;;  %v2379_v31 = vmul.f32 1.442695, %v2328_v51 }
 0x333   : > { %v4601_v47 = vpop.eup %4600  ;;  %v2212_v59 = vpop.f32.mrf.mxu1  ;;  %v2423_v62 = vadd.f32 1.0, %v4599_v3 }
 0x334   : > { %v2486_v22 = vmul.f32 %v4601_v47, %v2294_v28  ;;  %4602 = vpow2.f32 %v2379_v31  ;;  %v2262_v41 = vadd.f32 %v2212_v59, %v2075_v12 }
 0x335   : > { %4032 = vmatmul.msk.bf16.gmra.mxu2 %vm610_vm0, %v4788_v48  ;;  %4604 = vrcp.f32 %v2423_v62 }
 0x336   : > { %v2518_v52 = vadd.f32 %v2486_v22, %v5213_v10  ;;  %v2297_v13 = vadd.f32 %v5697_v61, %v2262_v41 }
 0x338   : > { %v2329_v4 = vsub.f32 0.0, %v2297_v13  ;;  %v1951_v29 = vpop.f32.mrf.mxu2  ;;  %v2541_v14 = vpack.c.bf16 %v2518_v52, %v2517_v54  ;;  %v2084_v7 = vpop.f32.mrf.mxu3 }
 0x339   : > { %v2080_v40 = vadd.f32 %v2079_v25, %v1951_v29  ;;  %v4790_v29 = vld [vmem:[%s5069_s17 + $0x28] sm:$0xff] }
 0x33a   : > { %v4603_v11 = vpop.eup %4602  ;;  %v2381_v28 = vmul.f32 1.442695, %v2329_v4  ;;  %4005 = vmatmul.msk.bf16.gmra.mxu0 %vm976_vm1, %v2541_v14 }
 0x33b   : > { %v2424_v46 = vadd.f32 1.0, %v4603_v11  ;;  %v2214_v19 = vpop.f32.mrf.mxu1  ;;  %v4605_v10 = vpop.eup %4604 }
 0x33c   : > { %4606 = vpow2.f32 %v2381_v28  ;;  %v2263_v36 = vadd.f32 %v2214_v19, %v2077_v42  ;;  %v2487_v60 = vmul.f32 %v4605_v10, %v2295_v17  ;;  %v4131_v17 = vld [vmem:[%s6274_s11 + $0x10] sm:$0xff] }
 0x33d   : > { %4608 = vrcp.f32 %v2424_v46  ;;  %3288 = vmatpush.bf16.msrb.mxu3 %v4131_v17  ;;  %v4791_v17 = vld [vmem:[%s5069_s17 + $0x30] sm:$0xff] }
 0x33e   : > { %v2298_v9 = vadd.f32 %v5697_v61, %v2263_v36  ;;  %v2519_v57 = vadd.f32 %v2487_v60, %v5225_v44 }
 0x340   : > { %v2330_v32 = vsub.f32 0.0, %v2298_v9  ;;  %v1953_v43 = vpop.f32.mrf.mxu2  ;;  %v2086_v24 = vpop.f32.mrf.mxu3 }
 0x341   : > { %v2082_v50 = vadd.f32 %v2081_v34, %v1953_v43 }
 0x342   : > { %v4607_v21 = vpop.eup %4606  ;;  %v2383_v63 = vmul.f32 1.442695, %v2330_v32 }
 0x343   : > { %v4609_v8 = vpop.eup %4608  ;;  %v2217_v26 = vpop.f32.mrf.mxu1  ;;  %v2425_v6 = vadd.f32 1.0, %v4607_v21 }
 0x344   : > { %v2488_v37 = vmul.f32 %v4609_v8, %v2296_v49  ;;  %4610 = vpow2.f32 %v2383_v63  ;;  %v2264_v56 = vadd.f32 %v2217_v26, %v2080_v40 }
 0x345   : > { %4033 = vmatmul.msk.bf16.gmra.mxu2 %vm610_vm0, %v4789_v33  ;;  %4612 = vrcp.f32 %v2425_v6  ;;  %v5871_v6 = vpop.f32.mrf.mxu0 }
 0x346   : > { %v2520_v16 = vadd.f32 %v2488_v37, %v5227_v45  ;;  %v2299_v53 = vadd.f32 %v5697_v61, %v2264_v56 }
 0x348   : > { %v2331_v1 = vsub.f32 0.0, %v2299_v53  ;;  %v1956_v23 = vpop.f32.mrf.mxu2  ;;  %v2542_v18 = vpack.c.bf16 %v2520_v16, %v2519_v57  ;;  %v2089_v42 = vpop.f32.mrf.mxu3 }
 0x349   : > { %v2085_v22 = vadd.f32 %v2084_v7, %v1956_v23 }
 0x34a   : > { %v4611_v49 = vpop.eup %4610  ;;  %v2385_v25 = vmul.f32 1.442695, %v2331_v1  ;;  %4006 = vmatmul.msk.bf16.gmra.mxu0 %vm976_vm1, %v2542_v18 }
 0x34b   : > { %v2426_v51 = vadd.f32 1.0, %v4611_v49  ;;  %v2219_v44 = vpop.f32.mrf.mxu1  ;;  %v4613_v58 = vpop.eup %4612 }
 0x34c   : > { %4614 = vpow2.f32 %v2385_v25  ;;  %v2265_v45 = vadd.f32 %v2219_v44, %v2082_v50  ;;  %v2489_v59 = vmul.f32 %v4613_v58, %v2297_v13 }
 0x34d   : > { %4616 = vrcp.f32 %v2426_v51 }
 0x34e   : > { %v2300_v3 = vadd.f32 %v5697_v61, %v2265_v45  ;;  %v2521_v14 = vadd.f32 %v2489_v59, %v5251_v35 }
 0x350   : > { %v2332_v12 = vsub.f32 0.0, %v2300_v3  ;;  %v1958_v31 = vpop.f32.mrf.mxu2  ;;  %v2091_v40 = vpop.f32.mrf.mxu3 }
 0x351   : > { %v2087_v36 = vadd.f32 %v2086_v24, %v1958_v31 }
 0x352   : > { %v4615_v47 = vpop.eup %4614  ;;  %v2387_v41 = vmul.f32 1.442695, %v2332_v12 }
 0x353   : > { %v4617_v62 = vpop.eup %4616  ;;  %v2222_v48 = vpop.f32.mrf.mxu1  ;;  %v2427_v4 = vadd.f32 1.0, %v4615_v47 }
 0x354   : > { %v2490_v54 = vmul.f32 %v4617_v62, %v2298_v9  ;;  %4618 = vpow2.f32 %v2387_v41  ;;  %v2266_v52 = vadd.f32 %v2222_v48, %v2085_v22 }
 0x355   : > { %4034 = vmatmul.msk.bf16.gmra.mxu2 %vm610_vm0, %v4790_v29  ;;  %4620 = vrcp.f32 %v2427_v4 }
 0x356   : > { %v2522_v34 = vadd.f32 %v2490_v54, %v5248_v27  ;;  %v2301_v11 = vadd.f32 %v5697_v61, %v2266_v52 }
 0x358   : > { %v2333_v28 = vsub.f32 0.0, %v2301_v11  ;;  %v1961_v13 = vpop.f32.mrf.mxu2  ;;  %v2543_v46 = vpack.c.bf16 %v2522_v34, %v2521_v14  ;;  %v2094_v45 = vpop.f32.mrf.mxu3  ;;  %v4792_v34 = vld [vmem:[%s5069_s17 + $0x38] sm:$0xff] }
 0x359   : > { %v2090_v7 = vadd.f32 %v2089_v42, %v1961_v13 }
 0x35a   : > { %v4619_v19 = vpop.eup %4618  ;;  %v2389_v9 = vmul.f32 1.442695, %v2333_v28  ;;  %4007 = vmatmul.msk.bf16.gmra.mxu0 %vm976_vm1, %v2543_v46 }
 0x35b   : > { %v2428_v10 = vadd.f32 1.0, %v4619_v19  ;;  %v2224_v32 = vpop.f32.mrf.mxu1  ;;  %v4621_v27 = vpop.eup %4620 }
 0x35c   : > { %4622 = vpow2.f32 %v2389_v9  ;;  %v2267_v43 = vadd.f32 %v2224_v32, %v2087_v36  ;;  %v2491_v8 = vmul.f32 %v4621_v27, %v2299_v53 }
 0x35d   : > { %4624 = vrcp.f32 %v2428_v10 }
 0x35e   : > { %v2302_v35 = vadd.f32 %v5697_v61, %v2267_v43  ;;  %v2523_v1 = vadd.f32 %v2491_v8, %v5284_v55  ;;  %v5879_v55 = vpop.f32.mrf.mxu0 }
 0x360   : > { %v2334_v21 = vsub.f32 0.0, %v2302_v35  ;;  %v1963_v60 = vpop.f32.mrf.mxu2  ;;  %v2096_v29 = vpop.f32.mrf.mxu3 }
 0x361   : > { %v2092_v51 = vadd.f32 %v2091_v40, %v1963_v60 }
 0x362   : > { %v4623_v63 = vpop.eup %4622  ;;  %v2391_v26 = vmul.f32 1.442695, %v2334_v21 }
 0x363   : > { %v4625_v37 = vpop.eup %4624  ;;  %v2227_v56 = vpop.f32.mrf.mxu1  ;;  %v2429_v16 = vadd.f32 1.0, %v4623_v63 }
 0x364   : > { %v2492_v33 = vmul.f32 %v4625_v37, %v2300_v3  ;;  %4626 = vpow2.f32 %v2391_v26  ;;  %v2268_v57 = vadd.f32 %v2227_v56, %v2090_v7 }
 0x365   : > { %4035 = vmatmul.msk.bf16.gmra.mxu2 %vm610_vm0, %v4791_v17  ;;  %4628 = vrcp.f32 %v2429_v16 }
 0x366   : > { %v2524_v23 = vadd.f32 %v2492_v33, %v5281_v30  ;;  %v2303_v18 = vadd.f32 %v5697_v61, %v2268_v57 }
 0x368   : > { %v2335_v53 = vsub.f32 0.0, %v2303_v18  ;;  %v1966_v49 = vpop.f32.mrf.mxu2  ;;  %v2544_v50 = vpack.c.bf16 %v2524_v23, %v2523_v1  ;;  %v2099_v21 = vpop.f32.mrf.mxu3  ;;  %v4794_v1 = vld [vmem:[%s5069_s17 + $0x40] sm:$0xff] }
 0x369   : > { %v2095_v41 = vadd.f32 %v2094_v45, %v1966_v49  ;;  %v5908_v45 = vld [vmem:[%s6273_s10] ss:$0 sm:$0xff] }
 0x36a   : > { %v4627_v25 = vpop.eup %4626  ;;  %v2393_v44 = vmul.f32 1.442695, %v2335_v53  ;;  %4008 = vmatmul.msk.bf16.gmra.mxu0 %vm976_vm1, %v2544_v50 }
 0x36b   : > { %v2430_v24 = vadd.f32 1.0, %v4627_v25  ;;  %v2229_v3 = vpop.f32.mrf.mxu1  ;;  %v4629_v12 = vpop.eup %4628 }
 0x36c   : > { %4630 = vpow2.f32 %v2393_v44  ;;  %v2269_v58 = vadd.f32 %v2229_v3, %v2092_v51  ;;  %v2493_v22 = vmul.f32 %v4629_v12, %v2301_v11  ;;  %v5889_v11 = vpop.f32.mrf.mxu0 }
 0x36d   : > { %4632 = vrcp.f32 %v2430_v24 }
 0x36e   : > { %v2304_v30 = vadd.f32 %v5697_v61, %v2269_v58  ;;  %v2525_v42 = vadd.f32 %v2493_v22, %v5314_v15 }
 0x370   : > { %v2336_v31 = vsub.f32 0.0, %v2304_v30  ;;  %v1968_v47 = vpop.f32.mrf.mxu2  ;;  %v2101_v44 = vpop.f32.mrf.mxu3 }
 0x371   : > { %v2097_v10 = vadd.f32 %v2096_v29, %v1968_v47 }
 0x372   : > { %v4631_v59 = vpop.eup %4630  ;;  %v2395_v62 = vmul.f32 1.442695, %v2336_v31 }
 0x373   : > { %v4633_v48 = vpop.eup %4632  ;;  %v2232_v54 = vpop.f32.mrf.mxu1  ;;  %v2431_v14 = vadd.f32 1.0, %v4631_v59 }
 0x374   : > { %v2494_v52 = vmul.f32 %v4633_v48, %v2302_v35  ;;  %4634 = vpow2.f32 %v2395_v62  ;;  %v2270_v4 = vadd.f32 %v2232_v54, %v2095_v41  ;;  %v5896_v8 = vpop.f32.mrf.mxu0 }
 0x375   : > { %4036 = vmatmul.msk.bf16.gmra.mxu2 %vm610_vm0, %v4792_v34  ;;  %4636 = vrcp.f32 %v2431_v14 }
 0x376   : > { %v2526_v28 = vadd.f32 %v2494_v52, %v5317_v0  ;;  %v5887_v13 = vadd.f32 %v5697_v61, %v2270_v4  ;;  %v4793_v0 = vld [vmem:[%s6269_s6] ss:$0 sm:$0xff] }
 0x378   : > { %v2337_v46 = vsub.f32 0.0, %v5887_v13  ;;  %v1971_v19 = vpop.f32.mrf.mxu2  ;;  %v2545_v36 = vpack.c.bf16 %v2526_v28, %v2525_v42  ;;  %v4795_v28 = vld [vmem:[%s5069_s17 + $0x48] sm:$0xff] }
 0x379   : > { %v2100_v26 = vadd.f32 %v2099_v21, %v1971_v19 }
 0x37a   : > { %v4635_v9 = vpop.eup %4634  ;;  %v2397_v32 = vmul.f32 1.442695, %v2337_v46  ;;  %4009 = vmatmul.msk.bf16.gmra.mxu0 %vm976_vm1, %v2545_v36 }
 0x37b   : > { %v2432_v43 = vadd.f32 1.0, %v4635_v9  ;;  %v2234_v35 = vpop.f32.mrf.mxu1  ;;  %v4637_v27 = vpop.eup %4636 }
 0x37c   : > { %4638 = vpow2.f32 %v2397_v32  ;;  %v2271_v15 = vadd.f32 %v2234_v35, %v2097_v10  ;;  %v2495_v7 = vmul.f32 %v4637_v27, %v2303_v18  ;;  %v4130_v18 = vld [vmem:[%s6274_s11 + $0x8] sm:$0xff] }
 0x37d   : > { %4640 = vrcp.f32 %v2432_v43  ;;  %3289 = vmatpush.bf16.msrb.mxu3 %v4130_v18 }
 0x37e   : > { %v2306_v61 = vadd.f32 %v4793_v0, %v2271_v15  ;;  %v2527_v23 = vadd.f32 %v2495_v7, %v5347_v38 }
 0x380   : > { %v2338_v60 = vsub.f32 0.0, %v2306_v61  ;;  %v1973_v40 = vpop.f32.mrf.mxu2 }
 0x381   : > { %v2102_v38 = vadd.f32 %v2101_v44, %v1973_v40  ;;  %v4797_v44 = vld [vmem:[%s5069_s17 + $0x58] sm:$0xff] }
 0x382   : > { %v4639_v63 = vpop.eup %4638  ;;  %v2399_v37 = vmul.f32 1.442695, %v2338_v60 }
 0x383   : > { %v4641_v56 = vpop.eup %4640  ;;  %v2237_v33 = vpop.f32.mrf.mxu1  ;;  %v2433_v17 = vadd.f32 1.0, %v4639_v63 }
 0x384   : > { %v2496_v57 = vmul.f32 %v4641_v56, %v2304_v30  ;;  %4642 = vpow2.f32 %v2399_v37  ;;  %v2272_v16 = vadd.f32 %v2237_v33, %v2100_v26  ;;  %v5911_v30 = vpop.f32.mrf.mxu0  ;;  %v4796_v26 = vld [vmem:[%s5069_s17 + $0x50] sm:$0xff] }
 0x385   : > { %4037 = vmatmul.msk.bf16.gmra.mxu2 %vm610_vm0, %v4794_v1  ;;  %4644 = vrcp.f32 %v2433_v17 }
 0x386   : > { %v2528_v53 = vadd.f32 %v2496_v57, %v5350_v39  ;;  %v2307_v49 = vadd.f32 %v4793_v0, %v2272_v16  ;;  %v6305_v57 = vld [vmem:[#allocation14_spill] sm:$0xff] }
 0x388   : > { %v2339_v50 = vsub.f32 0.0, %v2307_v49  ;;  %v2751_v25 = vpop.f32.mrf.mxu2  ;;  %v2546_v51 = vpack.c.bf16 %v2528_v53, %v2527_v23 }
 0x389   : > { %v2752_v31 = vadd.f32 %v5908_v45, %v2751_v25 }
 0x38a   : > { %v4643_v24 = vpop.eup %4642  ;;  %v2401_v3 = vmul.f32 1.442695, %v2339_v50  ;;  %4010 = vmatmul.msk.bf16.gmra.mxu0 %vm976_vm1, %v2546_v51  ;;  %v4129_v51 = vld [vmem:[%s6274_s11] sm:$0xff] }
 0x38b   : > { %v2434_v39 = vadd.f32 1.0, %v4643_v24  ;;  %v2239_v58 = vpop.f32.mrf.mxu1  ;;  %v4645_v59 = vpop.eup %4644  ;;  %v2959_v62 = vmul.f32 0.1, %v2752_v31  ;;  %vm2927_vm9 = vcmp.ge.f32.partialorder %v2752_v31, 0.0  ;;  %3290 = vmatpush.bf16.msrb.mxu3 %v4129_v51 }
 0x38c   : > { %4646 = vpow2.f32 %v2401_v3  ;;  %v2273_v12 = vadd.f32 %v2239_v58, %v2102_v38  ;;  %v2497_v52 = vmul.f32 %v4645_v59, %v5887_v13  ;;  %v5918_v36 = vpop.f32.mrf.mxu0 }
 0x38d   : > { %4648 = vrcp.f32 %v2434_v39  ;;  %v2991_v46 = vsel %vm2927_vm9, %v2752_v31, %v2959_v62 }
 0x38e   : > { %v2308_v47 = vadd.f32 %v4793_v0, %v2273_v12  ;;  %v2529_v9 = vadd.f32 %v2497_v52, %v5383_v20 }
 0x390   : > { %v2340_v22 = vsub.f32 0.0, %v2308_v47  ;;  %v2753_v41 = vpop.f32.mrf.mxu2 }
 0x391   : > { %v2754_v48 = vadd.f32 %v5908_v45, %v2753_v41 }
 0x392   : > { %v4647_v54 = vpop.eup %4646  ;;  %v2403_v4 = vmul.f32 1.442695, %v2340_v22  ;;  %v4798_v22 = vld [vmem:[%s5069_s17 + $0x60] sm:$0xff] }
 0x393   : > { %v4649_v29 = vpop.eup %4648  ;;  %vm2928_vm10 = vcmp.ge.f32.partialorder %v2754_v48, 0.0  ;;  %v2960_v14 = vmul.f32 0.1, %v2754_v48  ;;  %v2435_v42 = vadd.f32 1.0, %v4647_v54 }
 0x394   : > { %v2498_v34 = vmul.f32 %v4649_v29, %v2306_v61  ;;  %4650 = vpow2.f32 %v2403_v4  ;;  %v5925_v27 = vpop.f32.mrf.mxu0 }
 0x395   : > { %4038 = vmatmul.msk.bf16.gmra.mxu2 %vm610_vm0, %v4795_v28  ;;  %v2992_v19 = vsel %vm2928_vm10, %v2754_v48, %v2960_v14  ;;  %4652 = vrcp.f32 %v2435_v42  ;;  %v4799_v42 = vld [vmem:[%s5069_s17 + $0x68] sm:$0xff] }
 0x396   : > { %v2530_v10 = vadd.f32 %v2498_v34, %v5386_v5  ;;  %v4186_v13 = vpack.i.bf16 %v2992_v19, %v2991_v46 }
 0x398   : > { %v2756_v32 = vpop.f32.mrf.mxu2  ;;  %4187 = vrot.lane.b32.xlu2 %v4186_v13, %s4903_s23  ;;  %v2547_v43 = vpack.c.bf16 %v2530_v10, %v2529_v9 }
 0x399   : > { %v2757_v0 = vadd.f32 %v5908_v45, %v2756_v32 }
 0x39a   : > { %v4651_v35 = vpop.eup %4650  ;;  %4011 = vmatmul.msk.bf16.gmra.mxu0 %vm976_vm1, %v2547_v43 }
 0x39b   : > { %v2436_v15 = vadd.f32 1.0, %v4651_v35  ;;  %v4653_v61 = vpop.eup %4652  ;;  %v2961_v21 = vmul.f32 0.1, %v2757_v0  ;;  %vm2929_vm11 = vcmp.ge.f32.partialorder %v2757_v0, 0.0 }
 0x39c   : > { %v2499_v60 = vmul.f32 %v4653_v61, %v2307_v49  ;;  %v5933_v53 = vpop.f32.mrf.mxu0 }
 0x39d   : > { %4654 = vrcp.f32 %v2436_v15  ;;  %v2993_v37 = vsel %vm2929_vm11, %v2757_v0, %v2961_v21  ;;  %v4800_v15 = vld [vmem:[%s5069_s17 + $0x70] sm:$0xff]  ;;  %v5961_v21 = vld [vmem:[%s6271_s8] ss:$0 sm:$0xff] }
 0x39e   : > { %v2531_v33 = vadd.f32 %v2499_v60, %v5423_v2  ;;  %v2627_v60 = vadd.f32 %v5961_v21, %v5871_v6 }
 0x3a0   : > { %v2758_v20 = vpop.f32.mrf.mxu2  ;;  %vm2831_vm7 = vcmp.ge.f32.partialorder %v2627_v60, 0.0 }
 0x3a1   : > { %v2759_v5 = vadd.f32 %v5908_v45, %v2758_v20 }
 0x3a3   : > { %v4655_v40 = vpop.eup %4654  ;;  %vm2930_vm12 = vcmp.ge.f32.partialorder %v2759_v5, 0.0  ;;  %v2962_v63 = vmul.f32 0.1, %v2759_v5 }
 0x3a4   : > { %v2500_v7 = vmul.f32 %v4655_v40, %v2308_v47  ;;  %v2629_v40 = vadd.f32 %v5961_v21, %v5879_v55 }
 0x3a5   : > { %4039 = vmatmul.msk.bf16.gmra.mxu2 %vm610_vm0, %v4796_v26  ;;  %v2994_v56 = vsel %vm2930_vm12, %v2759_v5, %v2962_v63 }
 0x3a6   : > { %v2532_v16 = vadd.f32 %v2500_v7, %v6305_v57  ;;  %v4191_v17 = vpack.i.bf16 %v2994_v56, %v2993_v37  ;;  %v2863_v7 = vmul.f32 0.1, %v2627_v60  ;;  %v2864_v26 = vmul.f32 0.1, %v2629_v40 }
 0x3a7   : > { %vm2832_vm8 = vcmp.ge.f32.partialorder %v2629_v40, 0.0 }
 0x3a8   : > { %v2761_v1 = vpop.f32.mrf.mxu2  ;;  %4192 = vrot.lane.b32.xlu0 %v4191_v17, %s4903_s23  ;;  %v2548_v23 = vpack.c.bf16 %v2532_v16, %v2531_v33 }
 0x3a9   : > { %v2762_v49 = vadd.f32 %v5908_v45, %v2761_v1  ;;  %v2895_v1 = vsel %vm2831_vm7, %v2627_v60, %v2863_v7 }
 0x3aa   : > { %4012 = vmatmul.msk.bf16.gmra.mxu0 %vm976_vm1, %v2548_v23  ;;  %v2896_v23 = vsel %vm2832_vm8, %v2629_v40, %v2864_v26 }
 0x3ab   : > { %v2963_v50 = vmul.f32 0.1, %v2762_v49  ;;  %vm2931_vm13 = vcmp.ge.f32.partialorder %v2762_v49, 0.0 }
 0x3ad   : > { %v2995_v24 = vsel %vm2931_vm13, %v2762_v49, %v2963_v50 }
 0x3b0   : > { %v2763_v18 = vpop.f32.mrf.mxu2 }
 0x3b1   : > { %v2764_v25 = vadd.f32 %v5908_v45, %v2763_v18  ;;  %v4801_v18 = vld [vmem:[%s5069_s17 + $0x78] sm:$0xff]  ;;  %s3630_s17 = scalar_lea.sflag [#allocation4], %s5063_s30 }
 0x3b3   : > { %vm2932_vm14 = vcmp.ge.f32.partialorder %v2764_v25, 0.0  ;;  %v2964_v2 = vmul.f32 0.1, %v2764_v25 }
 0x3b5   : > { %4040 = vmatmul.msk.bf16.gmra.mxu2 %vm610_vm0, %v4797_v44  ;;  %v2996_v38 = vsel %vm2932_vm14, %v2764_v25, %v2964_v2 }
 0x3b6   : > { %v4196_v3 = vpack.i.bf16 %v2996_v38, %v2995_v24 }
 0x3b8   : > { %v2766_v39 = vpop.f32.mrf.mxu2  ;;  %4197 = vrot.lane.b32.xlu1 %v4196_v3, %s4903_s23 }
 0x3b9   : > { %v2767_v58 = vadd.f32 %v5908_v45, %v2766_v39 }
 0x3bb   : > { %v2965_v31 = vmul.f32 0.1, %v2767_v58  ;;  %vm2933_vm15 = vcmp.ge.f32.partialorder %v2767_v58, 0.0 }
 0x3bd   : > { %v2997_v41 = vsel %vm2933_vm15, %v2767_v58, %v2965_v31 }
 0x3c0   : > { %v2768_v12 = vpop.f32.mrf.mxu2 }
 0x3c1   : > { %v2769_v47 = vadd.f32 %v5908_v45, %v2768_v12 }
 0x3c3   : > { %vm2934_vm2 = vcmp.ge.f32.partialorder %v2769_v47, 0.0  ;;  %v2966_v59 = vmul.f32 0.1, %v2769_v47 }
 0x3c5   : > { %4041 = vmatmul.msk.bf16.gmra.mxu2 %vm610_vm0, %v4798_v22  ;;  %v2998_v62 = vsel %vm2934_vm2, %v2769_v47, %v2966_v59  ;;  %v5979_v22 = vpop.f32.mrf.mxu0 }
 0x3c6   : > { %v4201_v48 = vpack.i.bf16 %v2998_v62, %v2997_v41 }
 0x3c8   : > { %v2771_v54 = vpop.f32.mrf.mxu2  ;;  %4202 = vrot.lane.b32.xlu2 %v4201_v48, %s4903_s23 }
 0x3c9   : > { %v2772_v52 = vadd.f32 %v5908_v45, %v2771_v54 }
 0x3cb   : > { %v2967_v29 = vmul.f32 0.1, %v2772_v52  ;;  %vm2935_vm3 = vcmp.ge.f32.partialorder %v2772_v52, 0.0 }
 0x3cd   : > { %v2999_v28 = vsel %vm2935_vm3, %v2772_v52, %v2967_v29  ;;  %v5983_v52 = vpop.f32.mrf.mxu0  ;;  %v2632_v29 = vadd.f32 %v5961_v21, %v5889_v11  ;;  %v2642_v11 = vadd.f32 %v5961_v21, %v5925_v27 }
 0x3cf   : > { %vm2833_vm15 = vcmp.ge.f32.partialorder %v2632_v29, 0.0  ;;  %v2869_v60 = vmul.f32 0.1, %v2642_v11  ;;  %vm2837_vm3 = vcmp.ge.f32.partialorder %v2642_v11, 0.0 }
 0x3d0   : > { %v2773_v4 = vpop.f32.mrf.mxu2 }
 0x3d1   : > { %v2774_v14 = vadd.f32 %v5908_v45, %v2773_v4 }
 0x3d3   : > { %vm2936_vm4 = vcmp.ge.f32.partialorder %v2774_v14, 0.0  ;;  %v2968_v34 = vmul.f32 0.1, %v2774_v14 }
 0x3d5   : > { %4042 = vmatmul.msk.bf16.gmra.mxu2 %vm610_vm0, %v4799_v42  ;;  %v3000_v46 = vsel %vm2936_vm4, %v2774_v14, %v2968_v34  ;;  %v2634_v14 = vadd.f32 %v5961_v21, %v5896_v8  ;;  %v2644_v8 = vadd.f32 %v5961_v21, %v5933_v53 }
 0x3d6   : > { %v4206_v19 = vpack.i.bf16 %v3000_v46, %v2999_v28  ;;  %v2865_v46 = vmul.f32 0.1, %v2632_v29 }
 0x3d7   : > { %vm2834_vm2 = vcmp.ge.f32.partialorder %v2634_v14, 0.0  ;;  %v2870_v40 = vmul.f32 0.1, %v2644_v8  ;;  %vm2838_vm4 = vcmp.ge.f32.partialorder %v2644_v8, 0.0 }
 0x3d8   : > { %v2776_v9 = vpop.f32.mrf.mxu2  ;;  %4207 = vrot.lane.b32.xlu0 %v4206_v19, %s4903_s23  ;;  %v2866_v19 = vmul.f32 0.1, %v2634_v14 }
 0x3d9   : > { %v2777_v10 = vadd.f32 %v5908_v45, %v2776_v9 }
 0x3db   : > { %v2969_v32 = vmul.f32 0.1, %v2777_v10  ;;  %vm2937_vm5 = vcmp.ge.f32.partialorder %v2777_v10, 0.0 }
 0x3dd   : > { %v3001_v0 = vsel %vm2937_vm5, %v2777_v10, %v2969_v32 }
 0x3e0   : > { %v2778_v13 = vpop.f32.mrf.mxu2 }
 0x3e1   : > { %v2779_v43 = vadd.f32 %v5908_v45, %v2778_v13 }
 0x3e3   : > { %vm2938_vm6 = vcmp.ge.f32.partialorder %v2779_v43, 0.0  ;;  %v2970_v35 = vmul.f32 0.1, %v2779_v43 }
 0x3e5   : > { %4043 = vmatmul.msk.bf16.gmra.mxu2 %vm610_vm0, %v4800_v15  ;;  %v3002_v61 = vsel %vm2938_vm6, %v2779_v43, %v2970_v35  ;;  %v2897_v43 = vsel %vm2833_vm15, %v2632_v29, %v2865_v46  ;;  %v2898_v35 = vsel %vm2834_vm2, %v2634_v14, %v2866_v19  ;;  %v5994_v15 = vpop.f32.mrf.mxu0 }
 0x3e6   : > { %v4211_v20 = vpack.i.bf16 %v3002_v61, %v3001_v0 }
 0x3e8   : > { %v2781_v5 = vpop.f32.mrf.mxu2  ;;  %4212 = vrot.lane.b32.xlu1 %v4211_v20, %s4903_s23 }
 0x3e9   : > { %v2782_v63 = vadd.f32 %v5908_v45, %v2781_v5 }
 0x3eb   : > { %v2971_v56 = vmul.f32 0.1, %v2782_v63  ;;  %vm2939_vm9 = vcmp.ge.f32.partialorder %v2782_v63, 0.0 }
 0x3ed   : > { %v3003_v50 = vsel %vm2939_vm9, %v2782_v63, %v2971_v56 }
 0x3f0   : > { %v2783_v37 = vpop.f32.mrf.mxu2 }
 0x3f1   : > { %v2784_v33 = vadd.f32 %v5908_v45, %v2783_v37 }
 0x3f2   : > { %v4188_v57 = vpop.permute.xlu2 %4187 }
 0x3f3   : > { %vm2940_vm10 = vcmp.ge.f32.partialorder %v2784_v33, 0.0  ;;  %v2972_v16 = vmul.f32 0.1, %v2784_v33  ;;  %v4190_v17 = vunpack.i.h.bf16 %v4188_v57  ;;  %v4189_v6 = vunpack.i.l.bf16 %v4188_v57 }
 0x3f4   : > { %v2639_v57 = vadd.f32 %v5961_v21, %v5918_v36 }
 0x3f5   : > { %v3152_v55 = vsel %vm976_vm1, %v2896_v23, %v4190_v17  ;;  %v3151_v49 = vsel %vm976_vm1, %v2895_v1, %v4189_v6  ;;  %4044 = vmatmul.msk.bf16.gmra.mxu2 %vm610_vm0, %v4801_v18  ;;  %v3004_v25 = vsel %vm2940_vm10, %v2784_v33, %v2972_v16  ;;  %v2637_v33 = vadd.f32 %v5961_v21, %v5911_v30 }
 0x3f6   : > { %v3183_v2 = vpack.c.bf16 %v3152_v55, %v3151_v49  ;;  %v4216_v51 = vpack.i.bf16 %v3004_v25, %v3003_v50  ;;  %v2901_v16 = vsel %vm2837_vm3, %v2642_v11, %v2869_v60  ;;  %v2902_v17 = vsel %vm2838_vm4, %v2644_v8, %v2870_v40  ;;  %v6007_v50 = vpop.f32.mrf.mxu0 }
 0x3f7   : > { %v2867_v25 = vmul.f32 0.1, %v2637_v33  ;;  %vm2835_vm7 = vcmp.ge.f32.partialorder %v2637_v33, 0.0  ;;  %vm2836_vm8 = vcmp.ge.f32.partialorder %v2639_v57, 0.0 }
 0x3f8   : > { %v2786_v44 = vpop.f32.mrf.mxu2  ;;  %4217 = vrot.lane.b32.xlu2 %v4216_v51, %s4903_s23  ;;  %4061 = vmatmul.msk.bf16.vlgmr.msrb.gmra.mxu3 %vm610_vm0, %v3183_v2  ;;  %v2868_v2 = vmul.f32 0.1, %v2639_v57 }
 0x3f9   : > { %v2787_v24 = vadd.f32 %v5908_v45, %v2786_v44 }
 0x3fb   : > { %v2973_v3 = vmul.f32 0.1, %v2787_v24  ;;  %vm2941_vm11 = vcmp.ge.f32.partialorder %v2787_v24, 0.0 }
 0x3fd   : > { %v3005_v12 = vsel %vm2941_vm11, %v2787_v24, %v2973_v3  ;;  %v2899_v24 = vsel %vm2835_vm7, %v2637_v33, %v2867_v25  ;;  %v2652_v33 = vadd.f32 %v5961_v21, %v5994_v15 }
 0x3ff   : > { %vm2841_vm3 = vcmp.ge.f32.partialorder %v2652_v33, 0.0 }
 0x400   : > { %v2788_v38 = vpop.f32.mrf.mxu2 }
 0x401   : > { %v2789_v39 = vadd.f32 %v5908_v45, %v2788_v38  ;;  %v2900_v38 = vsel %vm2836_vm8, %v2639_v57, %v2868_v2  ;;  %v2654_v57 = vadd.f32 %v5961_v21, %v6007_v50 }
 0x403   : > { %vm2942_vm12 = vcmp.ge.f32.partialorder %v2789_v39, 0.0  ;;  %v2974_v58 = vmul.f32 0.1, %v2789_v39  ;;  %vm2842_vm4 = vcmp.ge.f32.partialorder %v2654_v57, 0.0 }
 0x405   : > { %v3006_v31 = vsel %vm2942_vm12, %v2789_v39, %v2974_v58 }
 0x406   : > { %v4221_v47 = vpack.i.bf16 %v3006_v31, %v3005_v12 }
 0x408   : > { %v2791_v59 = vpop.f32.mrf.mxu2  ;;  %4222 = vrot.lane.b32.xlu0 %v4221_v47, %s4903_s23  ;;  %v6014_v47 = vpop.f32.mrf.mxu0 }
 0x409   : > { %v2792_v41 = vadd.f32 %v5908_v45, %v2791_v59 }
 0x40b   : > { %v2975_v48 = vmul.f32 0.1, %v2792_v41  ;;  %vm2943_vm13 = vcmp.ge.f32.partialorder %v2792_v41, 0.0 }
 0x40d   : > { %v3007_v34 = vsel %vm2943_vm13, %v2792_v41, %v2975_v48 }
 0x410   : > { %v2793_v62 = vpop.f32.mrf.mxu2  ;;  %v6018_v14 = vpop.f32.mrf.mxu0 }
 0x411   : > { %v2794_v54 = vadd.f32 %v5908_v45, %v2793_v62 }
 0x413   : > { %vm2944_vm14 = vcmp.ge.f32.partialorder %v2794_v54, 0.0  ;;  %v2976_v4 = vmul.f32 0.1, %v2794_v54 }
 0x415   : > { %v3008_v42 = vsel %vm2944_vm14, %v2794_v54, %v2976_v4 }
 0x416   : > { %v4226_v28 = vpack.i.bf16 %v3008_v42, %v3007_v34 }
 0x418   : > { %v2796_v9 = vpop.f32.mrf.mxu2  ;;  %4227 = vrot.lane.b32.xlu1 %v4226_v28, %s4903_s23 }
 0x419   : > { %v2797_v0 = vadd.f32 %v5908_v45, %v2796_v9  ;;  %v2647_v9 = vadd.f32 %v5961_v21, %v5979_v22 }
 0x41a   : > { %v4193_v10 = vpop.permute.xlu0 %4192 }
 0x41b   : > { %v4195_v13 = vunpack.i.h.bf16 %v4193_v10  ;;  %v4194_v32 = vunpack.i.l.bf16 %v4193_v10  ;;  %v2977_v27 = vmul.f32 0.1, %v2797_v0  ;;  %vm2945_vm5 = vcmp.ge.f32.partialorder %v2797_v0, 0.0 }
 0x41c   : > { %v2649_v10 = vadd.f32 %v5961_v21, %v5983_v52  ;;  %v2871_v11 = vmul.f32 0.1, %v2647_v9  ;;  %vm2839_vm13 = vcmp.ge.f32.partialorder %v2647_v9, 0.0 }
 0x41d   : > { %v3154_v61 = vsel %vm976_vm1, %v2898_v35, %v4195_v13  ;;  %v3153_v20 = vsel %vm976_vm1, %v2897_v43, %v4194_v32  ;;  %v3009_v23 = vsel %vm2945_vm5, %v2797_v0, %v2977_v27  ;;  %v6027_v13 = vpop.f32.mrf.mxu0 }
 0x41e   : > { %v3184_v5 = vpack.c.bf16 %v3154_v61, %v3153_v20  ;;  %v2872_v8 = vmul.f32 0.1, %v2649_v10  ;;  %vm2840_vm14 = vcmp.ge.f32.partialorder %v2649_v10, 0.0  ;;  %v2903_v60 = vsel %vm2839_vm13, %v2647_v9, %v2871_v11 }
 0x420   : > { %v2798_v63 = vpop.f32.mrf.mxu2  ;;  %4062 = vmatmul.msk.bf16.gmra.mxu3 %vm610_vm0, %v3184_v5  ;;  %v2904_v22 = vsel %vm2840_vm14, %v2649_v10, %v2872_v8  ;;  %v2662_v8 = vadd.f32 %v5961_v21, %v6027_v13 }
 0x421   : > { %v2799_v7 = vadd.f32 %v5908_v45, %v2798_v63 }
 0x422   : > { %v4203_v53 = vpop.permute.xlu2 %4202 }
 0x423   : > { %vm2946_vm6 = vcmp.ge.f32.partialorder %v2799_v7, 0.0  ;;  %v2978_v26 = vmul.f32 0.1, %v2799_v7  ;;  %v4205_v37 = vunpack.i.h.bf16 %v4203_v53  ;;  %v4204_v56 = vunpack.i.l.bf16 %v4203_v53 }
 0x425   : > { %v3158_v6 = vsel %vm976_vm1, %v2902_v17, %v4205_v37  ;;  %v3157_v1 = vsel %vm976_vm1, %v2901_v16, %v4204_v56  ;;  %v3010_v55 = vsel %vm2946_vm6, %v2799_v7, %v2978_v26  ;;  %v6033_v7 = vpop.f32.mrf.mxu0 }
 0x426   : > { %v3186_v49 = vpack.c.bf16 %v3158_v6, %v3157_v1  ;;  %v4231_v18 = vpack.i.bf16 %v3010_v55, %v3009_v23  ;;  %v2873_v1 = vmul.f32 0.1, %v2652_v33  ;;  %v2874_v23 = vmul.f32 0.1, %v2654_v57 }
 0x428   : > { %v2801_v51 = vpop.f32.mrf.mxu2  ;;  %4232 = vrot.lane.b32.xlu2 %v4231_v18, %s4903_s23  ;;  %v2906_v15 = vsel %vm2842_vm4, %v2654_v57, %v2874_v23 }
 0x429   : > { %v2802_v3 = vadd.f32 %v5908_v45, %v2801_v51  ;;  %v2905_v51 = vsel %vm2841_vm3, %v2652_v33, %v2873_v1  ;;  %vm3596_vm3 = vcmask 519168  }
 0x42a   : > { %v4198_v30 = vpop.permute.xlu1 %4197 }
 0x42b   : > { %v4200_v36 = vunpack.i.h.bf16 %v4198_v30  ;;  %v4199_v44 = vunpack.i.l.bf16 %v4198_v30  ;;  %v2979_v59 = vmul.f32 0.1, %v2802_v3  ;;  %vm2947_vm9 = vcmp.ge.f32.partialorder %v2802_v3, 0.0 }
 0x42d   : > { %v3156_v39 = vsel %vm976_vm1, %v2900_v38, %v4200_v36  ;;  %v3155_v58 = vsel %vm976_vm1, %v2899_v24, %v4199_v44  ;;  %v3011_v48 = vsel %vm2947_vm9, %v2802_v3, %v2979_v59 }
 0x42e   : > { %v3185_v12 = vpack.c.bf16 %v3156_v39, %v3155_v58  ;;  %v2657_v39 = vadd.f32 %v5961_v21, %v6014_v47  ;;  %v2659_v58 = vadd.f32 %v5961_v21, %v6018_v14 }
 0x430   : > { %v2803_v31 = vpop.f32.mrf.mxu2  ;;  %4063 = vmatmul.msk.bf16.gmra.mxu3 %vm610_vm0, %v3185_v12  ;;  %vm2843_vm7 = vcmp.ge.f32.partialorder %v2657_v39, 0.0  ;;  %vm2844_vm8 = vcmp.ge.f32.partialorder %v2659_v58, 0.0 }
 0x431   : > { %v2804_v41 = vadd.f32 %v5908_v45, %v2803_v31 }
 0x433   : > { %vm2948_vm10 = vcmp.ge.f32.partialorder %v2804_v41, 0.0  ;;  %v2980_v62 = vmul.f32 0.1, %v2804_v41 }
 0x435   : > { %v3012_v54 = vsel %vm2948_vm10, %v2804_v41, %v2980_v62 }
 0x436   : > { %v4236_v4 = vpack.i.bf16 %v3012_v54, %v3011_v48  ;;  %v2875_v48 = vmul.f32 0.1, %v2657_v39  ;;  %v2876_v54 = vmul.f32 0.1, %v2659_v58 }
 0x438   : > { %v2806_v29 = vpop.f32.mrf.mxu2  ;;  %4237 = vrot.lane.b32.xlu0 %v4236_v4, %s4903_s23  ;;  %v2907_v47 = vsel %vm2843_vm7, %v2657_v39, %v2875_v48  ;;  %v2908_v14 = vsel %vm2844_vm8, %v2659_v58, %v2876_v54 }
 0x439   : > { %v2807_v34 = vadd.f32 %v5908_v45, %v2806_v29 }
 0x43b   : > { %v2981_v28 = vmul.f32 0.1, %v2807_v34  ;;  %vm2949_vm11 = vcmp.ge.f32.partialorder %v2807_v34, 0.0 }
 0x43d   : > { %v3013_v32 = vsel %vm2949_vm11, %v2807_v34, %v2981_v28  ;;  %vm2845_vm11 = vcmp.ge.f32.partialorder %v2662_v8, 0.0 }
 0x440   : > { %v2808_v42 = vpop.f32.mrf.mxu2  ;;  %4064 = vmatmul.msk.bf16.gmra.mxu3 %vm610_vm0, %v3186_v49  ;;  %v6042_v49 = vpop.f32.mrf.mxu0 }
 0x441   : > { %v2809_v46 = vadd.f32 %v5908_v45, %v2808_v42 }
 0x443   : > { %vm2950_vm12 = vcmp.ge.f32.partialorder %v2809_v46, 0.0  ;;  %v2982_v19 = vmul.f32 0.1, %v2809_v46 }
 0x445   : > { %v3014_v43 = vsel %vm2950_vm12, %v2809_v46, %v2982_v19 }
 0x446   : > { %v4241_v35 = vpack.i.bf16 %v3014_v43, %v3013_v32 }
 0x448   : > { %v2811_v0 = vpop.f32.mrf.mxu2  ;;  %4242 = vrot.lane.b32.xlu1 %v4241_v35, %s4903_s23  ;;  %v6053_v12 = vpop.f32.mrf.mxu0 }
 0x449   : > { %v2812_v40 = vadd.f32 %v5908_v45, %v2811_v0  ;;  %v2664_v0 = vadd.f32 %v5961_v21, %v6033_v7 }
 0x44a   : > { %v4208_v61 = vpop.permute.xlu0 %4207 }
 0x44b   : > { %v4210_v20 = vunpack.i.h.bf16 %v4208_v61  ;;  %v4209_v5 = vunpack.i.l.bf16 %v4208_v61  ;;  %v2983_v26 = vmul.f32 0.1, %v2812_v40  ;;  %vm2951_vm15 = vcmp.ge.f32.partialorder %v2812_v40, 0.0 }
 0x44c   : > { %vm2846_vm12 = vcmp.ge.f32.partialorder %v2664_v0, 0.0 }
 0x44d   : > { %v3160_v52 = vsel %vm976_vm1, %v2904_v22, %v4210_v20  ;;  %v3159_v63 = vsel %vm976_vm1, %v2903_v60, %v4209_v5  ;;  %v3015_v16 = vsel %vm2951_vm15, %v2812_v40, %v2983_v26  ;;  %v2877_v22 = vmul.f32 0.1, %v2662_v8 }
 0x44e   : > { %v3187_v27 = vpack.c.bf16 %v3160_v52, %v3159_v63  ;;  %v2878_v40 = vmul.f32 0.1, %v2664_v0  ;;  %v6071_v63 = vld [vmem:[%s6275_s12] ss:$0 sm:$0xff] }
 0x450   : > { %v2813_v53 = vpop.f32.mrf.mxu2  ;;  %4065 = vmatmul.msk.bf16.gmra.mxu3 %vm610_vm0, %v3187_v27  ;;  %v6058_v19 = vpop.f32.mrf.mxu0 }
 0x451   : > { %v2814_v37 = vadd.f32 %v5908_v45, %v2813_v53 }
 0x452   : > { %v4218_v59 = vpop.permute.xlu2 %4217 }
 0x453   : > { %vm2952_vm2 = vcmp.ge.f32.partialorder %v2814_v37, 0.0  ;;  %v2984_v56 = vmul.f32 0.1, %v2814_v37  ;;  %v4220_v29 = vunpack.i.h.bf16 %v4218_v59  ;;  %v4219_v34 = vunpack.i.l.bf16 %v4218_v59 }
 0x455   : > { %v3016_v17 = vsel %vm2952_vm2, %v2814_v37, %v2984_v56  ;;  %v3164_v28 = vsel %vm976_vm1, %v2908_v14, %v4220_v29  ;;  %v3163_v46 = vsel %vm976_vm1, %v2907_v47, %v4219_v34  ;;  %v2909_v37 = vsel %vm2845_vm11, %v2662_v8, %v2877_v22 }
 0x456   : > { %v4246_v6 = vpack.i.bf16 %v3016_v17, %v3015_v16  ;;  %v3189_v10 = vpack.c.bf16 %v3164_v28, %v3163_v46  ;;  %v2910_v56 = vsel %vm2846_vm12, %v2664_v0, %v2878_v40  ;;  %v2672_v14 = vadd.f32 %v5961_v21, %v6058_v19 }
 0x458   : > { %v2816_v55 = vpop.f32.mrf.mxu2  ;;  %4247 = vrot.lane.b32.xlu2 %v4246_v6, %s4903_s23  ;;  %v2673_v60 = vpop.f32.mrf.mxu0  ;;  %vm2849_vm4 = vcmp.ge.f32.partialorder %v2672_v14, 0.0 }
 0x459   : > { %v2817_v30 = vadd.f32 %v5908_v45, %v2816_v55  ;;  %v2674_v28 = vadd.f32 %v5961_v21, %v2673_v60 }
 0x45a   : > { %v4213_v18 = vpop.permute.xlu1 %4212 }
 0x45b   : > { %v4215_v25 = vunpack.i.h.bf16 %v4213_v18  ;;  %v4214_v2 = vunpack.i.l.bf16 %v4213_v18  ;;  %v2985_v38 = vmul.f32 0.1, %v2817_v30  ;;  %vm2953_vm5 = vcmp.ge.f32.partialorder %v2817_v30, 0.0 }
 0x45d   : > { %v3162_v50 = vsel %vm976_vm1, %v2906_v15, %v4215_v25  ;;  %v3161_v36 = vsel %vm976_vm1, %v2905_v51, %v4214_v2  ;;  %v3017_v41 = vsel %vm2953_vm5, %v2817_v30, %v2985_v38  ;;  %v2667_v30 = vadd.f32 %v5961_v21, %v6042_v49 }
 0x45e   : > { %v3188_v44 = vpack.c.bf16 %v3162_v50, %v3161_v36  ;;  %v2669_v50 = vadd.f32 %v5961_v21, %v6053_v12  ;;  %vm2850_vm5 = vcmp.ge.f32.partialorder %v2674_v28, 0.0 }
 0x45f   : > { %v2879_v39 = vmul.f32 0.1, %v2667_v30  ;;  %vm2847_vm15 = vcmp.ge.f32.partialorder %v2667_v30, 0.0 }
 0x460   : > { %v2818_v24 = vpop.f32.mrf.mxu2  ;;  %4066 = vmatmul.msk.bf16.gmra.mxu3 %vm610_vm0, %v3188_v44  ;;  %v6078_v18 = vpop.f32.mrf.mxu0  ;;  %v2880_v58 = vmul.f32 0.1, %v2669_v50  ;;  %vm2848_vm2 = vcmp.ge.f32.partialorder %v2669_v50, 0.0 }
 0x461   : > { %v2819_v3 = vadd.f32 %v5908_v45, %v2818_v24 }
 0x462   : > { %v2912_v48 = vsel %vm2848_vm2, %v2669_v50, %v2880_v58 }
 0x463   : > { %vm2954_vm6 = vcmp.ge.f32.partialorder %v2819_v3, 0.0  ;;  %v2986_v31 = vmul.f32 0.1, %v2819_v3 }
 0x465   : > { %v3018_v62 = vsel %vm2954_vm6, %v2819_v3, %v2986_v31 }
 0x466   : > { %v4251_v4 = vpack.i.bf16 %v3018_v62, %v3017_v41  ;;  %v2911_v62 = vsel %vm2847_vm15, %v2667_v30, %v2879_v39 }
 0x468   : > { %v2821_v42 = vpop.f32.mrf.mxu2  ;;  %4252 = vrot.lane.b32.xlu0 %v4251_v4, %s4903_s23  ;;  %v2678_v49 = vpop.f32.mrf.mxu0 }
 0x469   : > { %v2822_v9 = vadd.f32 %v5908_v45, %v2821_v42 }
 0x46b   : > { %v2987_v43 = vmul.f32 0.1, %v2822_v9  ;;  %vm2955_vm9 = vcmp.ge.f32.partialorder %v2822_v9, 0.0 }
 0x46d   : > { %v3019_v61 = vsel %vm2955_vm9, %v2822_v9, %v2987_v43  ;;  %v2881_v43 = vmul.f32 0.1, %v2672_v14 }
 0x46f   : > { %v2913_v0 = vsel %vm2849_vm4, %v2672_v14, %v2881_v43 }
 0x470   : > { %v2823_v32 = vpop.f32.mrf.mxu2  ;;  %4067 = vmatmul.msk.bf16.gmra.mxu3 %vm610_vm0, %v3189_v10 }
 0x471   : > { %v2824_v35 = vadd.f32 %v5908_v45, %v2823_v32  ;;  %v2681_v32 = vpop.f32.mrf.mxu0 }
 0x473   : > { %vm2956_vm10 = vcmp.ge.f32.partialorder %v2824_v35, 0.0  ;;  %v2988_v11 = vmul.f32 0.1, %v2824_v35 }
 0x475   : > { %v3020_v20 = vsel %vm2956_vm10, %v2824_v35, %v2988_v11  ;;  %v2882_v35 = vmul.f32 0.1, %v2674_v28 }
 0x476   : > { %v4256_v5 = vpack.i.bf16 %v3020_v20, %v3019_v61 }
 0x477   : > { %v2914_v61 = vsel %vm2850_vm5, %v2674_v28, %v2882_v35 }
 0x478   : > { %v2826_v52 = vpop.f32.mrf.mxu2  ;;  %4257 = vrot.lane.b32.xlu1 %v4256_v5, %s4903_s23 }
 0x479   : > { %v2827_v27 = vadd.f32 %v5908_v45, %v2826_v52  ;;  %v2683_v52 = vpop.f32.mrf.mxu0 }
 0x47a   : > { %v4223_v13 = vpop.permute.xlu0 %4222 }
 0x47b   : > { %v4225_v7 = vunpack.i.h.bf16 %v4223_v13  ;;  %v4224_v53 = vunpack.i.l.bf16 %v4223_v13  ;;  %v3292_v26 = vpop.f32.mrf.mxu3  ;;  %v2989_v1 = vmul.f32 0.1, %v2827_v27  ;;  %vm2957_vm13 = vcmp.ge.f32.partialorder %v2827_v27, 0.0 }
 0x47c   : > { %v3293_v33 = vadd.f32 %v6071_v63, %v3292_v26 }
 0x47d   : > { %v3166_v57 = vsel %vm976_vm1, %v2910_v56, %v4225_v7  ;;  %v3165_v16 = vsel %vm976_vm1, %v2909_v37, %v4224_v53  ;;  %v3021_v15 = vsel %vm2957_vm13, %v2827_v27, %v2989_v1  ;;  %v2677_v27 = vadd.f32 %v5961_v21, %v6078_v18 }
 0x47e   : > { %v3190_v17 = vpack.c.bf16 %v3166_v57, %v3165_v16  ;;  %v3372_v6 = vsub.f32 0.0, %v3293_v33  ;;  %v2679_v7 = vadd.f32 %v5961_v21, %v2678_v49 }
 0x47f   : > { %v2883_v37 = vmul.f32 0.1, %v2677_v27  ;;  %vm2851_vm6 = vcmp.ge.f32.partialorder %v2677_v27, 0.0 }
 0x480   : > { %v3404_v23 = vmul.f32 1.442695, %v3372_v6  ;;  %v2828_v55 = vpop.f32.mrf.mxu2  ;;  %4068 = vmatmul.msk.bf16.gmra.mxu3 %vm610_vm0, %v3190_v17  ;;  %v2884_v56 = vmul.f32 0.1, %v2679_v7  ;;  %vm2852_vm7 = vcmp.ge.f32.partialorder %v2679_v7, 0.0 }
 0x481   : > { %v2829_v25 = vadd.f32 %v5908_v45, %v2828_v55  ;;  %v2686_v57 = vpop.f32.mrf.mxu0 }
 0x482   : > { %4656 = vpow2.f32 %v3404_v23  ;;  %v4233_v10 = vpop.permute.xlu2 %4232  ;;  %v2915_v23 = vsel %vm2851_vm6, %v2677_v27, %v2883_v37  ;;  %v2916_v55 = vsel %vm2852_vm7, %v2679_v7, %v2884_v56 }
 0x483   : > { %vm2958_vm14 = vcmp.ge.f32.partialorder %v2829_v25, 0.0  ;;  %v2990_v2 = vmul.f32 0.1, %v2829_v25  ;;  %v3294_v51 = vpop.f32.mrf.mxu3  ;;  %v4235_v19 = vunpack.i.h.bf16 %v4233_v10  ;;  %v4234_v11 = vunpack.i.l.bf16 %v4233_v10 }
 0x484   : > { %v3295_v36 = vadd.f32 %v6071_v63, %v3294_v51 }
 0x485   : > { %v3022_v44 = vsel %vm2958_vm14, %v2829_v25, %v2990_v2  ;;  %v3170_v5 = vsel %vm976_vm1, %v2914_v61, %v4235_v19  ;;  %v3169_v60 = vsel %vm976_vm1, %v2913_v0, %v4234_v11  ;;  %v2687_v11 = vadd.f32 %v5961_v21, %v2686_v57 }
 0x486   : > { %v3373_v24 = vsub.f32 0.0, %v3295_v36  ;;  %v4261_v38 = vpack.i.bf16 %v3022_v44, %v3021_v15  ;;  %v3192_v40 = vpack.c.bf16 %v3170_v5, %v3169_v60 }
 0x487   : > { %vm2855_vm10 = vcmp.ge.f32.partialorder %v2687_v11, 0.0 }
 0x488   : > { %v4657_v3 = vpop.eup %4656  ;;  %v3406_v45 = vmul.f32 1.442695, %v3373_v24  ;;  %4262 = vrot.lane.b32.xlu2 %v4261_v38, %s4903_s23  ;;  %s6095_s23 = scalar_lea.vmem [#allocation5], %s3725_s20  ;;  %v2682_v38 = vadd.f32 %v5961_v21, %v2681_v32 }
 0x489   : > { %v3468_v31 = vadd.f32 1.0, %v4657_v3  ;;  %v2688_v44 = vpop.f32.mrf.mxu0  ;;  %v2684_v3 = vadd.f32 %v5961_v21, %v2683_v52  ;;  %s3642_s16 = sshll.u32 %s6095_s23, 4  ;;  %s3643_s16 = int_to_ptr.vmem [resolvable:$true] %s3642_s16 }
 0x48a   : > { %4658 = vpow2.f32 %v3406_v45  ;;  %v4228_v59 = vpop.permute.xlu1 %4227  ;;  %vm2853_vm8 = vcmp.ge.f32.partialorder %v2682_v38, 0.0  ;;  %v2689_v0 = vadd.f32 %v5961_v21, %v2688_v44 }
 0x48b   : > { %4660 = vrcp.f32 %v3468_v31  ;;  %v4230_v41 = vunpack.i.h.bf16 %v4228_v59  ;;  %v4229_v12 = vunpack.i.l.bf16 %v4228_v59  ;;  %v2885_v31 = vmul.f32 0.1, %v2682_v38 }
 0x48c   : > { %v2886_v59 = vmul.f32 0.1, %v2684_v3  ;;  %vm2854_vm9 = vcmp.ge.f32.partialorder %v2684_v3, 0.0  ;;  %v2888_v52 = vmul.f32 0.1, %v2689_v0  ;;  %vm2856_vm11 = vcmp.ge.f32.partialorder %v2689_v0, 0.0 }
 0x48d   : > { %v3168_v54 = vsel %vm976_vm1, %v2912_v48, %v4230_v41  ;;  %v3167_v4 = vsel %vm976_vm1, %v2911_v62, %v4229_v12 }
 0x48e   : > { %v3191_v29 = vpack.c.bf16 %v3168_v54, %v3167_v4 }
 0x490   : > { %v4659_v34 = vpop.eup %4658  ;;  %4069 = vmatmul.msk.bf16.gmra.mxu3 %vm610_vm0, %v3191_v29 }
 0x491   : > { %v4661_v42 = vpop.eup %4660  ;;  %v3469_v47 = vadd.f32 1.0, %v4659_v34  ;;  %v2917_v34 = vsel %vm2853_vm8, %v2682_v38, %v2885_v31  ;;  %v2691_v28 = vpop.f32.mrf.mxu0 }
 0x492   : > { %v3532_v46 = vmul.f32 %v4661_v42, %v3293_v33  ;;  %v2918_v42 = vsel %vm2854_vm9, %v2684_v3, %v2886_v59  ;;  %v2692_v38 = vadd.f32 %v5961_v21, %v2691_v28 }
 0x493   : > { %4662 = vrcp.f32 %v3469_v47 }
 0x494   : > { %v3564_v9 = vpack.c.bf16 %v3532_v46, %v3532_v46  ;;  %v2889_v59 = vmul.f32 0.1, %v2692_v38  ;;  %vm2857_vm12 = vcmp.ge.f32.partialorder %v2692_v38, 0.0 }
 0x496   : > { %3597 = vst.msk [vmem:[%s6095_s23] sm:$0xf] %vm3596_vm3, %v3564_v9 }
 0x499   : > { %v4663_v8 = vpop.eup %4662  ;;  %v2693_v27 = vpop.f32.mrf.mxu0 }
 0x49a   : > { %v3533_v20 = vmul.f32 %v4663_v8, %v3295_v36  ;;  %v2694_v3 = vadd.f32 %v5961_v21, %v2693_v27 }
 0x49c   : > { %v3565_v22 = vpack.c.bf16 %v3533_v20, %v3533_v20  ;;  %vm2858_vm13 = vcmp.ge.f32.partialorder %v2694_v3, 0.0 }
 0x49e   : > { %3598 = vst.msk [vmem:[%s6095_s23 + $0x4] sm:$0xf] %vm3596_vm3, %v3565_v22 }
 0x4a0   : > { %4070 = vmatmul.msk.bf16.gmra.mxu3 %vm610_vm0, %v3192_v40  ;;  %v2887_v40 = vmul.f32 0.1, %v2687_v11 }
 0x4a2   : > { %v2919_v57 = vsel %vm2855_vm10, %v2687_v11, %v2887_v40 }
 0x4a3   : > { %v3297_v13 = vpop.f32.mrf.mxu3 }
 0x4a4   : > { %v3298_v53 = vadd.f32 %v6071_v63, %v3297_v13 }
 0x4a6   : > { %v3374_v26 = vsub.f32 0.0, %v3298_v53 }
 0x4a8   : > { %v3408_v33 = vmul.f32 1.442695, %v3374_v26 }
 0x4aa   : > { %4664 = vpow2.f32 %v3408_v33  ;;  %v4238_v16 = vpop.permute.xlu0 %4237 }
 0x4ab   : > { %v4240_v17 = vunpack.i.h.bf16 %v4238_v16  ;;  %v4239_v6 = vunpack.i.l.bf16 %v4238_v16  ;;  %v3299_v1 = vpop.f32.mrf.mxu3  ;;  %v2920_v16 = vsel %vm2856_vm11, %v2689_v0, %v2888_v52 }
 0x4ac   : > { %v3300_v18 = vadd.f32 %v6071_v63, %v3299_v1 }
 0x4ad   : > { %v3172_v25 = vsel %vm976_vm1, %v2916_v55, %v4240_v17  ;;  %v3171_v2 = vsel %vm976_vm1, %v2915_v23, %v4239_v6 }
 0x4ae   : > { %v3193_v51 = vpack.c.bf16 %v3172_v25, %v3171_v2  ;;  %v3375_v15 = vsub.f32 0.0, %v3300_v18 }
 0x4b0   : > { %v4665_v30 = vpop.eup %4664  ;;  %v3410_v50 = vmul.f32 1.442695, %v3375_v15  ;;  %4071 = vmatmul.msk.bf16.gmra.mxu3 %vm610_vm0, %v3193_v51 }
 0x4b1   : > { %v3470_v36 = vadd.f32 1.0, %v4665_v30 }
 0x4b2   : > { %4666 = vpow2.f32 %v3410_v50  ;;  %v4248_v60 = vpop.permute.xlu2 %4247  ;;  %v2696_v50 = vpop.f32.mrf.mxu0 }
 0x4b3   : > { %4668 = vrcp.f32 %v3470_v36  ;;  %v3302_v24 = vpop.f32.mrf.mxu3  ;;  %v4250_v7 = vunpack.i.h.bf16 %v4248_v60 }
 0x4b4   : > { %v3303_v39 = vadd.f32 %v6071_v63, %v3302_v24 }
 0x4b5   : > { %v3176_v6 = vsel %vm976_vm1, %v2920_v16, %v4250_v7 }
 0x4b6   : > { %v3376_v58 = vsub.f32 0.0, %v3303_v39 }
 0x4b8   : > { %v4667_v45 = vpop.eup %4666  ;;  %v3412_v49 = vmul.f32 1.442695, %v3376_v58 }
 0x4b9   : > { %v4669_v41 = vpop.eup %4668  ;;  %v3471_v12 = vadd.f32 1.0, %v4667_v45 }
 0x4ba   : > { %v3534_v62 = vmul.f32 %v4669_v41, %v3298_v53  ;;  %4670 = vpow2.f32 %v3412_v49  ;;  %v4243_v48 = vpop.permute.xlu1 %4242  ;;  %v4249_v53 = vunpack.i.l.bf16 %v4248_v60  ;;  %v2890_v49 = vmul.f32 0.1, %v2694_v3 }
 0x4bb   : > { %4672 = vrcp.f32 %v3471_v12  ;;  %v4245_v54 = vunpack.i.h.bf16 %v4243_v48  ;;  %v4244_v4 = vunpack.i.l.bf16 %v4243_v48  ;;  %v3304_v29 = vpop.f32.mrf.mxu3 }
 0x4bc   : > { %v3566_v47 = vpack.c.bf16 %v3534_v62, %v3534_v62  ;;  %v3305_v14 = vadd.f32 %v6071_v63, %v3304_v29  ;;  %v3175_v1 = vsel %vm976_vm1, %v2919_v57, %v4249_v53 }
 0x4bd   : > { %v3174_v46 = vsel %vm976_vm1, %v2918_v42, %v4245_v54  ;;  %v3173_v9 = vsel %vm976_vm1, %v2917_v34, %v4244_v4  ;;  %v3195_v25 = vpack.c.bf16 %v3176_v6, %v3175_v1  ;;  %v2698_v4 = vpop.f32.mrf.mxu0 }
 0x4be   : > { %3599 = vst.msk [vmem:[%s6095_s23 + $0x8] sm:$0xf] %vm3596_vm3, %v3566_v47  ;;  %v3194_v10 = vpack.c.bf16 %v3174_v46, %v3173_v9  ;;  %v3377_v32 = vsub.f32 0.0, %v3305_v14  ;;  %v2921_v47 = vsel %vm2857_vm12, %v2692_v38, %v2889_v59 }
 0x4c0   : > { %v4671_v43 = vpop.eup %4670  ;;  %v3414_v35 = vmul.f32 1.442695, %v3377_v32  ;;  %4072 = vmatmul.msk.bf16.gmra.mxu3 %vm610_vm0, %v3194_v10 }
 0x4c1   : > { %v4673_v19 = vpop.eup %4672  ;;  %v3472_v8 = vadd.f32 1.0, %v4671_v43 }
 0x4c2   : > { %v3535_v61 = vmul.f32 %v4673_v19, %v3300_v18  ;;  %4674 = vpow2.f32 %v3414_v35 }
 0x4c3   : > { %4676 = vrcp.f32 %v3472_v8  ;;  %v3307_v20 = vpop.f32.mrf.mxu3 }
 0x4c4   : > { %v3567_v5 = vpack.c.bf16 %v3535_v61, %v3535_v61  ;;  %v3308_v22 = vadd.f32 %v6071_v63, %v3307_v20  ;;  %v2697_v20 = vadd.f32 %v5961_v21, %v2696_v50 }
 0x4c5   : > { %v2701_v40 = vpop.f32.mrf.mxu0 }
 0x4c6   : > { %3600 = vst.msk [vmem:[%s6095_s23 + $0xc] sm:$0xf] %vm3596_vm3, %v3567_v5  ;;  %v3378_v13 = vsub.f32 0.0, %v3308_v22  ;;  %v2699_v5 = vadd.f32 %v5961_v21, %v2698_v4  ;;  %v2891_v27 = vmul.f32 0.1, %v2697_v20  ;;  %vm2859_vm14 = vcmp.ge.f32.partialorder %v2697_v20, 0.0 }
 0x4c8   : > { %v4675_v26 = vpop.eup %4674  ;;  %v3416_v37 = vmul.f32 1.442695, %v3378_v13  ;;  %v2892_v7 = vmul.f32 0.1, %v2699_v5  ;;  %vm2860_vm15 = vcmp.ge.f32.partialorder %v2699_v5, 0.0  ;;  %v2923_v6 = vsel %vm2859_vm14, %v2697_v20, %v2891_v27 }
 0x4c9   : > { %v4677_v56 = vpop.eup %4676  ;;  %v3473_v33 = vadd.f32 1.0, %v4675_v26 }
 0x4ca   : > { %v3536_v17 = vmul.f32 %v4677_v56, %v3303_v39  ;;  %4678 = vpow2.f32 %v3416_v37  ;;  %v2924_v1 = vsel %vm2860_vm15, %v2699_v5, %v2892_v7 }
 0x4cb   : > { %4680 = vrcp.f32 %v3473_v33  ;;  %v3309_v23 = vpop.f32.mrf.mxu3 }
 0x4cc   : > { %v3568_v55 = vpack.c.bf16 %v3536_v17, %v3536_v17  ;;  %v3310_v18 = vadd.f32 %v6071_v63, %v3309_v23 }
 0x4ce   : > { %3601 = vst.msk [vmem:[%s6095_s23 + $0x10] sm:$0xf] %vm3596_vm3, %v3568_v55  ;;  %v3379_v2 = vsub.f32 0.0, %v3310_v18 }
 0x4d0   : > { %v4679_v51 = vpop.eup %4678  ;;  %v3418_v15 = vmul.f32 1.442695, %v3379_v2  ;;  %4073 = vmatmul.msk.bf16.gmra.mxu3 %vm610_vm0, %v3195_v25 }
 0x4d1   : > { %v4681_v30 = vpop.eup %4680  ;;  %v3474_v36 = vadd.f32 1.0, %v4679_v51 }
 0x4d2   : > { %v3537_v44 = vmul.f32 %v4681_v30, %v3305_v14  ;;  %4682 = vpow2.f32 %v3418_v15  ;;  %v2922_v14 = vsel %vm2858_vm13, %v2694_v3, %v2890_v49  ;;  %v2703_v15 = vpop.f32.mrf.mxu0 }
 0x4d3   : > { %4684 = vrcp.f32 %v3474_v36  ;;  %v3312_v24 = vpop.f32.mrf.mxu3  ;;  %v2704_v38 = vadd.f32 %v5961_v21, %v2703_v15 }
 0x4d4   : > { %v3569_v39 = vpack.c.bf16 %v3537_v44, %v3537_v44  ;;  %v3313_v58 = vadd.f32 %v6071_v63, %v3312_v24  ;;  %v2702_v44 = vadd.f32 %v5961_v21, %v2701_v40 }
 0x4d5   : > { %v2894_v49 = vmul.f32 0.1, %v2704_v38  ;;  %vm2862_vm4 = vcmp.ge.f32.partialorder %v2704_v38, 0.0 }
 0x4d6   : > { %3602 = vst.msk [vmem:[%s6095_s23 + $0x14] sm:$0xf] %vm3596_vm3, %v3569_v39  ;;  %v3380_v45 = vsub.f32 0.0, %v3313_v58  ;;  %v2893_v59 = vmul.f32 0.1, %v2702_v44  ;;  %vm2861_vm2 = vcmp.ge.f32.partialorder %v2702_v44, 0.0 }
 0x4d8   : > { %v4683_v31 = vpop.eup %4682  ;;  %v3420_v41 = vmul.f32 1.442695, %v3380_v45 }
 0x4d9   : > { %v4685_v12 = vpop.eup %4684  ;;  %v3475_v62 = vadd.f32 1.0, %v4683_v31 }
 0x4da   : > { %v3538_v48 = vmul.f32 %v4685_v12, %v3308_v22  ;;  %4686 = vpow2.f32 %v3420_v41  ;;  %v4253_v54 = vpop.permute.xlu0 %4252 }
 0x4db   : > { %4688 = vrcp.f32 %v3475_v62  ;;  %v4255_v29 = vunpack.i.h.bf16 %v4253_v54  ;;  %v4254_v34 = vunpack.i.l.bf16 %v4253_v54  ;;  %v3314_v42 = vpop.f32.mrf.mxu3 }
 0x4dc   : > { %v3570_v28 = vpack.c.bf16 %v3538_v48, %v3538_v48  ;;  %v3315_v46 = vadd.f32 %v6071_v63, %v3314_v42 }
 0x4dd   : > { %v3178_v9 = vsel %vm976_vm1, %v2922_v14, %v4255_v29  ;;  %v3177_v10 = vsel %vm976_vm1, %v2921_v47, %v4254_v34  ;;  %v2925_v29 = vsel %vm2861_vm2, %v2702_v44, %v2893_v59  ;;  %v2926_v34 = vsel %vm2862_vm4, %v2704_v38, %v2894_v49 }
 0x4de   : > { %3603 = vst.msk [vmem:[%s6095_s23 + $0x18] sm:$0xf] %vm3596_vm3, %v3570_v28  ;;  %v3196_v32 = vpack.c.bf16 %v3178_v9, %v3177_v10  ;;  %v3381_v43 = vsub.f32 0.0, %v3315_v46 }
 0x4e0   : > { %v4687_v35 = vpop.eup %4686  ;;  %v3422_v19 = vmul.f32 1.442695, %v3381_v43  ;;  %4074 = vmatmul.msk.bf16.gmra.mxu3 %vm610_vm0, %v3196_v32 }
 0x4e1   : > { %v4689_v11 = vpop.eup %4688  ;;  %v3476_v8 = vadd.f32 1.0, %v4687_v35 }
 0x4e2   : > { %v3539_v0 = vmul.f32 %v4689_v11, %v3310_v18  ;;  %4690 = vpow2.f32 %v3422_v19  ;;  %v4263_v45 = vpop.permute.xlu2 %4262 }
 0x4e3   : > { %4692 = vrcp.f32 %v3476_v8  ;;  %v3317_v61 = vpop.f32.mrf.mxu3  ;;  %v4265_v12 = vunpack.i.h.bf16 %v4263_v45  ;;  %v4264_v62 = vunpack.i.l.bf16 %v4263_v45 }
 0x4e4   : > { %v3571_v60 = vpack.c.bf16 %v3539_v0, %v3539_v0  ;;  %v3318_v22 = vadd.f32 %v6071_v63, %v3317_v61 }
 0x4e5   : > { %v3181_v47 = vsel %vm976_vm1, %v2925_v29, %v4264_v62  ;;  %v3182_v14 = vsel %vm976_vm1, %v2926_v34, %v4265_v12 }
 0x4e6   : > { %3604 = vst.msk [vmem:[%s6095_s23 + $0x1c] sm:$0xf] %vm3596_vm3, %v3571_v60  ;;  %v3382_v52 = vsub.f32 0.0, %v3318_v22  ;;  %v3198_v10 = vpack.c.bf16 %v3182_v14, %v3181_v47 }
 0x4e8   : > { %v4691_v13 = vpop.eup %4690  ;;  %v3424_v53 = vmul.f32 1.442695, %v3382_v52 }
 0x4e9   : > { %v4693_v26 = vpop.eup %4692  ;;  %v3477_v37 = vadd.f32 1.0, %v4691_v13 }
 0x4ea   : > { %v3540_v56 = vmul.f32 %v4693_v26, %v3313_v58  ;;  %4694 = vpow2.f32 %v3424_v53  ;;  %v4258_v33 = vpop.permute.xlu1 %4257 }
 0x4eb   : > { %4696 = vrcp.f32 %v3477_v37  ;;  %v4260_v57 = vunpack.i.h.bf16 %v4258_v33  ;;  %v4259_v16 = vunpack.i.l.bf16 %v4258_v33  ;;  %v3319_v17 = vpop.f32.mrf.mxu3 }
 0x4ec   : > { %v3572_v23 = vpack.c.bf16 %v3540_v56, %v3540_v56  ;;  %v3320_v55 = vadd.f32 %v6071_v63, %v3319_v17 }
 0x4ed   : > { %v3180_v18 = vsel %vm976_vm1, %v2924_v1, %v4260_v57  ;;  %v3179_v25 = vsel %vm976_vm1, %v2923_v6, %v4259_v16 }
 0x4ee   : > { %3605 = vst.msk [vmem:[%s6095_s23 + $0x20] sm:$0xf] %vm3596_vm3, %v3572_v23  ;;  %v3197_v2 = vpack.c.bf16 %v3180_v18, %v3179_v25  ;;  %v3383_v51 = vsub.f32 0.0, %v3320_v55 }
 0x4f0   : > { %v4695_v30 = vpop.eup %4694  ;;  %v3426_v50 = vmul.f32 1.442695, %v3383_v51  ;;  %4075 = vmatmul.msk.bf16.gmra.mxu3 %vm610_vm0, %v3197_v2 }
 0x4f1   : > { %v4697_v36 = vpop.eup %4696  ;;  %v3478_v24 = vadd.f32 1.0, %v4695_v30 }
 0x4f2   : > { %v3541_v3 = vmul.f32 %v4697_v36, %v3315_v46  ;;  %4698 = vpow2.f32 %v3426_v50 }
 0x4f3   : > { %4700 = vrcp.f32 %v3478_v24  ;;  %v3322_v39 = vpop.f32.mrf.mxu3 }
 0x4f4   : > { %v3573_v58 = vpack.c.bf16 %v3541_v3, %v3541_v3  ;;  %v3323_v31 = vadd.f32 %v6071_v63, %v3322_v39 }
 0x4f6   : > { %3606 = vst.msk [vmem:[%s6095_s23 + $0x24] sm:$0xf] %vm3596_vm3, %v3573_v58  ;;  %v3384_v41 = vsub.f32 0.0, %v3323_v31 }
 0x4f8   : > { %v4699_v48 = vpop.eup %4698  ;;  %v3428_v21 = vmul.f32 1.442695, %v3384_v41 }
 0x4f9   : > { %v4701_v54 = vpop.eup %4700  ;;  %v3479_v4 = vadd.f32 1.0, %v4699_v48 }
 0x4fa   : > { %v3542_v42 = vmul.f32 %v4701_v54, %v3318_v22  ;;  %4702 = vpow2.f32 %v3428_v21 }
 0x4fb   : > { %4704 = vrcp.f32 %v3479_v4  ;;  %v3324_v28 = vpop.f32.mrf.mxu3 }
 0x4fc   : > { %v3574_v46 = vpack.c.bf16 %v3542_v42, %v3542_v42  ;;  %v3325_v9 = vadd.f32 %v6071_v63, %v3324_v28 }
 0x4fe   : > { %3607 = vst.msk [vmem:[%s6095_s23 + $0x28] sm:$0xf] %vm3596_vm3, %v3574_v46  ;;  %v3385_v32 = vsub.f32 0.0, %v3325_v9 }
 0x500   : > { %v4703_v43 = vpop.eup %4702  ;;  %v3430_v35 = vmul.f32 1.442695, %v3385_v32  ;;  %4076 = vmatmul.msk.bf16.gmra.mxu3 %vm610_vm0, %v3198_v10 }
 0x501   : > { %v4705_v19 = vpop.eup %4704  ;;  %v3480_v11 = vadd.f32 1.0, %v4703_v43 }
 0x502   : > { %v3543_v8 = vmul.f32 %v4705_v19, %v3320_v55  ;;  %4706 = vpow2.f32 %v3430_v35 }
 0x503   : > { %4708 = vrcp.f32 %v3480_v11  ;;  %v3327_v0 = vpop.f32.mrf.mxu3 }
 0x504   : > { %v3575_v61 = vpack.c.bf16 %v3543_v8, %v3543_v8  ;;  %v3328_v20 = vadd.f32 %v6071_v63, %v3327_v0 }
 0x506   : > { %3608 = vst.msk [vmem:[%s6095_s23 + $0x2c] sm:$0xf] %vm3596_vm3, %v3575_v61  ;;  %v3386_v5 = vsub.f32 0.0, %v3328_v20 }
 0x508   : > { %v4707_v60 = vpop.eup %4706  ;;  %v3432_v22 = vmul.f32 1.442695, %v3386_v5 }
 0x509   : > { %v4709_v40 = vpop.eup %4708  ;;  %v3481_v52 = vadd.f32 1.0, %v4707_v60 }
 0x50a   : > { %v3544_v13 = vmul.f32 %v4709_v40, %v3323_v31  ;;  %4710 = vpow2.f32 %v3432_v22 }
 0x50b   : > { %4712 = vrcp.f32 %v3481_v52  ;;  %v3329_v27 = vpop.f32.mrf.mxu3 }
 0x50c   : > { %v3576_v7 = vpack.c.bf16 %v3544_v13, %v3544_v13  ;;  %v3330_v53 = vadd.f32 %v6071_v63, %v3329_v27 }
 0x50e   : > { %3609 = vst.msk [vmem:[%s6095_s23 + $0x30] sm:$0xf] %vm3596_vm3, %v3576_v7  ;;  %v3387_v26 = vsub.f32 0.0, %v3330_v53 }
 0x510   : > { %v4711_v37 = vpop.eup %4710  ;;  %v3434_v56 = vmul.f32 1.442695, %v3387_v26 }
 0x511   : > { %v4713_v33 = vpop.eup %4712  ;;  %v3482_v57 = vadd.f32 1.0, %v4711_v37 }
 0x512   : > { %v3545_v16 = vmul.f32 %v4713_v33, %v3325_v9  ;;  %4714 = vpow2.f32 %v3434_v56 }
 0x513   : > { %4716 = vrcp.f32 %v3482_v57  ;;  %v3332_v17 = vpop.f32.mrf.mxu3 }
 0x514   : > { %v3577_v6 = vpack.c.bf16 %v3545_v16, %v3545_v16  ;;  %v3333_v1 = vadd.f32 %v6071_v63, %v3332_v17 }
 0x516   : > { %3610 = vst.msk [vmem:[%s6095_s23 + $0x34] sm:$0xf] %vm3596_vm3, %v3577_v6  ;;  %v3388_v23 = vsub.f32 0.0, %v3333_v1 }
 0x518   : > { %v4715_v55 = vpop.eup %4714  ;;  %v3436_v18 = vmul.f32 1.442695, %v3388_v23 }
 0x519   : > { %v4717_v25 = vpop.eup %4716  ;;  %v3483_v2 = vadd.f32 1.0, %v4715_v55 }
 0x51a   : > { %v3546_v51 = vmul.f32 %v4717_v25, %v3328_v20  ;;  %4718 = vpow2.f32 %v3436_v18 }
 0x51b   : > { %4720 = vrcp.f32 %v3483_v2  ;;  %v3334_v15 = vpop.f32.mrf.mxu3 }
 0x51c   : > { %v3578_v30 = vpack.c.bf16 %v3546_v51, %v3546_v51  ;;  %v3335_v50 = vadd.f32 %v6071_v63, %v3334_v15 }
 0x51e   : > { %3611 = vst.msk [vmem:[%s6095_s23 + $0x38] sm:$0xf] %vm3596_vm3, %v3578_v30  ;;  %v3389_v36 = vsub.f32 0.0, %v3335_v50 }
 0x520   : > { %v4719_v44 = vpop.eup %4718  ;;  %v3438_v24 = vmul.f32 1.442695, %v3389_v36 }
 0x521   : > { %v4721_v38 = vpop.eup %4720  ;;  %v3484_v3 = vadd.f32 1.0, %v4719_v44 }
 0x522   : > { %v3547_v39 = vmul.f32 %v4721_v38, %v3330_v53  ;;  %4722 = vpow2.f32 %v3438_v24 }
 0x523   : > { %4724 = vrcp.f32 %v3484_v3  ;;  %v3337_v58 = vpop.f32.mrf.mxu3 }
 0x524   : > { %v3579_v45 = vpack.c.bf16 %v3547_v39, %v3547_v39  ;;  %v3338_v31 = vadd.f32 %v6071_v63, %v3337_v58 }
 0x526   : > { %3612 = vst.msk [vmem:[%s6095_s23 + $0x3c] sm:$0xf] %vm3596_vm3, %v3579_v45  ;;  %v3390_v59 = vsub.f32 0.0, %v3338_v31 }
 0x528   : > { %v4723_v49 = vpop.eup %4722  ;;  %v3440_v41 = vmul.f32 1.442695, %v3390_v59 }
 0x529   : > { %v4725_v12 = vpop.eup %4724  ;;  %v3485_v62 = vadd.f32 1.0, %v4723_v49 }
 0x52a   : > { %v3548_v48 = vmul.f32 %v4725_v12, %v3333_v1  ;;  %4726 = vpow2.f32 %v3440_v41 }
 0x52b   : > { %4728 = vrcp.f32 %v3485_v62  ;;  %v3339_v21 = vpop.f32.mrf.mxu3 }
 0x52c   : > { %v3580_v54 = vpack.c.bf16 %v3548_v48, %v3548_v48  ;;  %v3340_v4 = vadd.f32 %v6071_v63, %v3339_v21 }
 0x52e   : > { %3613 = vst.msk [vmem:[%s6095_s23 + $0x40] sm:$0xf] %vm3596_vm3, %v3580_v54  ;;  %v3391_v29 = vsub.f32 0.0, %v3340_v4 }
 0x530   : > { %v4727_v34 = vpop.eup %4726  ;;  %v3442_v42 = vmul.f32 1.442695, %v3391_v29 }
 0x531   : > { %v4729_v47 = vpop.eup %4728  ;;  %v3486_v14 = vadd.f32 1.0, %v4727_v34 }
 0x532   : > { %v3549_v28 = vmul.f32 %v4729_v47, %v3335_v50  ;;  %4730 = vpow2.f32 %v3442_v42 }
 0x533   : > { %4732 = vrcp.f32 %v3486_v14  ;;  %v3342_v46 = vpop.f32.mrf.mxu3 }
 0x534   : > { %v3581_v9 = vpack.c.bf16 %v3549_v28, %v3549_v28  ;;  %v3343_v10 = vadd.f32 %v6071_v63, %v3342_v46 }
 0x536   : > { %3614 = vst.msk [vmem:[%s6095_s23 + $0x44] sm:$0xf] %vm3596_vm3, %v3581_v9  ;;  %v3392_v32 = vsub.f32 0.0, %v3343_v10 }
 0x538   : > { %v4731_v43 = vpop.eup %4730  ;;  %v3444_v35 = vmul.f32 1.442695, %v3392_v32 }
 0x539   : > { %v4733_v19 = vpop.eup %4732  ;;  %v3487_v11 = vadd.f32 1.0, %v4731_v43 }
 0x53a   : > { %v3550_v8 = vmul.f32 %v4733_v19, %v3338_v31  ;;  %4734 = vpow2.f32 %v3444_v35 }
 0x53b   : > { %4736 = vrcp.f32 %v3487_v11  ;;  %v3344_v0 = vpop.f32.mrf.mxu3 }
 0x53c   : > { %v3582_v61 = vpack.c.bf16 %v3550_v8, %v3550_v8  ;;  %v3345_v20 = vadd.f32 %v6071_v63, %v3344_v0 }
 0x53e   : > { %3615 = vst.msk [vmem:[%s6095_s23 + $0x48] sm:$0xf] %vm3596_vm3, %v3582_v61  ;;  %v3393_v5 = vsub.f32 0.0, %v3345_v20 }
 0x540   : > { %v4735_v60 = vpop.eup %4734  ;;  %v3446_v22 = vmul.f32 1.442695, %v3393_v5 }
 0x541   : > { %v4737_v40 = vpop.eup %4736  ;;  %v3488_v52 = vadd.f32 1.0, %v4735_v60 }
 0x542   : > { %v3551_v13 = vmul.f32 %v4737_v40, %v3340_v4  ;;  %4738 = vpow2.f32 %v3446_v22 }
 0x543   : > { %4740 = vrcp.f32 %v3488_v52  ;;  %v3347_v27 = vpop.f32.mrf.mxu3 }
 0x544   : > { %v3583_v7 = vpack.c.bf16 %v3551_v13, %v3551_v13  ;;  %v3348_v53 = vadd.f32 %v6071_v63, %v3347_v27 }
 0x546   : > { %3616 = vst.msk [vmem:[%s6095_s23 + $0x4c] sm:$0xf] %vm3596_vm3, %v3583_v7  ;;  %v3394_v26 = vsub.f32 0.0, %v3348_v53 }
 0x548   : > { %v4739_v37 = vpop.eup %4738  ;;  %v3448_v56 = vmul.f32 1.442695, %v3394_v26 }
 0x549   : > { %v4741_v33 = vpop.eup %4740  ;;  %v3489_v57 = vadd.f32 1.0, %v4739_v37 }
 0x54a   : > { %v3552_v16 = vmul.f32 %v4741_v33, %v3343_v10  ;;  %4742 = vpow2.f32 %v3448_v56 }
 0x54b   : > { %4744 = vrcp.f32 %v3489_v57  ;;  %v3349_v17 = vpop.f32.mrf.mxu3 }
 0x54c   : > { %v3584_v6 = vpack.c.bf16 %v3552_v16, %v3552_v16  ;;  %v3350_v1 = vadd.f32 %v6071_v63, %v3349_v17 }
 0x54e   : > { %3617 = vst.msk [vmem:[%s6095_s23 + $0x50] sm:$0xf] %vm3596_vm3, %v3584_v6  ;;  %v3395_v23 = vsub.f32 0.0, %v3350_v1 }
 0x550   : > { %v4743_v55 = vpop.eup %4742  ;;  %v3450_v18 = vmul.f32 1.442695, %v3395_v23 }
 0x551   : > { %v4745_v25 = vpop.eup %4744  ;;  %v3490_v2 = vadd.f32 1.0, %v4743_v55 }
 0x552   : > { %v3553_v51 = vmul.f32 %v4745_v25, %v3345_v20  ;;  %4746 = vpow2.f32 %v3450_v18 }
 0x553   : > { %4748 = vrcp.f32 %v3490_v2  ;;  %v3352_v15 = vpop.f32.mrf.mxu3 }
 0x554   : > { %v3585_v30 = vpack.c.bf16 %v3553_v51, %v3553_v51  ;;  %v3353_v50 = vadd.f32 %v6071_v63, %v3352_v15 }
 0x556   : > { %3618 = vst.msk [vmem:[%s6095_s23 + $0x54] sm:$0xf] %vm3596_vm3, %v3585_v30  ;;  %v3396_v36 = vsub.f32 0.0, %v3353_v50 }
 0x558   : > { %v4747_v44 = vpop.eup %4746  ;;  %v3452_v24 = vmul.f32 1.442695, %v3396_v36 }
 0x559   : > { %v4749_v38 = vpop.eup %4748  ;;  %v3491_v3 = vadd.f32 1.0, %v4747_v44 }
 0x55a   : > { %v3554_v39 = vmul.f32 %v4749_v38, %v3348_v53  ;;  %4750 = vpow2.f32 %v3452_v24 }
 0x55b   : > { %4752 = vrcp.f32 %v3491_v3  ;;  %v3354_v58 = vpop.f32.mrf.mxu3 }
 0x55c   : > { %v3586_v45 = vpack.c.bf16 %v3554_v39, %v3554_v39  ;;  %v3355_v31 = vadd.f32 %v6071_v63, %v3354_v58 }
 0x55e   : > { %3619 = vst.msk [vmem:[%s6095_s23 + $0x58] sm:$0xf] %vm3596_vm3, %v3586_v45  ;;  %v3397_v59 = vsub.f32 0.0, %v3355_v31 }
 0x560   : > { %v4751_v49 = vpop.eup %4750  ;;  %v3454_v41 = vmul.f32 1.442695, %v3397_v59 }
 0x561   : > { %v4753_v12 = vpop.eup %4752  ;;  %v3492_v62 = vadd.f32 1.0, %v4751_v49 }
 0x562   : > { %v3555_v48 = vmul.f32 %v4753_v12, %v3350_v1  ;;  %4754 = vpow2.f32 %v3454_v41 }
 0x563   : > { %4756 = vrcp.f32 %v3492_v62  ;;  %v3357_v21 = vpop.f32.mrf.mxu3 }
 0x564   : > { %v3587_v54 = vpack.c.bf16 %v3555_v48, %v3555_v48  ;;  %v3358_v4 = vadd.f32 %v6071_v63, %v3357_v21 }
 0x566   : > { %3620 = vst.msk [vmem:[%s6095_s23 + $0x5c] sm:$0xf] %vm3596_vm3, %v3587_v54  ;;  %v3398_v29 = vsub.f32 0.0, %v3358_v4 }
 0x568   : > { %v4755_v34 = vpop.eup %4754  ;;  %v3456_v42 = vmul.f32 1.442695, %v3398_v29 }
 0x569   : > { %v4757_v47 = vpop.eup %4756  ;;  %v3493_v14 = vadd.f32 1.0, %v4755_v34 }
 0x56a   : > { %v3556_v28 = vmul.f32 %v4757_v47, %v3353_v50  ;;  %4758 = vpow2.f32 %v3456_v42  ;;  %v4802_v50 = vld [vmem:[%s6275_s12] ss:$0 sm:$0xff] }
 0x56b   : > { %4760 = vrcp.f32 %v3493_v14  ;;  %v3359_v46 = vpop.f32.mrf.mxu3 }
 0x56c   : > { %v3588_v9 = vpack.c.bf16 %v3556_v28, %v3556_v28  ;;  %v3360_v10 = vadd.f32 %v6071_v63, %v3359_v46 }
 0x56e   : > { %3621 = vst.msk [vmem:[%s6095_s23 + $0x60] sm:$0xf] %vm3596_vm3, %v3588_v9  ;;  %v3399_v32 = vsub.f32 0.0, %v3360_v10 }
 0x570   : > { %v4759_v43 = vpop.eup %4758  ;;  %v3458_v35 = vmul.f32 1.442695, %v3399_v32 }
 0x571   : > { %v4761_v19 = vpop.eup %4760  ;;  %v3494_v11 = vadd.f32 1.0, %v4759_v43 }
 0x572   : > { %v3557_v8 = vmul.f32 %v4761_v19, %v3355_v31  ;;  %4762 = vpow2.f32 %v3458_v35 }
 0x573   : > { %4764 = vrcp.f32 %v3494_v11  ;;  %v3362_v0 = vpop.f32.mrf.mxu3 }
 0x574   : > { %v3589_v61 = vpack.c.bf16 %v3557_v8, %v3557_v8  ;;  %v3363_v20 = vadd.f32 %v6071_v63, %v3362_v0 }
 0x576   : > { %3622 = vst.msk [vmem:[%s6095_s23 + $0x64] sm:$0xf] %vm3596_vm3, %v3589_v61  ;;  %v3400_v5 = vsub.f32 0.0, %v3363_v20 }
 0x578   : > { %v4763_v60 = vpop.eup %4762  ;;  %v3460_v22 = vmul.f32 1.442695, %v3400_v5 }
 0x579   : > { %v4765_v40 = vpop.eup %4764  ;;  %v3495_v52 = vadd.f32 1.0, %v4763_v60 }
 0x57a   : > { %v3558_v13 = vmul.f32 %v4765_v40, %v3358_v4  ;;  %4766 = vpow2.f32 %v3460_v22 }
 0x57b   : > { %4768 = vrcp.f32 %v3495_v52  ;;  %v3364_v27 = vpop.f32.mrf.mxu3 }
 0x57c   : > { %v3590_v7 = vpack.c.bf16 %v3558_v13, %v3558_v13  ;;  %v3365_v53 = vadd.f32 %v6071_v63, %v3364_v27 }
 0x57e   : > { %3623 = vst.msk [vmem:[%s6095_s23 + $0x68] sm:$0xf] %vm3596_vm3, %v3590_v7  ;;  %v3401_v26 = vsub.f32 0.0, %v3365_v53 }
 0x580   : > { %v4767_v37 = vpop.eup %4766  ;;  %v3462_v56 = vmul.f32 1.442695, %v3401_v26 }
 0x581   : > { %v4769_v33 = vpop.eup %4768  ;;  %v3496_v57 = vadd.f32 1.0, %v4767_v37 }
 0x582   : > { %v3559_v16 = vmul.f32 %v4769_v33, %v3360_v10  ;;  %4770 = vpow2.f32 %v3462_v56 }
 0x583   : > { %4772 = vrcp.f32 %v3496_v57  ;;  %v3367_v17 = vpop.f32.mrf.mxu3 }
 0x584   : > { %v3591_v6 = vpack.c.bf16 %v3559_v16, %v3559_v16  ;;  %v3368_v1 = vadd.f32 %v6071_v63, %v3367_v17 }
 0x586   : > { %3624 = vst.msk [vmem:[%s6095_s23 + $0x6c] sm:$0xf] %vm3596_vm3, %v3591_v6  ;;  %v3402_v23 = vsub.f32 0.0, %v3368_v1 }
 0x588   : > { %v4771_v55 = vpop.eup %4770  ;;  %v3464_v18 = vmul.f32 1.442695, %v3402_v23 }
 0x589   : > { %v4773_v25 = vpop.eup %4772  ;;  %v3497_v2 = vadd.f32 1.0, %v4771_v55 }
 0x58a   : > { %v3560_v51 = vmul.f32 %v4773_v25, %v3363_v20  ;;  %4774 = vpow2.f32 %v3464_v18 }
 0x58b   : > { %4776 = vrcp.f32 %v3497_v2  ;;  %v3369_v15 = vpop.f32.mrf.mxu3 }
 0x58c   : > { %v3592_v30 = vpack.c.bf16 %v3560_v51, %v3560_v51  ;;  %v3370_v36 = vadd.f32 %v4802_v50, %v3369_v15 }
 0x58e   : > { %3625 = vst.msk [vmem:[%s6095_s23 + $0x70] sm:$0xf] %vm3596_vm3, %v3592_v30  ;;  %v3403_v63 = vsub.f32 0.0, %v3370_v36 }
 0x590   : > { %v4775_v44 = vpop.eup %4774  ;;  %v3466_v24 = vmul.f32 1.442695, %v3403_v63 }
 0x591   : > { %v4777_v38 = vpop.eup %4776  ;;  %v3498_v3 = vadd.f32 1.0, %v4775_v44 }
 0x592   : > { %v3561_v39 = vmul.f32 %v4777_v38, %v3365_v53  ;;  %4778 = vpow2.f32 %v3466_v24 }
 0x593   : > { %4780 = vrcp.f32 %v3498_v3 }
 0x594   : > { %v3593_v58 = vpack.c.bf16 %v3561_v39, %v3561_v39 }
 0x596   : > { %3626 = vst.msk [vmem:[%s6095_s23 + $0x74] sm:$0xf] %vm3596_vm3, %v3593_v58 }
 0x598   : > { %v4779_v45 = vpop.eup %4778 }
 0x599   : > { %v4781_v31 = vpop.eup %4780  ;;  %v3499_v59 = vadd.f32 1.0, %v4779_v45 }
 0x59a   : > { %v3562_v49 = vmul.f32 %v4781_v31, %v3368_v1 }
 0x59b   : > { %4782 = vrcp.f32 %v3499_v59 }
 0x59c   : > { %v3594_v41 = vpack.c.bf16 %v3562_v49, %v3562_v49 }
 0x59e   : > { %3627 = vst.msk [vmem:[%s6095_s23 + $0x78] sm:$0xf] %vm3596_vm3, %v3594_v41 }
 0x5a1   : > { %v4783_v12 = vpop.eup %4782 }
 0x5a2   : > { %v3563_v62 = vmul.f32 %v4783_v12, %v3370_v36 }
 0x5a4   : > { %v3595_v48 = vpack.c.bf16 %v3563_v62, %v3563_v62 }
 0x5a6   : > { %3628 = vst.msk [vmem:[%s6095_s23 + $0x7c] sm:$0xf] %vm3596_vm3, %v3595_v48 }
 0x5a7   : > { %4860 = shalt.err (!%p4857_p4)
}
 0x5a8   : > { %s4906_s30 = smov 4  }
 0x5a9   : > { %4136 = dma.vmem_to_hbm [thread:$0]  (%p5027_p11), %s3643_s16, 2048, %s3645_s21, %s3630_s17, %s4904_s18, %s4904_s18, %s4906_s30  }
 0x5aa PF: > { %s6308_s23 = sld [smem:[#allocation8_spill]]  ;;  %p6310_p7 = scmp.ge.s32.totalorder %s4899_s28, 2 }
 0x5ac   : > { %p4143_p5 = pnand %p6310_p7, %p5031_p12 }
 0x5ae   : > { %p4144_p8 = pneg %p4143_p5 }
 0x5b0   : > { %s3659_s20 = sand.u32 1, %s6308_s23  }
 0x5b1   : > { %s3660_s13 = scalar_lea.sflag [#allocation4], %s3659_s20 }
 0x5b2   : > { %4882 = dma.done.wait (%p4144_p8), %s3660_s13, 2048  }
 0x5b3   : > { %4884 = vsyncadd (%p4144_p8), %s3660_s13, 4294965248  ;;  %s6311_s28 = sld [smem:[#allocation10_spill]]  ;;  %s6314_s25 = smov %s4891_s26 }
 0x5b4   : > { %s6312_s29 = sld [smem:[#allocation9_spill]] }
 0x5b5   : > { %s6313_s27 = sld [smem:[#allocation11_spill]] }
 0x5b9   : > { %p26_p10 = scmp.ge.s32.totalorder %s6311_s28, 4  }
 0x5ba   : > { %s6315_s26 = smov %s6312_s29 }
 0x5bb   :  { %28 = sbr.rel (!%p26_p10) target bundleno = 7 (0x7), region = 119 }
 0x5c0   :  { %3666 = vsyncpa [#allocation3], 1 }
 0x5c1   :  { %3668 = vsyncpa [#allocation3 + $0x1], 1 }
 0x5c2   :  { %3669 = vsyncpa [#allocation4], 1 }
 0x5c3   :  { %3671 = vsyncpa [#allocation4 + $0x1], 1 }

</bundles_post_ra>
